<compile_context>
chip_gen: v5e
topology: v5e:2x2
jax: 0.10.0
libtpu: 0.0.40
codegen_flags: <defaults>
</compile_context>

<pallas_src>
import jax
import jax.numpy as jnp
from jax import lax
from jax.experimental import pallas as pl
from jax.experimental.pallas import tpu as pltpu
import numpy as np


def bottleneck_kernel(x_ref, w1_ref, s1_ref, b1_ref,
                      w2_ref, s2_ref, b2_ref,
                      w3_ref, s3_ref, b3_ref,
                      o_ref, cc_ref, acc_ref):
    H, W, Cin = x_ref.shape[1], x_ref.shape[2], x_ref.shape[3]
    width = w1_ref.shape[1]
    Cout = o_ref.shape[3]

    x2d = x_ref[0].reshape(H * W, Cin)            # f32; also the identity path

    # --- conv1 (1x1, bias=False) + bn1 + relu ---------------------------
    y1 = jnp.dot(x2d.astype(jnp.bfloat16), w1_ref[...],
                 preferred_element_type=jnp.float32)
    y1 = jnp.maximum(y1 * s1_ref[...] + b1_ref[...], 0.0)    # (H*W, width) f32

    # --- conv2 (3x3, stride=1, pad=1, bias=False) + bn2 + relu ----------
    # Channel-concat im2col along W:
    #   cc[h+1, w, kx*width:(kx+1)*width] = y1[h, w+kx-1]   (zero outside).
    # The W shift is produced once at the value level; every ky tap below
    # slices cc_ref only along the untiled leading axis.
    wpos = lax.broadcasted_iota(jnp.int32, (H * W, width), 0) % W
    zrow = jnp.zeros((1, width), jnp.float32)
    shift_dn = jnp.concatenate([zrow, y1[:H * W - 1, :]], axis=0)   # y1[i-1]
    shift_up = jnp.concatenate([y1[1:, :], zrow], axis=0)           # y1[i+1]
    left = jnp.where(wpos == 0, 0.0, shift_dn)        # y1[h, w-1], 0 at w=0
    right = jnp.where(wpos == W - 1, 0.0, shift_up)   # y1[h, w+1], 0 at w=W-1

    zhalo = jnp.zeros((1, W, 3 * width), jnp.bfloat16)
    cc_ref[0:1, :, :] = zhalo                         # top halo row (y1 row -1)
    cc_ref[H + 1:H + 2, :, :] = zhalo                 # bottom halo row (y1 row H)
    cc_ref[1:H + 1, :, 0:width] = (
        left.reshape(H, W, width).astype(jnp.bfloat16))
    cc_ref[1:H + 1, :, width:2 * width] = (
        y1.reshape(H, W, width).astype(jnp.bfloat16))
    cc_ref[1:H + 1, :, 2 * width:3 * width] = (
        right.reshape(H, W, width).astype(jnp.bfloat16))

    for ky in range(3):                               # leading-axis slices only
        patch = cc_ref[ky:ky + H, :, :].reshape(H * W, 3 * width)   # bf16
        tap = jnp.dot(patch, w2_ref[ky], preferred_element_type=jnp.float32)
        if ky == 0:
            acc_ref[...] = tap
        else:
            acc_ref[...] += tap
    y2 = jnp.maximum(acc_ref[...] * s2_ref[...] + b2_ref[...], 0.0)

    # --- conv3 (1x1, bias=False) + bn3 + residual add + relu ------------
    y3 = jnp.dot(y2.astype(jnp.bfloat16), w3_ref[...],
                 preferred_element_type=jnp.float32)
    y3 = y3 * s3_ref[...] + b3_ref[...] + x2d         # identity shortcut (f32)
    o_ref[0] = jnp.maximum(y3, 0.0).reshape(H, W, Cout)


def bottleneck_forward(x_nchw, params):
    """x_nchw: [N, Cin, H, W] float32; returns [N, Cout, H, W] float32."""
    x = jnp.transpose(x_nchw, (0, 2, 3, 1))   # NCHW -> NHWC
    N, H, W, Cin = x.shape
    w1, s1, b1, w2, s2, b2, w3, s3, b3 = params
    width = w1.shape[1]
    Cout = w3.shape[1]

    # MXU-friendly operand prep (once, outside the kernel): bf16 weights; the
    # 3x3 kernel reshaped so each ky tap is a (3*width, width) matrix whose
    # rows are the [kx=0 | kx=1 | kx=2] input-channel blocks.
    w1b = w1.astype(jnp.bfloat16)
    w2b = w2.reshape(3, 3 * width, width).astype(jnp.bfloat16)
    w3b = w3.astype(jnp.bfloat16)

    def const_spec(a):
        r = a.ndim
        # Constant block index every grid step -> fetched once, revisited
        # (no per-image re-DMA of weights / BN constants).
        return pl.BlockSpec(a.shape, lambda n, _r=r: (0,) * _r)

    out = pl.pallas_call(
        bottleneck_kernel,
        out_shape=jax.ShapeDtypeStruct((N, H, W, Cout), jnp.float32),
        grid=(N,),
        in_specs=[
            pl.BlockSpec((1, H, W, Cin), lambda n: (n, 0, 0, 0)),
            const_spec(w1b), const_spec(s1), const_spec(b1),
            const_spec(w2b), const_spec(s2), const_spec(b2),
            const_spec(w3b), const_spec(s3), const_spec(b3),
        ],
        out_specs=pl.BlockSpec((1, H, W, Cout), lambda n: (n, 0, 0, 0)),
        scratch_shapes=[
            pltpu.VMEM((H + 2, W, 3 * width), jnp.bfloat16),  # im2col staging
            pltpu.VMEM((H * W, width), jnp.float32),          # conv2 accumulator
        ],
        compiler_params=pltpu.CompilerParams(
            dimension_semantics=("parallel",)),   # v7x: shard batch over 2 TCs
    )(x, w1b, s1, b1, w2b, s2, b2, w3b, s3, b3)
    return jnp.transpose(out, (0, 3, 1, 2))   # NHWC -> NCHW


def init_params(key, inplanes, planes, base_width=64, groups=1, eps=1e-5):
    expansion = 4
    width = int(planes * (base_width / 64.0)) * groups
    cout = planes * expansion
    ks = jax.random.split(key, 15)

    def bn_fold(kg, kb, km, kv, c):
        gamma = jax.random.uniform(kg, (c,), minval=0.5, maxval=1.5)
        beta = jax.random.uniform(kb, (c,), minval=-0.2, maxval=0.2)
        mean = jax.random.uniform(km, (c,), minval=-0.1, maxval=0.1)
        var = jax.random.uniform(kv, (c,), minval=0.5, maxval=1.5)
        scale = gamma / jnp.sqrt(var + eps)
        bias = beta - mean * scale
        return (scale.reshape(1, c).astype(jnp.float32),
                bias.reshape(1, c).astype(jnp.float32))

    w1 = (0.1 * jax.random.normal(ks[0], (inplanes, width))).astype(jnp.float32)
    s1, b1 = bn_fold(ks[1], ks[2], ks[3], ks[4], width)
    w2 = (0.1 * jax.random.normal(ks[5], (3, 3, width, width))).astype(jnp.float32)
    s2, b2 = bn_fold(ks[6], ks[7], ks[8], ks[9], width)
    w3 = (0.1 * jax.random.normal(ks[10], (width, cout))).astype(jnp.float32)
    s3, b3 = bn_fold(ks[11], ks[12], ks[13], ks[14], cout)
    return (w1, s1, b1, w2, s2, b2, w3, s3, b3)


def reference_forward(x_nchw, params):
    """Pure-JAX f32 reference (lax convs) for correctness checking."""
    x = jnp.transpose(x_nchw, (0, 2, 3, 1))
    w1, s1, b1, w2, s2, b2, w3, s3, b3 = params
    dn = ('NHWC', 'HWIO', 'NHWC')
    c = lambda v: v.reshape(1, 1, 1, -1)
    y = lax.conv_general_dilated(x, w1.reshape(1, 1, *w1.shape), (1, 1),
                                 'VALID', dimension_numbers=dn)
    y = jnp.maximum(y * c(s1) + c(b1), 0.0)
    y = lax.conv_general_dilated(y, w2, (1, 1), ((1, 1), (1, 1)),
                                 dimension_numbers=dn)
    y = jnp.maximum(y * c(s2) + c(b2), 0.0)
    y = lax.conv_general_dilated(y, w3.reshape(1, 1, *w3.shape), (1, 1),
                                 'VALID', dimension_numbers=dn)
    y = y * c(s3) + c(b3)
    y = jnp.maximum(y + x, 0.0)
    return jnp.transpose(y, (0, 3, 1, 2))


if __name__ == "__main__":
    key = jax.random.PRNGKey(0)
    kx, kp = jax.random.split(key)

    N, planes, H = 2, 4, 16
    inplanes = planes * 4            # expansion=4 so the identity add is valid
    x = jax.random.normal(kx, (N, inplanes, H, H), dtype=jnp.float32)
    params = init_params(kp, inplanes, planes)

    out = bottleneck_forward(x, params)
    out = jax.block_until_ready(out)

    ref = reference_forward(x, params)
    # bf16 MXU operands (f32 accumulation) vs. the f32 reference -> loosened
    # tolerance; structural errors would show up as O(0.1+) deviations.
    np.testing.assert_allclose(np.asarray(out), np.asarray(ref),
                               rtol=5e-2, atol=5e-2)
    print("KERNEL_OK")
</pallas_src>

<mosaic_0001>
module attributes {stable_mosaic.version = 11 : i64} {
  func.func @bottleneck_kernel(%arg0: i32, %arg1: memref<1x16x16x16xf32, #tpu.memory_space<vmem>>, %arg2: memref<16x4xbf16, #tpu.memory_space<vmem>>, %arg3: memref<1x4xf32, #tpu.memory_space<vmem>>, %arg4: memref<1x4xf32, #tpu.memory_space<vmem>>, %arg5: memref<3x12x4xbf16, #tpu.memory_space<vmem>>, %arg6: memref<1x4xf32, #tpu.memory_space<vmem>>, %arg7: memref<1x4xf32, #tpu.memory_space<vmem>>, %arg8: memref<4x16xbf16, #tpu.memory_space<vmem>>, %arg9: memref<1x16xf32, #tpu.memory_space<vmem>>, %arg10: memref<1x16xf32, #tpu.memory_space<vmem>>, %arg11: memref<1x16x16x16xf32, #tpu.memory_space<vmem>>, %arg12: memref<18x16x12xbf16, #tpu.memory_space<vmem>>, %arg13: memref<256x4xf32, #tpu.memory_space<vmem>>) attributes {dimension_semantics = [#tpu.dimension_semantics<parallel>], iteration_bounds = array<i64: 2>, scalar_prefetch = 0 : i64, scratch_operands = 2 : i64, tpu.core_type = #tpu.core_type<tc>, window_params = [{transform_indices = @transform_0, window_bounds = array<i64: 1, 16, 16, 16>}, {pipeline_mode = #tpu.pipeline_mode<synchronous>, transform_indices = @transform_1, window_bounds = array<i64: 16, 4>}, {pipeline_mode = #tpu.pipeline_mode<synchronous>, transform_indices = @transform_2, window_bounds = array<i64: 1, 4>}, {pipeline_mode = #tpu.pipeline_mode<synchronous>, transform_indices = @transform_3, window_bounds = array<i64: 1, 4>}, {pipeline_mode = #tpu.pipeline_mode<synchronous>, transform_indices = @transform_4, window_bounds = array<i64: 3, 12, 4>}, {pipeline_mode = #tpu.pipeline_mode<synchronous>, transform_indices = @transform_5, window_bounds = array<i64: 1, 4>}, {pipeline_mode = #tpu.pipeline_mode<synchronous>, transform_indices = @transform_6, window_bounds = array<i64: 1, 4>}, {pipeline_mode = #tpu.pipeline_mode<synchronous>, transform_indices = @transform_7, window_bounds = array<i64: 4, 16>}, {pipeline_mode = #tpu.pipeline_mode<synchronous>, transform_indices = @transform_8, window_bounds = array<i64: 1, 16>}, {pipeline_mode = #tpu.pipeline_mode<synchronous>, transform_indices = @transform_9, window_bounds = array<i64: 1, 16>}, {transform_indices = @transform_10, window_bounds = array<i64: 1, 16, 16, 16>}]} {
    %c0 = arith.constant 0 : index
    %c0_0 = arith.constant 0 : index
    %c0_1 = arith.constant 0 : index
    %c0_2 = arith.constant 0 : index
    %0 = vector.load %arg1[%c0, %c0_0, %c0_1, %c0_2] : memref<1x16x16x16xf32, #tpu.memory_space<vmem>>, vector<1x16x16x16xf32>
    %1 = vector.shape_cast %0 : vector<1x16x16x16xf32> to vector<16x16x16xf32>
    %2 = vector.shape_cast %1 : vector<16x16x16xf32> to vector<256x16xf32>
    %3 = arith.truncf %2 : vector<256x16xf32> to vector<256x16xbf16>
    %c0_3 = arith.constant 0 : index
    %c0_4 = arith.constant 0 : index
    %4 = vector.load %arg2[%c0_3, %c0_4] : memref<16x4xbf16, #tpu.memory_space<vmem>>, vector<16x4xbf16>
    %cst = arith.constant dense<0.000000e+00> : vector<256x4xf32>
    %5 = tpu.matmul %3, %4, %cst {dimension_numbers = #tpu.dot_dimension_numbers<[1], [0], [0], [1], [0, 0, 1, 1], [], []>} : vector<256x16xbf16>, vector<16x4xbf16>, vector<256x4xf32> -> vector<256x4xf32>
    %c0_5 = arith.constant 0 : index
    %c0_6 = arith.constant 0 : index
    %6 = vector.load %arg3[%c0_5, %c0_6] : memref<1x4xf32, #tpu.memory_space<vmem>>, vector<1x4xf32>
    %7 = vector.broadcast %6 : vector<1x4xf32> to vector<256x4xf32>
    %8 = arith.mulf %5, %7 : vector<256x4xf32>
    %c0_7 = arith.constant 0 : index
    %c0_8 = arith.constant 0 : index
    %9 = vector.load %arg4[%c0_7, %c0_8] : memref<1x4xf32, #tpu.memory_space<vmem>>, vector<1x4xf32>
    %10 = vector.broadcast %9 : vector<1x4xf32> to vector<256x4xf32>
    %11 = arith.addf %8, %10 : vector<256x4xf32>
    %cst_9 = arith.constant 0.000000e+00 : f32
    %12 = vector.broadcast %cst_9 : f32 to vector<256x4xf32>
    %13 = arith.maximumf %11, %12 : vector<256x4xf32>
    %14 = tpu.iota {dimensions = array<i32: 0>} : vector<256x4xi32>
    %c16_i32 = arith.constant 16 : i32
    %c0_i32 = arith.constant 0 : i32
    %15 = arith.cmpi eq, %c16_i32, %c0_i32 : i32
    %c1_i32 = arith.constant 1 : i32
    %16 = arith.select %15, %c1_i32, %c16_i32 : i32
    %17 = vector.broadcast %16 : i32 to vector<256x4xi32>
    %18 = arith.remsi %14, %17 : vector<256x4xi32>
    %c0_i32_10 = arith.constant 0 : i32
    %19 = vector.broadcast %c0_i32_10 : i32 to vector<256x4xi32>
    %20 = arith.cmpi ne, %18, %19 : vector<256x4xi32>
    %c0_i32_11 = arith.constant 0 : i32
    %21 = vector.broadcast %c0_i32_11 : i32 to vector<256x4xi32>
    %22 = arith.cmpi slt, %18, %21 : vector<256x4xi32>
    %c0_i32_12 = arith.constant 0 : i32
    %23 = arith.cmpi slt, %16, %c0_i32_12 : i32
    %24 = vector.broadcast %23 : i1 to vector<256x4xi1>
    %25 = vector.broadcast %24 : vector<256x4xi1> to vector<256x4xi1>
    %26 = arith.xori %22, %25 : vector<256x4xi1>
    %27 = arith.andi %26, %20 : vector<256x4xi1>
    %28 = vector.broadcast %16 : i32 to vector<256x4xi32>
    %29 = arith.addi %18, %28 : vector<256x4xi32>
    %30 = arith.select %27, %29, %18 : vector<256x4xi1>, vector<256x4xi32>
    %cst_13 = arith.constant 0.000000e+00 : f32
    %31 = vector.broadcast %cst_13 : f32 to vector<1x4xf32>
    %32 = vector.extract_strided_slice %13 {offsets = [0, 0], sizes = [255, 4], strides = [1, 1]} : vector<256x4xf32> to vector<255x4xf32>
    %33 = tpu.concatenate %31, %32 in 0 : vector<1x4xf32>, vector<255x4xf32> -> vector<256x4xf32>
    %34 = vector.extract_strided_slice %13 {offsets = [1, 0], sizes = [255, 4], strides = [1, 1]} : vector<256x4xf32> to vector<255x4xf32>
    %35 = tpu.concatenate %34, %31 in 0 : vector<255x4xf32>, vector<1x4xf32> -> vector<256x4xf32>
    %c0_i32_14 = arith.constant 0 : i32
    %36 = vector.broadcast %c0_i32_14 : i32 to vector<256x4xi32>
    %37 = arith.cmpi eq, %30, %36 : vector<256x4xi32>
    %cst_15 = arith.constant 0.000000e+00 : f32
    %38 = vector.broadcast %cst_15 : f32 to vector<256x4xf32>
    %39 = arith.select %37, %38, %33 : vector<256x4xi1>, vector<256x4xf32>
    %c15_i32 = arith.constant 15 : i32
    %40 = vector.broadcast %c15_i32 : i32 to vector<256x4xi32>
    %41 = arith.cmpi eq, %30, %40 : vector<256x4xi32>
    %cst_16 = arith.constant 0.000000e+00 : f32
    %42 = vector.broadcast %cst_16 : f32 to vector<256x4xf32>
    %43 = arith.select %41, %42, %35 : vector<256x4xi1>, vector<256x4xf32>
    %cst_17 = arith.constant 0.000000e+00 : bf16
    %44 = vector.broadcast %cst_17 : bf16 to vector<1x16x12xbf16>
    %c0_18 = arith.constant 0 : index
    %c0_19 = arith.constant 0 : index
    %c0_20 = arith.constant 0 : index
    %45 = vector.load %arg12[%c0_18, %c0_19, %c0_20] : memref<18x16x12xbf16, #tpu.memory_space<vmem>>, vector<1x16x12xbf16>
    tpu.vector_store %arg12[%c0_18, %c0_19, %c0_20], %44 {strides = array<i32>} : memref<18x16x12xbf16, #tpu.memory_space<vmem>>, vector<1x16x12xbf16>,
    %c17 = arith.constant 17 : index
    %c0_21 = arith.constant 0 : index
    %c0_22 = arith.constant 0 : index
    %46 = vector.load %arg12[%c17, %c0_21, %c0_22] : memref<18x16x12xbf16, #tpu.memory_space<vmem>>, vector<1x16x12xbf16>
    tpu.vector_store %arg12[%c17, %c0_21, %c0_22], %44 {strides = array<i32>} : memref<18x16x12xbf16, #tpu.memory_space<vmem>>, vector<1x16x12xbf16>,
    %47 = vector.shape_cast %39 : vector<256x4xf32> to vector<16x16x4xf32>
    %48 = arith.truncf %47 : vector<16x16x4xf32> to vector<16x16x4xbf16>
    %c1 = arith.constant 1 : index
    %c0_23 = arith.constant 0 : index
    %c0_24 = arith.constant 0 : index
    %49 = vector.load %arg12[%c1, %c0_23, %c0_24] : memref<18x16x12xbf16, #tpu.memory_space<vmem>>, vector<16x16x4xbf16>
    tpu.vector_store %arg12[%c1, %c0_23, %c0_24], %48 {strides = array<i32>} : memref<18x16x12xbf16, #tpu.memory_space<vmem>>, vector<16x16x4xbf16>,
    %50 = vector.shape_cast %13 : vector<256x4xf32> to vector<16x16x4xf32>
    %51 = arith.truncf %50 : vector<16x16x4xf32> to vector<16x16x4xbf16>
    %c1_25 = arith.constant 1 : index
    %c0_26 = arith.constant 0 : index
    %c4 = arith.constant 4 : index
    %52 = vector.load %arg12[%c1_25, %c0_26, %c4] : memref<18x16x12xbf16, #tpu.memory_space<vmem>>, vector<16x16x4xbf16>
    tpu.vector_store %arg12[%c1_25, %c0_26, %c4], %51 {strides = array<i32>} : memref<18x16x12xbf16, #tpu.memory_space<vmem>>, vector<16x16x4xbf16>,
    %53 = vector.shape_cast %43 : vector<256x4xf32> to vector<16x16x4xf32>
    %54 = arith.truncf %53 : vector<16x16x4xf32> to vector<16x16x4xbf16>
    %c1_27 = arith.constant 1 : index
    %c0_28 = arith.constant 0 : index
    %c8 = arith.constant 8 : index
    %55 = vector.load %arg12[%c1_27, %c0_28, %c8] : memref<18x16x12xbf16, #tpu.memory_space<vmem>>, vector<16x16x4xbf16>
    tpu.vector_store %arg12[%c1_27, %c0_28, %c8], %54 {strides = array<i32>} : memref<18x16x12xbf16, #tpu.memory_space<vmem>>, vector<16x16x4xbf16>,
    %c0_29 = arith.constant 0 : index
    %c0_30 = arith.constant 0 : index
    %c0_31 = arith.constant 0 : index
    %56 = vector.load %arg12[%c0_29, %c0_30, %c0_31] : memref<18x16x12xbf16, #tpu.memory_space<vmem>>, vector<16x16x12xbf16>
    %57 = vector.shape_cast %56 : vector<16x16x12xbf16> to vector<256x12xbf16>
    %c0_32 = arith.constant 0 : index
    %c0_33 = arith.constant 0 : index
    %c0_34 = arith.constant 0 : index
    %58 = vector.load %arg5[%c0_32, %c0_33, %c0_34] : memref<3x12x4xbf16, #tpu.memory_space<vmem>>, vector<1x12x4xbf16>
    %59 = vector.shape_cast %58 : vector<1x12x4xbf16> to vector<12x4xbf16>
    %cst_35 = arith.constant dense<0.000000e+00> : vector<256x4xf32>
    %60 = tpu.matmul %57, %59, %cst_35 {dimension_numbers = #tpu.dot_dimension_numbers<[1], [0], [0], [1], [0, 0, 1, 1], [], []>} : vector<256x12xbf16>, vector<12x4xbf16>, vector<256x4xf32> -> vector<256x4xf32>
    %c0_36 = arith.constant 0 : index
    %c0_37 = arith.constant 0 : index
    %61 = vector.load %arg13[%c0_36, %c0_37] : memref<256x4xf32, #tpu.memory_space<vmem>>, vector<256x4xf32>
    tpu.vector_store %arg13[%c0_36, %c0_37], %60 {strides = array<i32>} : memref<256x4xf32, #tpu.memory_space<vmem>>, vector<256x4xf32>,
    %c1_38 = arith.constant 1 : index
    %c0_39 = arith.constant 0 : index
    %c0_40 = arith.constant 0 : index
    %62 = vector.load %arg12[%c1_38, %c0_39, %c0_40] : memref<18x16x12xbf16, #tpu.memory_space<vmem>>, vector<16x16x12xbf16>
    %63 = vector.shape_cast %62 : vector<16x16x12xbf16> to vector<256x12xbf16>
    %c1_41 = arith.constant 1 : index
    %c0_42 = arith.constant 0 : index
    %c0_43 = arith.constant 0 : index
    %64 = vector.load %arg5[%c1_41, %c0_42, %c0_43] : memref<3x12x4xbf16, #tpu.memory_space<vmem>>, vector<1x12x4xbf16>
    %65 = vector.shape_cast %64 : vector<1x12x4xbf16> to vector<12x4xbf16>
    %cst_44 = arith.constant dense<0.000000e+00> : vector<256x4xf32>
    %66 = tpu.matmul %63, %65, %cst_44 {dimension_numbers = #tpu.dot_dimension_numbers<[1], [0], [0], [1], [0, 0, 1, 1], [], []>} : vector<256x12xbf16>, vector<12x4xbf16>, vector<256x4xf32> -> vector<256x4xf32>
    %c0_45 = arith.constant 0 : index
    %c0_46 = arith.constant 0 : index
    %67 = vector.load %arg13[%c0_45, %c0_46] : memref<256x4xf32, #tpu.memory_space<vmem>>, vector<256x4xf32>
    %68 = arith.addf %67, %66 : vector<256x4xf32>
    %c0_47 = arith.constant 0 : index
    %c0_48 = arith.constant 0 : index
    %69 = vector.load %arg13[%c0_47, %c0_48] : memref<256x4xf32, #tpu.memory_space<vmem>>, vector<256x4xf32>
    tpu.vector_store %arg13[%c0_47, %c0_48], %68 {strides = array<i32>} : memref<256x4xf32, #tpu.memory_space<vmem>>, vector<256x4xf32>,
    %c2 = arith.constant 2 : index
    %c0_49 = arith.constant 0 : index
    %c0_50 = arith.constant 0 : index
    %70 = vector.load %arg12[%c2, %c0_49, %c0_50] : memref<18x16x12xbf16, #tpu.memory_space<vmem>>, vector<16x16x12xbf16>
    %71 = vector.shape_cast %70 : vector<16x16x12xbf16> to vector<256x12xbf16>
    %c2_51 = arith.constant 2 : index
    %c0_52 = arith.constant 0 : index
    %c0_53 = arith.constant 0 : index
    %72 = vector.load %arg5[%c2_51, %c0_52, %c0_53] : memref<3x12x4xbf16, #tpu.memory_space<vmem>>, vector<1x12x4xbf16>
    %73 = vector.shape_cast %72 : vector<1x12x4xbf16> to vector<12x4xbf16>
    %cst_54 = arith.constant dense<0.000000e+00> : vector<256x4xf32>
    %74 = tpu.matmul %71, %73, %cst_54 {dimension_numbers = #tpu.dot_dimension_numbers<[1], [0], [0], [1], [0, 0, 1, 1], [], []>} : vector<256x12xbf16>, vector<12x4xbf16>, vector<256x4xf32> -> vector<256x4xf32>
    %c0_55 = arith.constant 0 : index
    %c0_56 = arith.constant 0 : index
    %75 = vector.load %arg13[%c0_55, %c0_56] : memref<256x4xf32, #tpu.memory_space<vmem>>, vector<256x4xf32>
    %76 = arith.addf %75, %74 : vector<256x4xf32>
    %c0_57 = arith.constant 0 : index
    %c0_58 = arith.constant 0 : index
    %77 = vector.load %arg13[%c0_57, %c0_58] : memref<256x4xf32, #tpu.memory_space<vmem>>, vector<256x4xf32>
    tpu.vector_store %arg13[%c0_57, %c0_58], %76 {strides = array<i32>} : memref<256x4xf32, #tpu.memory_space<vmem>>, vector<256x4xf32>,
    %c0_59 = arith.constant 0 : index
    %c0_60 = arith.constant 0 : index
    %78 = vector.load %arg13[%c0_59, %c0_60] : memref<256x4xf32, #tpu.memory_space<vmem>>, vector<256x4xf32>
    %c0_61 = arith.constant 0 : index
    %c0_62 = arith.constant 0 : index
    %79 = vector.load %arg6[%c0_61, %c0_62] : memref<1x4xf32, #tpu.memory_space<vmem>>, vector<1x4xf32>
    %80 = vector.broadcast %79 : vector<1x4xf32> to vector<256x4xf32>
    %81 = arith.mulf %78, %80 : vector<256x4xf32>
    %c0_63 = arith.constant 0 : index
    %c0_64 = arith.constant 0 : index
    %82 = vector.load %arg7[%c0_63, %c0_64] : memref<1x4xf32, #tpu.memory_space<vmem>>, vector<1x4xf32>
    %83 = vector.broadcast %82 : vector<1x4xf32> to vector<256x4xf32>
    %84 = arith.addf %81, %83 : vector<256x4xf32>
    %cst_65 = arith.constant 0.000000e+00 : f32
    %85 = vector.broadcast %cst_65 : f32 to vector<256x4xf32>
    %86 = arith.maximumf %84, %85 : vector<256x4xf32>
    %87 = arith.truncf %86 : vector<256x4xf32> to vector<256x4xbf16>
    %c0_66 = arith.constant 0 : index
    %c0_67 = arith.constant 0 : index
    %88 = vector.load %arg8[%c0_66, %c0_67] : memref<4x16xbf16, #tpu.memory_space<vmem>>, vector<4x16xbf16>
    %cst_68 = arith.constant dense<0.000000e+00> : vector<256x16xf32>
    %89 = tpu.matmul %87, %88, %cst_68 {dimension_numbers = #tpu.dot_dimension_numbers<[1], [0], [0], [1], [0, 0, 1, 1], [], []>} : vector<256x4xbf16>, vector<4x16xbf16>, vector<256x16xf32> -> vector<256x16xf32>
    %c0_69 = arith.constant 0 : index
    %c0_70 = arith.constant 0 : index
    %90 = vector.load %arg9[%c0_69, %c0_70] : memref<1x16xf32, #tpu.memory_space<vmem>>, vector<1x16xf32>
    %91 = vector.broadcast %90 : vector<1x16xf32> to vector<256x16xf32>
    %92 = arith.mulf %89, %91 : vector<256x16xf32>
    %c0_71 = arith.constant 0 : index
    %c0_72 = arith.constant 0 : index
    %93 = vector.load %arg10[%c0_71, %c0_72] : memref<1x16xf32, #tpu.memory_space<vmem>>, vector<1x16xf32>
    %94 = vector.broadcast %93 : vector<1x16xf32> to vector<256x16xf32>
    %95 = arith.addf %92, %94 : vector<256x16xf32>
    %96 = arith.addf %95, %2 : vector<256x16xf32>
    %cst_73 = arith.constant 0.000000e+00 : f32
    %97 = vector.broadcast %cst_73 : f32 to vector<256x16xf32>
    %98 = arith.maximumf %96, %97 : vector<256x16xf32>
    %99 = vector.shape_cast %98 : vector<256x16xf32> to vector<16x16x16xf32>
    %c0_74 = arith.constant 0 : index
    %c0_75 = arith.constant 0 : index
    %c0_76 = arith.constant 0 : index
    %c0_77 = arith.constant 0 : index
    %100 = vector.load %arg11[%c0_74, %c0_75, %c0_76, %c0_77] : memref<1x16x16x16xf32, #tpu.memory_space<vmem>>, vector<1x16x16x16xf32>
    %101 = vector.shape_cast %100 : vector<1x16x16x16xf32> to vector<16x16x16xf32>
    %102 = vector.shape_cast %99 : vector<16x16x16xf32> to vector<1x16x16x16xf32>
    tpu.vector_store %arg11[%c0_74, %c0_75, %c0_76, %c0_77], %102 {strides = array<i32>} : memref<1x16x16x16xf32, #tpu.memory_space<vmem>>, vector<1x16x16x16xf32>,
    return
  }
  func.func @transform_0(%arg0: i32) -> (i32, i32, i32, i32) {
    %c0_i32 = arith.constant 0 : i32
    %c0_i32_0 = arith.constant 0 : i32
    %c0_i32_1 = arith.constant 0 : i32
    %c0_i32_2 = arith.constant 0 : i32
    return %arg0, %c0_i32, %c0_i32_0, %c0_i32_1 : i32, i32, i32, i32
  }
  func.func @transform_1(%arg0: i32) -> (i32, i32) {
    %c0_i32 = arith.constant 0 : i32
    %c0_i32_0 = arith.constant 0 : i32
    %c0_i32_1 = arith.constant 0 : i32
    return %c0_i32, %c0_i32_0 : i32, i32
  }
  func.func @transform_2(%arg0: i32) -> (i32, i32) {
    %c0_i32 = arith.constant 0 : i32
    %c0_i32_0 = arith.constant 0 : i32
    %c0_i32_1 = arith.constant 0 : i32
    return %c0_i32, %c0_i32_0 : i32, i32
  }
  func.func @transform_3(%arg0: i32) -> (i32, i32) {
    %c0_i32 = arith.constant 0 : i32
    %c0_i32_0 = arith.constant 0 : i32
    %c0_i32_1 = arith.constant 0 : i32
    return %c0_i32, %c0_i32_0 : i32, i32
  }
  func.func @transform_4(%arg0: i32) -> (i32, i32, i32) {
    %c0_i32 = arith.constant 0 : i32
    %c0_i32_0 = arith.constant 0 : i32
    %c0_i32_1 = arith.constant 0 : i32
    %c0_i32_2 = arith.constant 0 : i32
    return %c0_i32, %c0_i32_0, %c0_i32_1 : i32, i32, i32
  }
  func.func @transform_5(%arg0: i32) -> (i32, i32) {
    %c0_i32 = arith.constant 0 : i32
    %c0_i32_0 = arith.constant 0 : i32
    %c0_i32_1 = arith.constant 0 : i32
    return %c0_i32, %c0_i32_0 : i32, i32
  }
  func.func @transform_6(%arg0: i32) -> (i32, i32) {
    %c0_i32 = arith.constant 0 : i32
    %c0_i32_0 = arith.constant 0 : i32
    %c0_i32_1 = arith.constant 0 : i32
    return %c0_i32, %c0_i32_0 : i32, i32
  }
  func.func @transform_7(%arg0: i32) -> (i32, i32) {
    %c0_i32 = arith.constant 0 : i32
    %c0_i32_0 = arith.constant 0 : i32
    %c0_i32_1 = arith.constant 0 : i32
    return %c0_i32, %c0_i32_0 : i32, i32
  }
  func.func @transform_8(%arg0: i32) -> (i32, i32) {
    %c0_i32 = arith.constant 0 : i32
    %c0_i32_0 = arith.constant 0 : i32
    %c0_i32_1 = arith.constant 0 : i32
    return %c0_i32, %c0_i32_0 : i32, i32
  }
  func.func @transform_9(%arg0: i32) -> (i32, i32) {
    %c0_i32 = arith.constant 0 : i32
    %c0_i32_0 = arith.constant 0 : i32
    %c0_i32_1 = arith.constant 0 : i32
    return %c0_i32, %c0_i32_0 : i32, i32
  }
  func.func @transform_10(%arg0: i32) -> (i32, i32, i32, i32) {
    %c0_i32 = arith.constant 0 : i32
    %c0_i32_0 = arith.constant 0 : i32
    %c0_i32_1 = arith.constant 0 : i32
    %c0_i32_2 = arith.constant 0 : i32
    return %arg0, %c0_i32, %c0_i32_0, %c0_i32_1 : i32, i32, i32, i32
  }
}

</mosaic_0001>

<bundles_post_ra>
// kernel: tpu_custom_call.1
= control target key start
LH: loop header
LB: loop body
LE: loop exit
PB: predicated region body
PF: predicated region fallthrough
CT: control target
= control target key end

     0   :  { %15 = vsyncpa [#allocation5], 0  ;;  %s5264_s0 = inlined_call_operand.hbm [shape: f32[2,16,16,16], index: 0, kind: input, shape index: {}]   ;;  %s5265_s1 = inlined_call_operand.vmem [shape: bf16[16,4], index: 1, kind: input, shape index: {}]   ;;  %s5266_s2 = inlined_call_operand.vmem [shape: f32[1,4], index: 2, kind: input, shape index: {}]   ;;  %s5267_s3 = inlined_call_operand.vmem [shape: f32[1,4], index: 3, kind: input, shape index: {}]   ;;  %s5268_s4 = inlined_call_operand.vmem [shape: bf16[3,12,4], index: 4, kind: input, shape index: {}]   ;;  %s5269_s5 = inlined_call_operand.vmem [shape: f32[1,4], index: 5, kind: input, shape index: {}]   ;;  %s5270_s6 = inlined_call_operand.vmem [shape: f32[1,4], index: 6, kind: input, shape index: {}]   ;;  %s5271_s7 = inlined_call_operand.vmem [shape: bf16[4,16], index: 7, kind: input, shape index: {}]   ;;  %s5272_s8 = inlined_call_operand.vmem [shape: f32[1,16], index: 8, kind: input, shape index: {}]   ;;  %s5273_s9 = inlined_call_operand.vmem [shape: f32[1,16], index: 9, kind: input, shape index: {}]   ;;  %s5274_s10 = inlined_call_operand.hbm [shape: f32[2,16,16,16], index: 10, kind: output, shape index: {}]  }
   0x1   :  { %17 = vsyncpa [#allocation5 + $0x1], 0 }
   0x2   :  { %18 = vsyncpa [#allocation6], 0 }
   0x3   :  { %20 = vsyncpa [#allocation6 + $0x1], 0  ;;  %s4082_s13 = smov 0   ;;  %s4084_s14 = smov 0  }
   0x4   :  { %s4086_s15 = smov 0   ;;  %s4088_s16 = smov 0  }
   0x5 LB: > { %5279 = sst [smem:[#allocation10_spill]] %s4015_s15  ;;  %s4103_s17 = sadd.s32 4294967295, %s4019_s16   ;;  %s4019_s16 = sphi %s4088_s16, %s5294_s16   ;;  %s4015_s15 = sphi %s4086_s15, %s5296_s15   ;;  %s4011_s14 = sphi %s4084_s14, %s5298_s14   ;;  %s4007_s13 = sphi %s4082_s13, %s5297_s13  }
   0x6   : > { %s3466_s18 = sadd.s32 4294967294, %s4019_s16   ;;  %s4107_s19 = sadd.s32 1, %s4019_s16  }
   0x7   : > { %5280 = sst [smem:[#allocation11_spill]] %s4107_s19  ;;  %s33_s20 = sadd.s32 1, %s4015_s15 }
   0x8   : > { %s30_s21 = ssub.s32 %s4019_s16, %s4107_s19  ;;  %p40_p0 = scmp.ne.s32.totalorder %s4015_s15, %s4011_s14 }
   0x9   : > { %p31_p1 = scmp.eq.s32.totalorder %s30_s21, 0  ;;  %p41_p2 = scmp.eq.s32.totalorder %s4019_s16, 0 }
   0xa   : > { %p46_p3 = scmp.ne.s32.totalorder %s4011_s14, %s4007_s13  ;;  %p47_p4 = scmp.eq.s32.totalorder %s4103_s17, 0 }
   0xb   : > { %s4119_s22 = scalar_select %p31_p1, %s4015_s15, %s33_s20  }
   0xc   : > { %p4121_p5 = por %p41_p2, %p40_p0  ;;  %p4125_p6 = por %p47_p4, %p46_p3 }
   0xd   : > { %5281 = sst [smem:[#allocation12_spill]] %s4119_s22  ;;  %p259_p7 = scmp.eq.s32.totalorder %s4103_s17, 1 }
   0xe   : > { %p265_p8 = scmp.eq.s32.totalorder %s3466_s18, 1  ;;  %p3841_p10 = scmp.lt.s32.totalorder %s4019_s16, 2 }
   0xf   : > { %p4132_p11 = por %p259_p7, %p40_p0  ;;  %s312_s27 = sand.u32 1, %s4015_s15  }
  0x10   : > { %p4136_p12 = por %p265_p8, %p46_p3  ;;  %s3772_s28 = sshll.u32 %s4019_s16, 8 }
  0x11   : > { %s3469_s29 = sshll.u32 %s312_s27, 8  ;;  %s321_s12 = scalar_lea.hbm %s5264_s0, %s3772_s28 }
  0x12   : > { %s5285_s26 = scalar_select %p4136_p12, 1, 0 }
  0x13   : > { %s322_s20 = sshll.u32 %s321_s12, 4  ;;  %s316_s18 = scalar_lea.vmem [#allocation4], %s3469_s29  ;;  %s323_s20 = int_to_ptr.hbm [resolvable:$true] %s322_s20 }
  0x14   : > { %5286 = sst [smem:[#allocation13_spill]] %s5285_s26  ;;  %s324_s21 = sshll.u32 %s316_s18, 4  ;;  %s325_s21 = int_to_ptr.vmem [resolvable:$true] %s324_s21 }
  0x15   : > { %p4147_p13 = pnand %p3841_p10, %p4121_p5  ;;  %p3472_p0 = scmp.ge.s32.totalorder %s4019_s16, 1 }
  0x16   : > { %p332_p1 = scmp.lt.s32.totalorder %s4019_s16, 3  ;;  %s313_s15 = scalar_lea.sflag [#allocation5], %s312_s27 }
  0x17   : > { %s3923_s19 = sshra.s32 %s323_s20, 4  ;;  %p3927_p3 = pneg %p4147_p13  ;;  %s3924_s19 = int_to_ptr.hbm [resolvable:$true] %s3923_s19 }
  0x18   : > { %s3925_s26 = scalar_lea.hbm %s3924_s19, 256  ;;  %s3930_s23 = scalar_lea.hbm %s5264_s0, 512 }
  0x19   : > { %p3926_p2 = scmp.ne.s32.totalorder %s3924_s19, %s3925_s26  ;;  %p3931_p5 = scmp.lt.s32.totalorder %s3924_s19, %s5264_s0 }
  0x1a   : > { %p3932_p8 = scmp.lt.s32.totalorder %s3930_s23, %s3925_s26 }
  0x1b   : > { %p3928_p4 = pnand %p3927_p3, %p3926_p2 }
  0x1c   : > { %p3933_p10 = por %p3932_p8, %p3931_p5 }
  0x1d   : > { %p3929_p7 = pneg %p3928_p4 }
  0x1f   : > { %p3934_p9 = pnand %p3933_p10, %p3929_p7 }
  0x21   : > { %3937 = shalt.err (!%p3934_p9)
}
  0x22   : > { %s4021_s27 = smov 128   ;;  %s4022_s12 = smov 8  }
  0x23   : > { %3836 = dma.hbm_to_vmem [thread:$0]  (!%p4147_p13), %s323_s20, 4096, %s325_s21, %s313_s15, %s4021_s27, %s4021_s27, %s4022_s12  }
  0x24   : > { %p333_p2 = pnand %p3472_p0, %p332_p1 }
  0x25   : > { %s4168_s18 = sand.u32 (!%p333_p2), 1, %s4011_s14  }
  0x26   : > { %336 = sbr.rel (%p333_p2) target bundleno = 887 (0x377), region = 60  ;;  %s3473_s19 = sshll.u32 (!%p333_p2), %s4168_s18, 8 }
  0x27   : > { %s339_s26 = scalar_lea.sflag (!%p333_p2), [#allocation5], %s4168_s18  ;;  %s4174_s28 = scalar_lea.vmem (!%p333_p2), [#allocation4], %s3473_s19 }
  0x2b   : > { %3998 = dma.done.wait (%p4125_p6), %s339_s26, 4096  }
  0x2c   : > { %4000 = vsyncadd (%p4125_p6), %s339_s26, 4294963200  ;;  %v3773_v0 = vld [vmem:[%s5265_s1] sm:$0xff]  ;;  %v381_v1 = vld [vmem:[%s4174_s28] sm:$0xff]  ;;  %vm437_vm0 = vcmask 130048   ;;  %v679_v40 = vlaneseq  ;;  %vm1128_vm1 = vcmask 1040384   ;;  %s4023_s23 = smov 4  }
  0x2d   : > { %v382_v2 = vld [vmem:[%s4174_s28 + $0x8] sm:$0xff]  ;;  %493 = vmatpush.bf16.msra.mxu0 %v3773_v0  ;;  %3826 = vmatpush.bf16.msra.mxu1 %v3773_v0  ;;  %v389_v4 = vld [vmem:[%s4174_s28 + $0x40] sm:$0xff]  ;;  %v383_v7 = vld [vmem:[%s4174_s28 + $0x10] sm:$0xff]  ;;  %vm1489_vm3 = vcmask 27648   ;;  %vm1225_vm4 = vcmask 1046528   ;;  %s4024_s30 = smov 8  }
  0x2e   : > { %v413_v3 = vpack.c.bf16 %v382_v2, %v381_v1  ;;  %3827 = vmatpush.bf16.msra.mxu2 %v3773_v0  ;;  %3828 = vmatpush.bf16.msra.mxu3 %v3773_v0  ;;  %v390_v5 = vld [vmem:[%s4174_s28 + $0x48] sm:$0xff]  ;;  %v384_v8 = vld [vmem:[%s4174_s28 + $0x18] sm:$0xff]  ;;  %v391_v10 = vld [vmem:[%s4174_s28 + $0x50] sm:$0xff]  ;;  %v4232_v43 = vshrl.u32 %v679_v40, 7  ;;  %vm2076_vm13 = vcmask 1045504   ;;  %s5009_s22 = scalar_lea.vmem [#allocation7], %s3473_s19 }
  0x2f   : > { %v417_v6 = vpack.c.bf16 %v390_v5, %v389_v4  ;;  %v414_v9 = vpack.c.bf16 %v384_v8, %v383_v7  ;;  %v392_v11 = vld [vmem:[%s4174_s28 + $0x58] sm:$0xff]  ;;  %v397_v13 = vld [vmem:[%s4174_s28 + $0x80] sm:$0xff]  ;;  %v398_v14 = vld [vmem:[%s4174_s28 + $0x88] sm:$0xff]  ;;  %s3825_s21 = sshll.u32 %s4103_s17, 8  ;;  %s3390_s12 = sshll.u32 %s5009_s22, 4  ;;  %s3391_s12 = int_to_ptr.vmem [resolvable:$true] %s3390_s12 }
  0x30   : > { %3479 = vmatmul.msk.bf16.vlgmr.msra.gmra.mxu0 %vm437_vm0, %v413_v3  ;;  %v418_v12 = vpack.c.bf16 %v392_v11, %v391_v10  ;;  %v421_v15 = vpack.c.bf16 %v398_v14, %v397_v13  ;;  %v385_v16 = vld [vmem:[%s4174_s28 + $0x20] sm:$0xff]  ;;  %v386_v17 = vld [vmem:[%s4174_s28 + $0x28] sm:$0xff]  ;;  %v399_v21 = vld [vmem:[%s4174_s28 + $0x90] sm:$0xff]  ;;  %v716_v50 = vand.u32 15, %v4232_v43  ;;  %v681_v62 = vadd.s32 8, %v4232_v43  ;;  %s3389_s27 = scalar_lea.hbm %s5274_s10, %s3825_s21  ;;  %s3378_s17 = scalar_lea.sflag [#allocation6], %s4168_s18 }
  0x31   : > { %3483 = vmatmul.msk.bf16.vlgmr.msra.gmra.mxu1 %vm437_vm0, %v417_v6  ;;  %v415_v18 = vpack.c.bf16 %v386_v17, %v385_v16  ;;  %v393_v19 = vld [vmem:[%s4174_s28 + $0x60] sm:$0xff]  ;;  %v394_v20 = vld [vmem:[%s4174_s28 + $0x68] sm:$0xff]  ;;  %v400_v22 = vld [vmem:[%s4174_s28 + $0x98] sm:$0xff]  ;;  %v682_v63 = vadd.s32 16, %v4232_v43  ;;  %s3392_s26 = sshll.u32 %s3389_s27, 4  ;;  %s3973_s20 = scalar_lea.hbm %s5274_s10, 512  ;;  %s3393_s26 = int_to_ptr.hbm [resolvable:$true] %s3392_s26 }
  0x32   : > { %3487 = vmatmul.msk.bf16.vlgmr.msra.gmra.mxu2 %vm437_vm0, %v421_v15  ;;  %v419_v23 = vpack.c.bf16 %v394_v20, %v393_v19  ;;  %v422_v24 = vpack.c.bf16 %v400_v22, %v399_v21  ;;  %v387_v25 = vld [vmem:[%s4174_s28 + $0x30] sm:$0xff]  ;;  %v388_v26 = vld [vmem:[%s4174_s28 + $0x38] sm:$0xff]  ;;  %v401_v30 = vld [vmem:[%s4174_s28 + $0xa0] sm:$0xff]  ;;  %vm1322_vm2 = vcmp.eq.s32.totalorder %v716_v50, 0  ;;  %v723_v10 = vand.u32 15, %v681_v62  ;;  %s3967_s15 = sshra.s32 %s3393_s26, 4  ;;  %s3968_s15 = int_to_ptr.hbm [resolvable:$true] %s3967_s15 }
  0x33   : > { %v416_v27 = vpack.c.bf16 %v388_v26, %v387_v25  ;;  %v395_v28 = vld [vmem:[%s4174_s28 + $0x70] sm:$0xff]  ;;  %v396_v29 = vld [vmem:[%s4174_s28 + $0x78] sm:$0xff]  ;;  %v402_v31 = vld [vmem:[%s4174_s28 + $0xa8] sm:$0xff]  ;;  %v730_v13 = vand.u32 15, %v682_v63  ;;  %s3969_s19 = scalar_lea.hbm %s3968_s15, 256  ;;  %p3974_p0 = scmp.lt.s32.totalorder %s3968_s15, %s5274_s10 }
  0x34   : > { %v420_v32 = vpack.c.bf16 %v396_v29, %v395_v28  ;;  %v423_v33 = vpack.c.bf16 %v402_v31, %v401_v30  ;;  %v403_v34 = vld [vmem:[%s4174_s28 + $0xb0] sm:$0xff]  ;;  %v404_v35 = vld [vmem:[%s4174_s28 + $0xb8] sm:$0xff]  ;;  %v405_v37 = vld [vmem:[%s4174_s28 + $0xc0] sm:$0xff]  ;;  %vm1387_vm5 = vcmp.eq.s32.totalorder %v723_v10, 15  ;;  %p3970_p6 = scmp.ne.s32.totalorder %s3968_s15, %s3969_s19  ;;  %p3975_p1 = scmp.lt.s32.totalorder %s3973_s20, %s3969_s19 }
  0x35   : > { %v424_v36 = vpack.c.bf16 %v404_v35, %v403_v34  ;;  %v406_v38 = vld [vmem:[%s4174_s28 + $0xc8] sm:$0xff]  ;;  %v4225_v41 = vld [vmem:[%s5266_s2] ss:$0 sm:$0xff]  ;;  %v408_v47 = vld [vmem:[%s4174_s28 + $0xd8] sm:$0xff]  ;;  %vm1324_vm6 = vcmp.eq.s32.totalorder %v730_v13, 0 }
  0x36   : > { %v425_v39 = vpack.c.bf16 %v406_v38, %v405_v37  ;;  %v4230_v42 = vld [vmem:[%s5267_s3] ss:$0 sm:$0xff]  ;;  %v410_v25 = vld [vmem:[%s4174_s28 + $0xe8] sm:$0xff]  ;;  %v683_v37 = vadd.s32 24, %v4232_v43  ;;  %p3971_p9 = pnand %p3970_p6, %p4132_p11  ;;  %p3976_p3 = por %p3975_p1, %p3974_p0 }
  0x37   : > { %v407_v46 = vld [vmem:[%s4174_s28 + $0xd0] sm:$0xff] }
  0x38   : > { %3491 = vmatmul.msk.bf16.vlgmr.msra.gmra.mxu3 %vm437_vm0, %v425_v39  ;;  %v426_v48 = vpack.c.bf16 %v408_v47, %v407_v46  ;;  %v684_v47 = vadd.s32 32, %v4232_v43  ;;  %p3972_p13 = pneg %p3971_p9 }
  0x3a   : > { %p3977_p4 = pnand %p3976_p3, %p3972_p13 }
  0x40   : > { %3480 = vmatmul.msk.bf16.gmra.mxu0 %vm437_vm0, %v414_v9 }
  0x41   : > { %3484 = vmatmul.msk.bf16.gmra.mxu1 %vm437_vm0, %v418_v12 }
  0x42   : > { %3488 = vmatmul.msk.bf16.gmra.mxu2 %vm437_vm0, %v422_v24  ;;  %v409_v24 = vld [vmem:[%s4174_s28 + $0xe0] sm:$0xff] }
  0x43   : > { %v427_v29 = vpack.c.bf16 %v410_v25, %v409_v24  ;;  %v411_v24 = vld [vmem:[%s4174_s28 + $0xf0] sm:$0xff]  ;;  %v412_v25 = vld [vmem:[%s4174_s28 + $0xf8] sm:$0xff] }
  0x48   : > { %3492 = vmatmul.msk.bf16.gmra.mxu3 %vm437_vm0, %v426_v48 }
  0x50   : > { %3481 = vmatmul.msk.bf16.gmra.mxu0 %vm437_vm0, %v415_v18 }
  0x51   : > { %3485 = vmatmul.msk.bf16.gmra.mxu1 %vm437_vm0, %v419_v23 }
  0x52   : > { %3489 = vmatmul.msk.bf16.gmra.mxu2 %vm437_vm0, %v423_v33 }
  0x58   : > { %3493 = vmatmul.msk.bf16.gmra.mxu3 %vm437_vm0, %v427_v29 }
  0x60   : > { %3482 = vmatmul.msk.bf16.gmra.mxu0 %vm437_vm0, %v416_v27 }
  0x61   : > { %3486 = vmatmul.msk.bf16.gmra.mxu1 %vm437_vm0, %v420_v32 }
  0x62   : > { %3490 = vmatmul.msk.bf16.gmra.mxu2 %vm437_vm0, %v424_v36 }
  0xad   : > { %v495_v44 = vpop.f32.mrf.mxu0 }
  0xae   : > { %v579_v45 = vmul.f32 %v4225_v41, %v495_v44  ;;  %v515_v55 = vpop.f32.mrf.mxu1 }
  0xaf   : > { %v587_v33 = vmul.f32 %v4225_v41, %v515_v55 }
  0xb0   : > { %v615_v49 = vadd.f32 %v4230_v42, %v579_v45 }
  0xb2   : > { %v647_v51 = vmax.f32 %v615_v49, 0.0  ;;  %v623_v49 = vadd.f32 %v4230_v42, %v587_v33 }
  0xb4   : > { %v1129_v52 = vrot.slane %v647_v51, 7  ;;  %v1522_v53 = vpack.c.bf16 %v647_v51, %v647_v51  ;;  %v1226_v2 = vrot.slane %v647_v51, 1 }
  0xb5   : > { %v497_v54 = vpop.f32.mrf.mxu0 }
  0xb6   : > { %v1224_v56 = vsel %vm1128_vm1, 0.0, %v1129_v52  ;;  %v580_v57 = vmul.f32 %v4225_v41, %v497_v54  ;;  %1586 = vrot.lane.b32.xlu0 %v1522_v53, %s4023_s23  ;;  %v517_v5 = vpop.f32.mrf.mxu1  ;;  %v737_v53 = vand.u32 15, %v683_v37 }
  0xb7   : > { %v1354_v58 = vsel %vm1322_vm2, 0.0, %v1224_v56  ;;  %v588_v30 = vmul.f32 %v4225_v41, %v517_v5  ;;  %v744_v56 = vand.u32 15, %v684_v47 }
  0xb8   : > { %v1456_v59 = vpack.c.bf16 %v1354_v58, %v1354_v58  ;;  %v616_v60 = vadd.f32 %v4230_v42, %v580_v57  ;;  %v4280_v57 = vmax.f32 %v623_v49, 0.0  ;;  %vm1389_vm7 = vcmp.eq.s32.totalorder %v737_v53, 15 }
  0xb9   : > { %v624_v39 = vadd.f32 %v4230_v42, %v588_v30  ;;  %vm1326_vm8 = vcmp.eq.s32.totalorder %v744_v56, 0 }
  0xba   : > { %v648_v61 = vmax.f32 %v616_v60, 0.0  ;;  %1490 = vst.msk [vmem:[#allocation2 + $0x8] sm:$0xf] %vm1489_vm3, %v1456_v59  ;;  %v1241_v56 = vrot.slane %v4280_v57, 1 }
  0xbb   : > { %v4277_v54 = vmax.f32 %v624_v39, 0.0 }
  0xbc   : > { %v1130_v0 = vrot.slane %v648_v61, 7  ;;  %v1523_v1 = vpack.c.bf16 %v648_v61, %v648_v61  ;;  %v1227_v3 = vrot.slane %v648_v61, 1 }
  0xbd   : > { %v500_v4 = vpop.f32.mrf.mxu0  ;;  %v1146_v63 = vrot.slane %v4277_v54, 7 }
  0xbe   : > { %v581_v6 = vmul.f32 %v4225_v41, %v500_v4  ;;  %1588 = vrot.lane.b32.xlu0 %v1523_v1, %s4023_s23  ;;  %v1228_v7 = vsel %vm1225_vm4, %v1226_v2, %v1227_v3  ;;  %v1131_v8 = vsel %vm1128_vm1, %v1129_v52, %v1130_v0  ;;  %v520_v19 = vpop.f32.mrf.mxu1 }
  0xbf   : > { %v1715_v9 = vpack.c.bf16 %v1228_v7, %v1228_v7  ;;  %v1457_v11 = vpack.c.bf16 %v1131_v8, %v1131_v8  ;;  %v589_v50 = vmul.f32 %v4225_v41, %v520_v19  ;;  %v685_v19 = vadd.s32 40, %v4232_v43 }
  0xc0   : > { %v617_v12 = vadd.f32 %v4230_v42, %v581_v6 }
  0xc1   : > { %1779 = vrot.lane.b32.xlu1 %v1715_v9, %s4024_s30  ;;  %1491 = vst.msk [vmem:[#allocation2 + $0xc] sm:$0xf] %vm1489_vm3, %v1457_v11  ;;  %v625_v58 = vadd.f32 %v4230_v42, %v589_v50 }
  0xc2   : > { %v649_v14 = vmax.f32 %v617_v12, 0.0 }
  0xc3   : > { %v4289_v5 = vmax.f32 %v625_v58, 0.0 }
  0xc4   : > { %v1132_v15 = vrot.slane %v649_v14, 7  ;;  %v1229_v16 = vrot.slane %v649_v14, 1  ;;  %v1524_v17 = vpack.c.bf16 %v649_v14, %v649_v14 }
  0xc5   : > { %v502_v18 = vpop.f32.mrf.mxu0  ;;  %v1148_v13 = vrot.slane %v4289_v5, 7 }
  0xc6   : > { %v1133_v20 = vsel %vm1128_vm1, %v1130_v0, %v1132_v15  ;;  %v582_v21 = vmul.f32 %v4225_v41, %v502_v18  ;;  %1590 = vrot.lane.b32.xlu2 %v1524_v17, %s4023_s23  ;;  %v1230_v22 = vsel %vm1225_vm4, %v1227_v3, %v1229_v16  ;;  %v522_v45 = vpop.f32.mrf.mxu1  ;;  %v1144_v3 = vrot.slane %v4280_v57, 7 }
  0xc7   : > { %v1419_v23 = vsel %vm1387_vm5, 0.0, %v1230_v22  ;;  %v1356_v26 = vsel %vm1324_vm6, 0.0, %v1133_v20  ;;  %v590_v33 = vmul.f32 %v4225_v41, %v522_v45 }
  0xc8   : > { %v618_v27 = vadd.f32 %v4230_v42, %v582_v21  ;;  %v1716_v28 = vpack.c.bf16 %v1419_v23, %v1419_v23  ;;  %v1458_v31 = vpack.c.bf16 %v1356_v26, %v1356_v26  ;;  %v1147_v10 = vsel %vm1128_vm1, %v1144_v3, %v1146_v63 }
  0xc9   : > { %v1465_v14 = vpack.c.bf16 %v1147_v10, %v1147_v10  ;;  %v3647_v10 = vld [vmem:[%s5268_s4 + $0x8] sm:$0xf] }
  0xca   : > { %v650_v32 = vmax.f32 %v618_v27, 0.0  ;;  %1781 = vrot.lane.b32.xlu1 %v1716_v28, %s4024_s30  ;;  %1492 = vst.msk [vmem:[#allocation2 + $0x10] sm:$0xf] %vm1489_vm3, %v1458_v31  ;;  %v1149_v27 = vsel %vm1128_vm1, %v1146_v63, %v1148_v13  ;;  %v428_v28 = vpack.c.bf16 %v412_v25, %v411_v24  ;;  %v751_v31 = vand.u32 15, %v685_v19 }
  0xcb   : > { %1499 = vst.msk [vmem:[#allocation2 + $0x2c] sm:$0xf] %vm1489_vm3, %v1465_v14 }
  0xcc   : > { %v1134_v34 = vrot.slane %v650_v32, 7  ;;  %v1525_v35 = vpack.c.bf16 %v650_v32, %v650_v32  ;;  %v1231_v36 = vrot.slane %v650_v32, 1  ;;  %3494 = vmatmul.msk.bf16.gmra.mxu3 %vm437_vm0, %v428_v28  ;;  %vm1391_vm10 = vcmp.eq.s32.totalorder %v751_v31, 15 }
  0xcd   : > { %v505_v38 = vpop.f32.mrf.mxu0 }
  0xce   : > { %v583_v40 = vmul.f32 %v4225_v41, %v505_v38  ;;  %1592 = vrot.lane.b32.xlu2 %v1525_v35, %s4023_s23  ;;  %v1232_v44 = vsel %vm1225_vm4, %v1229_v16, %v1231_v36  ;;  %v1135_v46 = vsel %vm1128_vm1, %v1132_v15, %v1134_v34  ;;  %v525_v8 = vpop.f32.mrf.mxu1  ;;  %v690_v15 = vadd.s32 80, %v4232_v43 }
  0xcf   : > { %v1717_v48 = vpack.c.bf16 %v1232_v44, %v1232_v44  ;;  %v1459_v51 = vpack.c.bf16 %v1135_v46, %v1135_v46  ;;  %v686_v35 = vadd.s32 48, %v4232_v43  ;;  %v626_v46 = vadd.f32 %v4230_v42, %v590_v33 }
  0xd0   : > { %v619_v52 = vadd.f32 %v4230_v42, %v583_v40  ;;  %v786_v21 = vand.u32 15, %v690_v15  ;;  %v1243_v15 = vrot.slane %v4277_v54, 1 }
  0xd1   : > { %1783 = vrot.lane.b32.xlu0 %v1717_v48, %s4024_s30  ;;  %1493 = vst.msk [vmem:[#allocation2 + $0x14] sm:$0xf] %vm1489_vm3, %v1459_v51  ;;  %v591_v48 = vmul.f32 %v4225_v41, %v525_v8  ;;  %v758_v49 = vand.u32 15, %v686_v35 }
  0xd2   : > { %v651_v55 = vmax.f32 %v619_v52, 0.0  ;;  %vm1332_vm9 = vcmp.eq.s32.totalorder %v786_v21, 0  ;;  %v4334_v52 = vpop.f32.mrf.mxu2 }
  0xd3   : > { %v1364_v38 = vsel %vm1332_vm9, 0.0, %v1149_v27  ;;  %v627_v63 = vadd.f32 %v4230_v42, %v591_v48  ;;  %vm4347_vm12 = vcmp.eq.s32.totalorder %v758_v49, 0 }
  0xd4   : > { %v1136_v59 = vrot.slane %v651_v55, 7  ;;  %v1233_v60 = vrot.slane %v651_v55, 1  ;;  %v1526_v61 = vpack.c.bf16 %v651_v55, %v651_v55  ;;  %v1466_v39 = vpack.c.bf16 %v1364_v38, %v1364_v38 }
  0xd5   : > { %v507_v62 = vpop.f32.mrf.mxu0  ;;  %v1244_v38 = vsel %vm1225_vm4, %v1241_v56, %v1243_v15 }
  0xd6   : > { %v1137_v0 = vsel %vm1128_vm1, %v1134_v34, %v1136_v59  ;;  %v584_v1 = vmul.f32 %v4225_v41, %v507_v62  ;;  %1594 = vrot.lane.b32.xlu2 %v1526_v61, %s4023_s23  ;;  %v1234_v2 = vsel %vm1225_vm4, %v1231_v36, %v1233_v60  ;;  %v687_v34 = vadd.s32 56, %v4232_v43  ;;  %v527_v37 = vpop.f32.mrf.mxu1  ;;  %1500 = vst.msk [vmem:[#allocation2 + $0x30] sm:$0xf] %vm1489_vm3, %v1466_v39 }
  0xd7   : > { %v1421_v4 = vsel %vm1389_vm7, 0.0, %v1234_v2  ;;  %v1358_v9 = vsel %vm1326_vm8, 0.0, %v1137_v0  ;;  %v4340_v61 = vmax.f32 %v626_v46, 0.0  ;;  %v689_v2 = vadd.s32 72, %v4232_v43 }
  0xd8   : > { %v620_v6 = vadd.f32 %v4230_v42, %v584_v1  ;;  %v1718_v7 = vpack.c.bf16 %v1421_v4, %v1421_v4  ;;  %v1460_v12 = vpack.c.bf16 %v1358_v9, %v1358_v9  ;;  %v765_v47 = vand.u32 15, %v687_v34  ;;  %v3561_v4 = vld [vmem:[%s5268_s4] sm:$0xf] }
  0xd9   : > { %v1150_v8 = vrot.slane %v4340_v61, 7  ;;  %v592_v24 = vmul.f32 %v4225_v41, %v527_v37  ;;  %v779_v34 = vand.u32 15, %v689_v2  ;;  %v691_v62 = vadd.s32 88, %v4232_v43 }
  0xda   : > { %v4295_v11 = vmax.f32 %v620_v6, 0.0  ;;  %1785 = vrot.lane.b32.xlu1 %v1718_v7, %s4024_s30  ;;  %1494 = vst.msk [vmem:[#allocation2 + $0x18] sm:$0xf] %vm1489_vm3, %v1460_v12  ;;  %vm4342_vm11 = vcmp.eq.s32.totalorder %v765_v47, 15  ;;  %v3790_v6 = vld [vmem:[%s5268_s4] sm:$0x30]  ;;  %v4384_v33 = vpop.f32.mrf.mxu2 }
  0xdb   : > { %v3562_v9 = vor.u32 %v3790_v6, %v3561_v4  ;;  %v628_v39 = vadd.f32 %v4230_v42, %v592_v24  ;;  %v1151_v47 = vsel %vm1128_vm1, %v1148_v13, %v1150_v8  ;;  %vm1395_vm15 = vcmp.eq.s32.totalorder %v779_v34, 15 }
  0xdc   : > { %v1138_v16 = vrot.slane %v4295_v11, 7  ;;  %v1527_v17 = vpack.c.bf16 %v4295_v11, %v4295_v11  ;;  %v1235_v18 = vrot.slane %v4295_v11, 1  ;;  %v3807_v11 = vld [vmem:[%s5268_s4 + $0x8] sm:$0x30]  ;;  %v1467_v49 = vpack.c.bf16 %v1151_v47, %v1151_v47 }
  0xdd   : > { %v510_v20 = vpop.f32.mrf.mxu0  ;;  %v3648_v21 = vor.u32 %v3807_v11, %v3647_v10  ;;  %v793_v11 = vand.u32 15, %v691_v62  ;;  %v695_v47 = vadd.s32 120, %v4232_v43  ;;  %vm1450_vm8 = vcmask 93184  }
  0xde   : > { %v585_v22 = vmul.f32 %v4225_v41, %v510_v20  ;;  %1596 = vrot.lane.b32.xlu0 %v1527_v17, %s4023_s23  ;;  %v1236_v23 = vsel %vm1225_vm4, %v1233_v60, %v1235_v18  ;;  %v1139_v29 = vsel %vm1128_vm1, %v1136_v59, %v1138_v16  ;;  %v688_v60 = vadd.s32 64, %v4232_v43  ;;  %v530_v17 = vpop.f32.mrf.mxu1  ;;  %1501 = vst.msk [vmem:[#allocation2 + $0x34] sm:$0xf] %vm1489_vm3, %v1467_v49 }
  0xdf   : > { %v1719_v26 = vpack.c.bf16 %v1236_v23, %v1236_v23  ;;  %v1461_v32 = vpack.c.bf16 %v1139_v29, %v1139_v29  ;;  %v2078_v20 = vsel %vm2076_vm13, %v3562_v9, 0  ;;  %v593_v28 = vmul.f32 %v4225_v41, %v530_v17 }
  0xe0   : > { %v621_v30 = vadd.f32 %v4230_v42, %v585_v22  ;;  %2087 = vmatpush.bf16.msrb.mxu1 %v2078_v20  ;;  %v2371_v29 = vsel %vm2076_vm13, %v3648_v21, 0  ;;  %v1532_v17 = vpack.c.bf16 %v4289_v5, %v4289_v5  ;;  %v693_v20 = vadd.s32 104, %v4232_v43 }
  0xe1   : > { %1495 = vst.msk [vmem:[#allocation2 + $0x1c] sm:$0xf] %vm1489_vm3, %v1461_v32  ;;  %v1530_v32 = vpack.c.bf16 %v4280_v57, %v4280_v57  ;;  %2380 = vmatpush.bf16.msrb.mxu2 %v2371_v29  ;;  %v3733_v57 = vld [vmem:[%s5268_s4 + $0x10] sm:$0xf]  ;;  %vm1397_vm6 = vcmp.eq.s32.totalorder %v793_v11, 15 }
  0xe2   : > { %v4321_v36 = vmax.f32 %v621_v30, 0.0  ;;  %1787 = vrot.lane.b32.xlu1 %v1719_v26, %s4024_s30  ;;  %v1245_v30 = vrot.slane %v4289_v5, 1  ;;  %v4427_v4 = vpop.f32.mrf.mxu2 }
  0xe4   : > { %v1237_v40 = vrot.slane %v4321_v36, 1  ;;  %v1528_v44 = vpack.c.bf16 %v4321_v36, %v4321_v36  ;;  %v1140_v53 = vrot.slane %v4321_v36, 7 }
  0xe5   : > { %v512_v45 = vpop.f32.mrf.mxu0 }
  0xe6   : > { %v586_v50 = vmul.f32 %v4225_v41, %v512_v45  ;;  %1598 = vrot.lane.b32.xlu0 %v1528_v44, %s4023_s23  ;;  %v1238_v51 = vsel %vm1225_vm4, %v1235_v18, %v1237_v40  ;;  %v1141_v7 = vsel %vm1128_vm1, %v1138_v16, %v1140_v53  ;;  %v772_v18 = vand.u32 15, %v688_v60 }
  0xe7   : > { %v1423_v55 = vsel %vm1391_vm10, 0.0, %v1238_v51  ;;  %v4368_v16 = vmax.f32 %v627_v63, 0.0  ;;  %v1360_v25 = vsel %vm4347_vm12, 0.0, %v1141_v7  ;;  %v629_v44 = vadd.f32 %v4230_v42, %v593_v28 }
  0xe8   : > { %v622_v58 = vadd.f32 %v4230_v42, %v586_v50  ;;  %v1720_v59 = vpack.c.bf16 %v1423_v55, %v1423_v55  ;;  %v1462_v35 = vpack.c.bf16 %v1360_v25, %v1360_v25  ;;  %vm1330_vm14 = vcmp.eq.s32.totalorder %v772_v18, 0  ;;  %v532_v18 = vpop.f32.mrf.mxu1 }
  0xe9   : > { %v1152_v37 = vrot.slane %v4368_v16, 7  ;;  %v1246_v55 = vsel %vm1225_vm4, %v1243_v15, %v1245_v30  ;;  %v1531_v60 = vpack.c.bf16 %v4277_v54, %v4277_v54  ;;  %v1247_v54 = vrot.slane %v4340_v61, 1 }
  0xea   : > { %v654_v1 = vmax.f32 %v622_v58, 0.0  ;;  %1789 = vrot.lane.b32.xlu2 %v1720_v59, %s4024_s30  ;;  %1496 = vst.msk [vmem:[#allocation2 + $0x20] sm:$0xf] %vm1489_vm3, %v1462_v35  ;;  %v4415_v58 = vmax.f32 %v629_v44, 0.0  ;;  %v1427_v0 = vsel %vm1395_vm15, 0.0, %v1246_v55  ;;  %v1249_v9 = vrot.slane %v4368_v16, 1 }
  0xeb   : > { %v1153_v13 = vsel %vm1128_vm1, %v1150_v8, %v1152_v37  ;;  %v694_v8 = vadd.s32 112, %v4232_v43  ;;  %v1724_v10 = vpack.c.bf16 %v1427_v0, %v1427_v0  ;;  %v1533_v15 = vpack.c.bf16 %v4340_v61, %v4340_v61 }
  0xec   : > { %v1239_v12 = vrot.slane %v654_v1, 1  ;;  %v1529_v14 = vpack.c.bf16 %v654_v1, %v654_v1  ;;  %v1142_v19 = vrot.slane %v654_v1, 7  ;;  %v1156_v1 = vrot.slane %v4415_v58, 7 }
  0xed   : > { %v595_v61 = vmul.f32 %v4225_v41, %v4334_v52  ;;  %v594_v25 = vmul.f32 %v4225_v41, %v532_v18  ;;  %v1253_v28 = vrot.slane %v4415_v58, 1  ;;  %v1534_v34 = vpack.c.bf16 %v4368_v16, %v4368_v16 }
  0xee   : > { %1600 = vrot.lane.b32.xlu1 %v1529_v14, %s4023_s23  ;;  %v1242_v22 = vsel %vm1225_vm4, %v1239_v12, %v1241_v56  ;;  %v1240_v23 = vsel %vm1225_vm4, %v1237_v40, %v1239_v12  ;;  %v1143_v36 = vsel %vm1128_vm1, %v1140_v53, %v1142_v19  ;;  %v692_v40 = vadd.s32 96, %v4232_v43 }
  0xef   : > { %v1425_v26 = vsel %vm4342_vm11, 0.0, %v1242_v22  ;;  %v1721_v27 = vpack.c.bf16 %v1240_v23, %v1240_v23  ;;  %v1463_v45 = vpack.c.bf16 %v1143_v36, %v1143_v36  ;;  %v1145_v46 = vsel %vm1128_vm1, %v1142_v19, %v1144_v3  ;;  %v3824_v3 = vld [vmem:[%s5268_s4 + $0x10] sm:$0x30] }
  0xf0   : > { %v1722_v31 = vpack.c.bf16 %v1425_v26, %v1425_v26  ;;  %v1362_v48 = vsel %vm1330_vm14, 0.0, %v1145_v46  ;;  %v800_v50 = vand.u32 15, %v692_v40  ;;  %v1723_v53 = vpack.c.bf16 %v1244_v38, %v1244_v38 }
  0xf1   : > { %1497 = vst.msk [vmem:[#allocation2 + $0x24] sm:$0xf] %vm1489_vm3, %v1463_v45  ;;  %v1464_v51 = vpack.c.bf16 %v1362_v48, %v1362_v48  ;;  %v4413_v56 = vmax.f32 %v628_v39, 0.0  ;;  %v3734_v59 = vor.u32 %v3824_v3, %v3733_v57  ;;  %v814_v14 = vand.u32 15, %v694_v8 }
  0xf2   : > { %1793 = vrot.lane.b32.xlu0 %v1722_v31, %s4024_s30  ;;  %1791 = vrot.lane.b32.xlu2 %v1721_v27, %s4024_s30  ;;  %vm1334_vm2 = vcmp.eq.s32.totalorder %v800_v50, 0  ;;  %v1248_v19 = vsel %vm1225_vm4, %v1245_v30, %v1247_v54  ;;  %v1250_v22 = vsel %vm1225_vm4, %v1247_v54, %v1249_v9  ;;  %v807_v30 = vand.u32 15, %v693_v20  ;;  %v542_v31 = vpop.f32.mrf.mxu2 }
  0xf3   : > { %1498 = vst.msk [vmem:[#allocation2 + $0x28] sm:$0xf] %vm1489_vm3, %v1464_v51  ;;  %v1154_v63 = vrot.slane %v4413_v56, 7  ;;  %v2728_v2 = vsel %vm2076_vm13, %v3734_v59, 0  ;;  %v1366_v6 = vsel %vm1334_vm2, 0.0, %v1153_v13  ;;  %vm1336_vm5 = vcmp.eq.s32.totalorder %v814_v14, 0 }
  0xf4   : > { %2737 = vmatpush.bf16.msrb.mxu3 %v2728_v2  ;;  %v1468_v7 = vpack.c.bf16 %v1366_v6, %v1366_v6  ;;  %v1725_v5 = vpack.c.bf16 %v1248_v19, %v1248_v19  ;;  %v1251_v27 = vrot.slane %v4413_v56, 1  ;;  %v1429_v29 = vsel %vm1397_vm6, 0.0, %v1250_v22 }
  0xf5   : > { %v1157_v12 = vsel %vm1128_vm1, %v1154_v63, %v1156_v1  ;;  %v1155_v21 = vsel %vm1128_vm1, %v1152_v37, %v1154_v63  ;;  %v631_v52 = vadd.f32 %v4230_v42, %v595_v61  ;;  %v1726_v35 = vpack.c.bf16 %v1429_v29, %v1429_v29 }
  0xf6   : > { %1602 = vrot.lane.b32.xlu1 %v1530_v32, %s4023_s23  ;;  %1502 = vst.msk [vmem:[#allocation2 + $0x38] sm:$0xf] %vm1489_vm3, %v1468_v7  ;;  %v1469_v23 = vpack.c.bf16 %v1155_v21, %v1155_v21  ;;  %v1368_v24 = vsel %vm1336_vm5, 0.0, %v1157_v12  ;;  %v630_v32 = vadd.f32 %v4230_v42, %v594_v25  ;;  %v1254_v36 = vsel %vm1225_vm4, %v1251_v27, %v1253_v28 }
  0xf7   : > { %v1470_v26 = vpack.c.bf16 %v1368_v24, %v1368_v24  ;;  %vm1399_vm7 = vcmp.eq.s32.totalorder %v807_v30, 15  ;;  %v4462_v37 = vmax.f32 %v631_v52, 0.0  ;;  %v1535_v39 = vpack.c.bf16 %v4413_v56, %v4413_v56 }
  0xf8   : > { %1503 = vst.msk [vmem:[#allocation2 + $0x3c] sm:$0xf] %vm1489_vm3, %v1469_v23  ;;  %v662_v38 = vmax.f32 %v630_v32, 0.0  ;;  %v1431_v40 = vsel %vm1399_vm7, 0.0, %v1254_v36  ;;  %v1252_v16 = vsel %vm1225_vm4, %v1249_v9, %v1251_v27  ;;  %v696_v46 = vadd.s32 128, %v4232_v43 }
  0xf9   : > { %1504 = vst.msk [vmem:[#allocation2 + $0x40] sm:$0xf] %vm1489_vm3, %v1470_v26  ;;  %v1160_v44 = vrot.slane %v4462_v37, 7  ;;  %v596_v48 = vmul.f32 %v4225_v41, %v4384_v33  ;;  %v1728_v49 = vpack.c.bf16 %v1431_v40, %v1431_v40  ;;  %v1727_v51 = vpack.c.bf16 %v1252_v16, %v1252_v16 }
  0xfa   : > { %1795 = vrot.lane.b32.xlu0 %v1723_v53, %s4024_s30  ;;  %1604 = vrot.lane.b32.xlu2 %v1531_v60, %s4023_s23  ;;  %v1158_v45 = vrot.slane %v662_v38, 7  ;;  %v828_v50 = vand.u32 15, %v696_v46  ;;  %v1255_v53 = vrot.slane %v662_v38, 1  ;;  %v545_v55 = vpop.f32.mrf.mxu2  ;;  %v597_v57 = vmul.f32 %v4225_v41, %v4427_v4 }
  0xfb   : > { %v4025_v3 = vmov 0   ;;  %v1257_v56 = vrot.slane %v4462_v37, 1  ;;  %v821_v59 = vand.u32 15, %v695_v47  ;;  %v1536_v0 = vpack.c.bf16 %v4415_v58, %v4415_v58 }
  0xfc   : > { %1451 = vst.msk [vmem:[#allocation2] sm:$0xf] %vm1450_vm8, %v4025_v3  ;;  %v1159_v13 = vsel %vm1128_vm1, %v1156_v1, %v1158_v45  ;;  %v1161_v33 = vsel %vm1128_vm1, %v1158_v45, %v1160_v44  ;;  %vm1338_vm9 = vcmp.eq.s32.totalorder %v828_v50, 0  ;;  %v1256_v1 = vsel %vm1225_vm4, %v1253_v28, %v1255_v53 }
  0xfd   : > { %1452 = vst.msk [vmem:[#allocation2 + $0x4] sm:$0xf] %vm1450_vm8, %v4025_v3  ;;  %v1471_v60 = vpack.c.bf16 %v1159_v13, %v1159_v13  ;;  %v1370_v62 = vsel %vm1338_vm9, 0.0, %v1161_v33  ;;  %v632_v2 = vadd.f32 %v4230_v42, %v596_v48  ;;  %v633_v4 = vadd.f32 %v4230_v42, %v597_v57  ;;  %v4534_v48 = vpop.f32.mrf.mxu3 }
  0xfe   : > { %1797 = vrot.lane.b32.xlu1 %v1724_v10, %s4024_s30  ;;  %1454 = vst.msk [vmem:[#allocation2 + $0x88] sm:$0xf] %vm1450_vm8, %v4025_v3  ;;  %v1472_v63 = vpack.c.bf16 %v1370_v62, %v1370_v62  ;;  %v1258_v6 = vsel %vm1225_vm4, %v1255_v53, %v1257_v56  ;;  %vm1401_vm10 = vcmp.eq.s32.totalorder %v821_v59, 15  ;;  %v1729_v54 = vpack.c.bf16 %v1256_v1, %v1256_v1 }
  0xff   : > { %1455 = vst.msk [vmem:[#allocation2 + $0x8c] sm:$0xf] %vm1450_vm8, %v4025_v3  ;;  %v598_v58 = vmul.f32 %v4225_v41, %v542_v31  ;;  %v599_v7 = vmul.f32 %v4225_v41, %v545_v55  ;;  %v1537_v8 = vpack.c.bf16 %v662_v38, %v662_v38  ;;  %vm2027_vm11 = vcmask 97280  }
 0x100   : > { %1505 = vst.msk [vmem:[#allocation2 + $0x44] sm:$0xf] %vm1489_vm3, %v1471_v60  ;;  %v664_v10 = vmax.f32 %v632_v2, 0.0  ;;  %v4501_v11 = vmax.f32 %v633_v4, 0.0  ;;  %v1433_v12 = vsel %vm1401_vm10, 0.0, %v1258_v6  ;;  %v698_v23 = vadd.s32 144, %v4232_v43 }
 0x101   : > { %1506 = vst.msk [vmem:[#allocation2 + $0x48] sm:$0xf] %vm1489_vm3, %v1472_v63  ;;  %v634_v19 = vadd.f32 %v4230_v42, %v598_v58  ;;  %v1730_v20 = vpack.c.bf16 %v1433_v12, %v1433_v12  ;;  %v635_v21 = vadd.f32 %v4230_v42, %v599_v7  ;;  %vm1682_vm12 = vcmask 60448  }
 0x102   : > { %1608 = vrot.lane.b32.xlu0 %v1533_v15, %s4023_s23  ;;  %1606 = vrot.lane.b32.xlu2 %v1532_v17, %s4023_s23  ;;  %v547_v9 = vpop.f32.mrf.mxu2  ;;  %v697_v15 = vadd.s32 136, %v4232_v43  ;;  %v1162_v17 = vrot.slane %v664_v10, 7  ;;  %v1164_v18 = vrot.slane %v4501_v11, 7  ;;  %v1259_v22 = vrot.slane %v664_v10, 1 }
 0x103   : > { %v1261_v24 = vrot.slane %v4501_v11, 1  ;;  %v842_v26 = vand.u32 15, %v698_v23  ;;  %v1539_v27 = vpack.c.bf16 %v664_v10, %v664_v10  ;;  %v4516_v28 = vmax.f32 %v635_v21, 0.0 }
 0x104   : > { %v3774_v14 = vld [vmem:[#allocation2] sm:$0xff]  ;;  %v835_v61 = vand.u32 15, %v697_v15  ;;  %v1165_v25 = vsel %vm1128_vm1, %v1162_v17, %v1164_v18  ;;  %v1538_v29 = vpack.c.bf16 %v4462_v37, %v4462_v37  ;;  %v1260_v30 = vsel %vm1225_vm4, %v1257_v56, %v1259_v22 }
 0x105   : > { %3563 = vmatmul.msk.bf16.vlgmr.msrb.gmra.mxu1 %vm2027_vm11, %v3774_v14  ;;  %v699_v31 = vadd.s32 152, %v4232_v43  ;;  %v1163_v52 = vsel %vm1128_vm1, %v1160_v44, %v1162_v17  ;;  %vm1340_vm13 = vcmp.eq.s32.totalorder %v842_v26, 0  ;;  %v1265_v45 = vrot.slane %v4516_v28, 1  ;;  %v557_v2 = vpop.f32.mrf.mxu3 }
 0x106   : > { %1799 = vrot.lane.b32.xlu1 %v1725_v5, %s4024_s30  ;;  %v666_v5 = vmax.f32 %v634_v19, 0.0  ;;  %vm1403_vm14 = vcmp.eq.s32.totalorder %v835_v61, 15  ;;  %v1473_v36 = vpack.c.bf16 %v1163_v52, %v1163_v52  ;;  %v1372_v38 = vsel %vm1340_vm13, 0.0, %v1165_v25 }
 0x107   : > { %v1731_v16 = vpack.c.bf16 %v1260_v30, %v1260_v30  ;;  %v849_v37 = vand.u32 15, %v699_v31  ;;  %v600_v44 = vmul.f32 %v4225_v41, %v547_v9  ;;  %v1168_v33 = vrot.slane %v4516_v28, 7 }
 0x108   : > { %v1263_v40 = vrot.slane %v666_v5, 1  ;;  %1507 = vst.msk [vmem:[#allocation2 + $0x4c] sm:$0xf] %vm1489_vm3, %v1473_v36  ;;  %v1166_v13 = vrot.slane %v666_v5, 7  ;;  %v1541_v56 = vpack.c.bf16 %v666_v5, %v666_v5  ;;  %v701_v1 = vadd.s32 168, %v4232_v43 }
 0x109   : > { %vm1405_vm15 = vcmp.eq.s32.totalorder %v849_v37, 15  ;;  %v636_v53 = vadd.f32 %v4230_v42, %v600_v44  ;;  %vm1875_vm5 = vcmask 93248   ;;  %v702_v36 = vadd.s32 176, %v4232_v43 }
 0x10a   : > { %1610 = vrot.lane.b32.xlu0 %v1534_v34, %s4023_s23  ;;  %1801 = vrot.lane.b32.xlu2 %v1726_v35, %s4024_s30  ;;  %v1262_v34 = vsel %vm1225_vm4, %v1259_v22, %v1261_v24  ;;  %v550_v35 = vpop.f32.mrf.mxu2  ;;  %v1264_v63 = vsel %vm1225_vm4, %v1261_v24, %v1263_v40  ;;  %v1169_v4 = vsel %vm1128_vm1, %v1166_v13, %v1168_v33  ;;  %v863_v17 = vand.u32 15, %v701_v1 }
 0x10b   : > { %v1435_v46 = vsel %vm1403_vm14, 0.0, %v1262_v34  ;;  %v601_v47 = vmul.f32 %v4225_v41, %v550_v35  ;;  %v4547_v60 = vmax.f32 %v636_v53, 0.0  ;;  %v1733_v7 = vpack.c.bf16 %v1264_v63, %v1264_v63 }
 0x10c   : > { %v1732_v50 = vpack.c.bf16 %v1435_v46, %v1435_v46  ;;  %v1167_v10 = vsel %vm1128_vm1, %v1164_v18, %v1166_v13  ;;  %vm1407_vm6 = vcmp.eq.s32.totalorder %v863_v17, 15 }
 0x10d   : > { %v637_v55 = vadd.f32 %v4230_v42, %v601_v47  ;;  %v1267_v9 = vrot.slane %v4547_v60, 1  ;;  %v1475_v19 = vpack.c.bf16 %v1167_v10, %v1167_v10  ;;  %v560_v61 = vpop.f32.mrf.mxu3  ;;  %v1543_v26 = vpack.c.bf16 %v4547_v60, %v4547_v60 }
 0x10e   : > { %1612 = vrot.lane.b32.xlu1 %v1535_v39, %s4023_s23  ;;  %v1474_v39 = vpack.c.bf16 %v1372_v38, %v1372_v38  ;;  %v605_v30 = vmul.f32 %v4225_v41, %v560_v61  ;;  %v1170_v31 = vrot.slane %v4547_v60, 7  ;;  %v704_v10 = vadd.s32 192, %v4232_v43 }
 0x10f   : > { %v4549_v62 = vmax.f32 %v637_v55, 0.0  ;;  %v1268_v22 = vsel %vm1225_vm4, %v1265_v45, %v1267_v9  ;;  %1509 = vst.msk [vmem:[#allocation2 + $0x54] sm:$0xf] %vm1489_vm3, %v1475_v19 }
 0x110   : > { %1508 = vst.msk [vmem:[#allocation2 + $0x50] sm:$0xf] %vm1489_vm3, %v1474_v39  ;;  %v1735_v25 = vpack.c.bf16 %v1268_v22, %v1268_v22  ;;  %v1171_v46 = vsel %vm1128_vm1, %v1168_v33, %v1170_v31 }
 0x111   : > { %v1172_v52 = vrot.slane %v4549_v62, 7 }
 0x112   : > { %1805 = vrot.lane.b32.xlu0 %v1728_v49, %s4024_s30  ;;  %1803 = vrot.lane.b32.xlu2 %v1727_v51, %s4024_s30  ;;  %v1540_v49 = vpack.c.bf16 %v4501_v11, %v4501_v11  ;;  %v1266_v51 = vsel %vm1225_vm4, %v1263_v40, %v1265_v45  ;;  %v552_v6 = vpop.f32.mrf.mxu2  ;;  %v1542_v11 = vpack.c.bf16 %v4516_v28, %v4516_v28  ;;  %v870_v45 = vand.u32 15, %v702_v36 }
 0x113   : > { %v1437_v59 = vsel %vm1405_vm15, 0.0, %v1266_v51  ;;  %v602_v15 = vmul.f32 %v4225_v41, %v552_v6  ;;  %v641_v40 = vadd.f32 %v4230_v42, %v605_v30  ;;  %v1544_v51 = vpack.c.bf16 %v4549_v62, %v4549_v62 }
 0x114   : > { %v1734_v58 = vpack.c.bf16 %v1437_v59, %v1437_v59  ;;  %vm1344_vm7 = vcmp.eq.s32.totalorder %v870_v45, 0 }
 0x115   : > { %v638_v23 = vadd.f32 %v4230_v42, %v602_v15  ;;  %v562_v63 = vpop.f32.mrf.mxu3  ;;  %v4646_v15 = vld [vmem:[%s5266_s2] ss:$0 sm:$0xff] }
 0x116   : > { %1614 = vrot.lane.b32.xlu1 %v1536_v0, %s4023_s23  ;;  %v700_v0 = vadd.s32 160, %v4232_v43  ;;  %v606_v17 = vmul.f32 %v4646_v15, %v562_v63 }
 0x11a   : > { %1807 = vrot.lane.b32.xlu0 %v1729_v54, %s4024_s30  ;;  %1616 = vrot.lane.b32.xlu2 %v1537_v8, %s4023_s23  ;;  %v856_v54 = vand.u32 15, %v700_v0  ;;  %v1269_v8 = vrot.slane %v4549_v62, 1 }
 0x11c   : > { %vm1342_vm2 = vcmp.eq.s32.totalorder %v856_v54, 0  ;;  %v1270_v24 = vsel %vm1225_vm4, %v1267_v9, %v1269_v8 }
 0x11d   : > { %v1439_v5 = vsel %vm1407_vm6, 0.0, %v1270_v24  ;;  %v565_v19 = vpop.f32.mrf.mxu3 }
 0x11e   : > { %1809 = vrot.lane.b32.xlu1 %v1730_v20, %s4024_s30  ;;  %v1374_v20 = vsel %vm1342_vm2, 0.0, %v1169_v4  ;;  %v1736_v34 = vpack.c.bf16 %v1439_v5, %v1439_v5  ;;  %v703_v4 = vadd.s32 184, %v4232_v43 }
 0x11f   : > { %v1476_v21 = vpack.c.bf16 %v1374_v20, %v1374_v20  ;;  %v884_v20 = vand.u32 15, %v704_v10 }
 0x120   : > { %v1591_v32 = vpop.permute.xlu2 %1590 }
 0x121   : > { %1685 = vst.msk [vmem:[#allocation2 + $0x10] sm:$0xf] %vm1682_vm12, %v1591_v32  ;;  %v603_v32 = vmul.f32 %v4225_v41, %v4534_v48  ;;  %v4607_v48 = vmax.f32 %v641_v40, 0.0  ;;  %vm1346_vm10 = vcmp.eq.s32.totalorder %v884_v20, 0 }
 0x122   : > { %1620 = vrot.lane.b32.xlu0 %v1539_v27, %s4023_s23  ;;  %1618 = vrot.lane.b32.xlu2 %v1538_v29, %s4023_s23  ;;  %1510 = vst.msk [vmem:[#allocation2 + $0x58] sm:$0xf] %vm1489_vm3, %v1476_v21  ;;  %v604_v27 = vmul.f32 %v4225_v41, %v557_v2  ;;  %v4580_v29 = vmax.f32 %v638_v23, 0.0  ;;  %v1173_v41 = vsel %vm1128_vm1, %v1170_v31, %v1172_v52 }
 0x123   : > { %v1277_v59 = vrot.slane %v4607_v48, 1  ;;  %v1548_v30 = vpack.c.bf16 %v4607_v48, %v4607_v48 }
 0x124   : > { %v640_v35 = vadd.f32 %v4230_v42, %v604_v27  ;;  %v1271_v39 = vrot.slane %v4580_v29, 1  ;;  %v1545_v37 = vpack.c.bf16 %v4580_v29, %v4580_v29  ;;  %v1174_v54 = vrot.slane %v4580_v29, 7 }
 0x126   : > { %1811 = vrot.lane.b32.xlu1 %v1731_v16, %s4024_s30  ;;  %v639_v16 = vadd.f32 %v4230_v42, %v603_v32  ;;  %v4601_v44 = vmax.f32 %v640_v35, 0.0  ;;  %v1272_v47 = vsel %vm1225_vm4, %v1269_v8, %v1271_v39  ;;  %v705_v42 = vadd.s32 200, %v4232_v43 }
 0x127   : > { %v877_v8 = vand.u32 15, %v703_v4  ;;  %v1175_v23 = vsel %vm1128_vm1, %v1172_v52, %v1174_v54 }
 0x128   : > { %v1587_v57 = vpop.permute.xlu0 %1586  ;;  %v1593_v3 = vpop.permute.xlu2 %1592  ;;  %v4612_v55 = vmax.f32 %v639_v16, 0.0  ;;  %v891_v60 = vand.u32 15, %v705_v42  ;;  %v1479_v5 = vpack.c.bf16 %v1175_v23, %v1175_v23 }
 0x129   : > { %1683 = vst.msk [vmem:[#allocation2 + $0x8] sm:$0xf] %vm1682_vm12, %v1587_v57  ;;  %v1275_v57 = vrot.slane %v4601_v44, 1  ;;  %vm1409_vm9 = vcmp.eq.s32.totalorder %v877_v8, 15 }
 0x12a   : > { %1686 = vst.msk [vmem:[#allocation2 + $0x14] sm:$0xf] %vm1682_vm12, %v1593_v3  ;;  %1622 = vrot.lane.b32.xlu0 %v1540_v49, %s4023_s23  ;;  %1813 = vrot.lane.b32.xlu2 %v1732_v50, %s4024_s30  ;;  %v1477_v49 = vpack.c.bf16 %v1171_v46, %v1171_v46  ;;  %v1376_v50 = vsel %vm1344_vm7, 0.0, %v1173_v41  ;;  %v1737_v3 = vpack.c.bf16 %v1272_v47, %v1272_v47  ;;  %v1273_v1 = vrot.slane %v4612_v55, 1 }
 0x12b   : > { %v1478_v53 = vpack.c.bf16 %v1376_v50, %v1376_v50  ;;  %v1546_v0 = vpack.c.bf16 %v4612_v55, %v4612_v55  ;;  %v1278_v2 = vsel %vm1225_vm4, %v1275_v57, %v1277_v59  ;;  %vm1411_vm8 = vcmp.eq.s32.totalorder %v891_v60, 15  ;;  %1513 = vst.msk [vmem:[#allocation2 + $0x64] sm:$0xf] %vm1489_vm3, %v1479_v5 }
 0x12c   : > { %1511 = vst.msk [vmem:[#allocation2 + $0x5c] sm:$0xf] %vm1489_vm3, %v1477_v49  ;;  %v1176_v6 = vrot.slane %v4612_v55, 7  ;;  %v1274_v9 = vsel %vm1225_vm4, %v1271_v39, %v1273_v1  ;;  %v567_v39 = vpop.f32.mrf.mxu3  ;;  %v1276_v46 = vsel %vm1225_vm4, %v1273_v1, %v1275_v57  ;;  %v707_v47 = vadd.s32 216, %v4232_v43 }
 0x12d   : > { %1512 = vst.msk [vmem:[#allocation2 + $0x60] sm:$0xf] %vm1489_vm3, %v1478_v53  ;;  %v608_v41 = vmul.f32 %v4646_v15, %v567_v39  ;;  %v1178_v49 = vrot.slane %v4601_v44, 7  ;;  %v1180_v50 = vrot.slane %v4607_v48, 7  ;;  %v1739_v42 = vpack.c.bf16 %v1276_v46, %v1276_v46 }
 0x12e   : > { %1624 = vrot.lane.b32.xlu1 %v1541_v56, %s4023_s23  ;;  %v1177_v24 = vsel %vm1128_vm1, %v1174_v54, %v1176_v6  ;;  %v905_v53 = vand.u32 15, %v707_v47  ;;  %v706_v57 = vadd.s32 208, %v4232_v43 }
 0x12f   : > { %v1378_v27 = vsel %vm1346_vm10, 0.0, %v1177_v24  ;;  %v1179_v60 = vsel %vm1128_vm1, %v1176_v6, %v1178_v49 }
 0x130   : > { %v1589_v12 = vpop.permute.xlu0 %1588  ;;  %v1595_v14 = vpop.permute.xlu2 %1594  ;;  %v1480_v31 = vpack.c.bf16 %v1378_v27, %v1378_v27  ;;  %vm1413_vm13 = vcmp.eq.s32.totalorder %v905_v53, 15 }
 0x131   : > { %1684 = vst.msk [vmem:[#allocation2 + $0xc] sm:$0xf] %vm1682_vm12, %v1589_v12 }
 0x132   : > { %1687 = vst.msk [vmem:[#allocation2 + $0x18] sm:$0xf] %vm1682_vm12, %v1595_v14  ;;  %1817 = vrot.lane.b32.xlu0 %v1734_v58, %s4024_s30  ;;  %1815 = vrot.lane.b32.xlu2 %v1733_v7, %s4024_s30  ;;  %v1547_v58 = vpack.c.bf16 %v4601_v44, %v4601_v44  ;;  %v1443_v7 = vsel %vm1411_vm8, 0.0, %v1278_v2  ;;  %vm3116_vm8 = vcmask 1041408  }
 0x133   : > { %v1780_v18 = vpop.permute.xlu1 %1779  ;;  %v1740_v21 = vpack.c.bf16 %v1443_v7, %v1443_v7  ;;  %1514 = vst.msk [vmem:[#allocation2 + $0x68] sm:$0xf] %vm1489_vm3, %v1480_v31 }
 0x134   : > { %1876 = vst.msk [vmem:[#allocation2 + $0x8] sm:$0xf] %vm1875_vm5, %v1780_v18  ;;  %v607_v18 = vmul.f32 %v4646_v15, %v565_v19 }
 0x136   : > { %1626 = vrot.lane.b32.xlu1 %v1542_v11, %s4023_s23  ;;  %v1441_v11 = vsel %vm1409_vm9, 0.0, %v1274_v9 }
 0x137   : > { %v1738_v22 = vpack.c.bf16 %v1441_v11, %v1441_v11 }
 0x13a   : > { %1819 = vrot.lane.b32.xlu0 %v1735_v25, %s4024_s30  ;;  %1628 = vrot.lane.b32.xlu2 %v1543_v26, %s4023_s23  ;;  %v4660_v25 = vld [vmem:[%s5267_s3] ss:$0 sm:$0xff] }
 0x13b   : > { %v643_v26 = vadd.f32 %v4660_v25, %v607_v18  ;;  %v642_v62 = vadd.f32 %v4660_v25, %v606_v17  ;;  %v644_v16 = vadd.f32 %v4660_v25, %v608_v41  ;;  %v708_v18 = vadd.s32 224, %v4232_v43 }
 0x13c   : > { %v1782_v38 = vpop.permute.xlu1 %1781 }
 0x13d   : > { %1877 = vst.msk [vmem:[#allocation2 + $0xc] sm:$0xf] %vm1875_vm5, %v1782_v38  ;;  %v4668_v29 = vmax.f32 %v643_v26, 0.0  ;;  %v4674_v38 = vmax.f32 %v642_v62, 0.0  ;;  %v4703_v44 = vmax.f32 %v644_v16, 0.0  ;;  %v912_v5 = vand.u32 15, %v708_v18 }
 0x13e   : > { %1821 = vrot.lane.b32.xlu1 %v1736_v34, %s4024_s30 }
 0x13f   : > { %v1281_v40 = vrot.slane %v4668_v29, 1  ;;  %v1283_v1 = vrot.slane %v4703_v44, 1  ;;  %v1551_v54 = vpack.c.bf16 %v4703_v44, %v4703_v44  ;;  %v1182_v20 = vrot.slane %v4674_v38, 7 }
 0x140   : > { %vm1350_vm15 = vcmp.eq.s32.totalorder %v912_v5, 0 }
 0x141   : > { %v1284_v55 = vsel %vm1225_vm4, %v1281_v40, %v1283_v1  ;;  %v1183_v62 = vsel %vm1128_vm1, %v1180_v50, %v1182_v20 }
 0x142   : > { %1632 = vrot.lane.b32.xlu0 %v1545_v37, %s4023_s23  ;;  %1630 = vrot.lane.b32.xlu2 %v1544_v51, %s4023_s23  ;;  %v1279_v37 = vrot.slane %v4674_v38, 1  ;;  %v1743_v10 = vpack.c.bf16 %v1284_v55, %v1284_v55  ;;  %v1483_v31 = vpack.c.bf16 %v1183_v62, %v1183_v62 }
 0x143   : > { %v1784_v28 = vpop.permute.xlu0 %1783 }
 0x144   : > { %1878 = vst.msk [vmem:[#allocation2 + $0x10] sm:$0xf] %vm1875_vm5, %v1784_v28  ;;  %v1790_v13 = vpop.permute.xlu2 %1789  ;;  %v3775_v33 = vld [vmem:[#allocation2 + $0x8] sm:$0xff]  ;;  %v1280_v51 = vsel %vm1225_vm4, %v1277_v59, %v1279_v37  ;;  %v1282_v28 = vsel %vm1225_vm4, %v1279_v37, %v1281_v40  ;;  %v1186_v37 = vrot.slane %v4703_v44, 7 }
 0x145   : > { %v3791_v56 = vld [vmem:[#allocation2 + $0x8] sm:$0xff]  ;;  %3564 = vmatmul.msk.bf16.gmra.mxu1 %vm2027_vm11, %v3775_v33  ;;  %v1181_v33 = vsel %vm1128_vm1, %v1178_v49, %v1180_v50  ;;  %v1445_v48 = vsel %vm1413_vm13, 0.0, %v1282_v28  ;;  %1517 = vst.msk [vmem:[#allocation2 + $0x74] sm:$0xf] %vm1489_vm3, %v1483_v31  ;;  %v711_v49 = vadd.s32 248, %v4232_v43 }
 0x146   : > { %3649 = vmatmul.msk.bf16.vlgmr.msrb.gmra.mxu2 %vm2027_vm11, %v3791_v56  ;;  %1823 = vrot.lane.b32.xlu1 %v1737_v3, %s4024_s30  ;;  %v898_v56 = vand.u32 15, %v706_v57  ;;  %v1742_v59 = vpack.c.bf16 %v1445_v48, %v1445_v48 }
 0x147   : > { %v933_v53 = vand.u32 15, %v711_v49 }
 0x148   : > { %vm1348_vm14 = vcmp.eq.s32.totalorder %v898_v56, 0 }
 0x149   : > { %v1380_v2 = vsel %vm1348_vm14, 0.0, %v1181_v33  ;;  %vm1417_vm2 = vcmp.eq.s32.totalorder %v933_v53, 15 }
 0x14a   : > { %1634 = vrot.lane.b32.xlu0 %v1546_v0, %s4023_s23  ;;  %1825 = vrot.lane.b32.xlu2 %v1738_v22, %s4024_s30  ;;  %v1481_v0 = vpack.c.bf16 %v1179_v60, %v1179_v60  ;;  %v1482_v4 = vpack.c.bf16 %v1380_v2, %v1380_v2 }
 0x14c   : > { %v1786_v12 = vpop.permute.xlu1 %1785  ;;  %v1792_v14 = vpop.permute.xlu2 %1791  ;;  %1515 = vst.msk [vmem:[#allocation2 + $0x6c] sm:$0xf] %vm1489_vm3, %v1481_v0 }
 0x14d   : > { %1879 = vst.msk [vmem:[#allocation2 + $0x14] sm:$0xf] %vm1875_vm5, %v1786_v12 }
 0x14e   : > { %1636 = vrot.lane.b32.xlu1 %v1547_v58, %s4023_s23  ;;  %1516 = vst.msk [vmem:[#allocation2 + $0x70] sm:$0xf] %vm1489_vm3, %v1482_v4 }
 0x14f   : > { %v570_v12 = vpop.f32.mrf.mxu3 }
 0x150   : > { %v1597_v61 = vpop.permute.xlu0 %1596  ;;  %v609_v17 = vmul.f32 %v4646_v15, %v570_v12 }
 0x151   : > { %1688 = vst.msk [vmem:[#allocation2 + $0x1c] sm:$0xf] %vm1682_vm12, %v1597_v61 }
 0x152   : > { %1881 = vst.msk [vmem:[#allocation2 + $0x1c] sm:$0xf] %vm1875_vm5, %v1790_v13  ;;  %1829 = vrot.lane.b32.xlu0 %v1740_v21, %s4024_s30  ;;  %v1741_v13 = vpack.c.bf16 %v1280_v51, %v1280_v51  ;;  %1827 = vrot.lane.b32.xlu2 %v1739_v42, %s4024_s30  ;;  %v1184_v21 = vrot.slane %v4668_v29, 7  ;;  %v645_v11 = vadd.f32 %v4660_v25, %v609_v17  ;;  %v709_v42 = vadd.s32 232, %v4232_v43 }
 0x154   : > { %v1788_v52 = vpop.permute.xlu1 %1787  ;;  %v1605_v32 = vpop.permute.xlu2 %1604  ;;  %v3776_v34 = vld [vmem:[#allocation2 + $0x10] sm:$0xff]  ;;  %v1185_v24 = vsel %vm1128_vm1, %v1182_v20, %v1184_v21  ;;  %v4739_v61 = vmax.f32 %v645_v11, 0.0 }
 0x155   : > { %v3792_v35 = vld [vmem:[#allocation2 + $0x10] sm:$0xff]  ;;  %1880 = vst.msk [vmem:[#allocation2 + $0x18] sm:$0xf] %vm1875_vm5, %v1788_v52  ;;  %3565 = vmatmul.msk.bf16.gmra.mxu1 %vm2027_vm11, %v3776_v34  ;;  %v1382_v52 = vsel %vm1350_vm15, 0.0, %v1185_v24 }
 0x156   : > { %v3808_v36 = vld [vmem:[#allocation2 + $0x10] sm:$0xff]  ;;  %1692 = vst.msk [vmem:[#allocation2 + $0x2c] sm:$0xf] %vm1682_vm12, %v1605_v32  ;;  %3650 = vmatmul.msk.bf16.gmra.mxu2 %vm2027_vm11, %v3792_v35  ;;  %1638 = vrot.lane.b32.xlu1 %v1548_v30, %s4023_s23  ;;  %v1552_v34 = vpack.c.bf16 %v4739_v61, %v4739_v61  ;;  %v1550_v35 = vpack.c.bf16 %v4668_v29, %v4668_v29  ;;  %v1188_v47 = vrot.slane %v4739_v61, 7 }
 0x157   : > { %3735 = vmatmul.msk.bf16.vlgmr.msrb.gmra.mxu3 %vm2027_vm11, %v3808_v36  ;;  %v572_v26 = vpop.f32.mrf.mxu3  ;;  %v1484_v36 = vpack.c.bf16 %v1382_v52, %v1382_v52 }
 0x158   : > { %v1599_v45 = vpop.permute.xlu0 %1598  ;;  %v610_v27 = vmul.f32 %v4646_v15, %v572_v26  ;;  %v1189_v48 = vsel %vm1128_vm1, %v1186_v37, %v1188_v47 }
 0x159   : > { %1689 = vst.msk [vmem:[#allocation2 + $0x20] sm:$0xf] %vm1682_vm12, %v1599_v45  ;;  %v1285_v45 = vrot.slane %v4739_v61, 1 }
 0x15a   : > { %1882 = vst.msk [vmem:[#allocation2 + $0x20] sm:$0xf] %vm1875_vm5, %v1792_v14  ;;  %1831 = vrot.lane.b32.xlu0 %v1741_v13, %s4024_s30  ;;  %v1549_v14 = vpack.c.bf16 %v4674_v38, %v4674_v38  ;;  %v646_v32 = vadd.f32 %v4660_v25, %v610_v27  ;;  %v710_v13 = vadd.s32 240, %v4232_v43  ;;  %v1187_v43 = vsel %vm1128_vm1, %v1184_v21, %v1186_v37 }
 0x15b   : > { %1518 = vst.msk [vmem:[#allocation2 + $0x78] sm:$0xf] %vm1489_vm3, %v1484_v36  ;;  %v1286_v51 = vsel %vm1225_vm4, %v1283_v1, %v1285_v45  ;;  %v1485_v1 = vpack.c.bf16 %v1187_v43, %v1187_v43 }
 0x15c   : > { %v1607_v3 = vpop.permute.xlu2 %1606  ;;  %v3777_v7 = vld [vmem:[#allocation2 + $0x18] sm:$0xff]  ;;  %1640 = vrot.lane.b32.xlu2 %v1549_v14, %s4023_s23  ;;  %v4754_v41 = vmax.f32 %v646_v32, 0.0  ;;  %v926_v56 = vand.u32 15, %v710_v13 }
 0x15d   : > { %1693 = vst.msk [vmem:[#allocation2 + $0x30] sm:$0xf] %vm1682_vm12, %v1607_v3  ;;  %v3793_v8 = vld [vmem:[#allocation2 + $0x18] sm:$0xff]  ;;  %v919_v3 = vand.u32 15, %v709_v42 }
 0x15e   : > { %1833 = vrot.lane.b32.xlu1 %v1742_v59, %s4024_s30  ;;  %v3809_v9 = vld [vmem:[#allocation2 + $0x18] sm:$0xff]  ;;  %v1553_v16 = vpack.c.bf16 %v4754_v41, %v4754_v41  ;;  %v1287_v50 = vrot.slane %v4754_v41, 1  ;;  %vm1352_vm7 = vcmp.eq.s32.totalorder %v926_v56, 0  ;;  %1519 = vst.msk [vmem:[#allocation2 + $0x7c] sm:$0xf] %vm1489_vm3, %v1485_v1  ;;  %v1190_v20 = vrot.slane %v4754_v41, 7 }
 0x15f   : > { %vm1415_vm6 = vcmp.eq.s32.totalorder %v919_v3, 15  ;;  %v1384_v2 = vsel %vm1352_vm7, 0.0, %v1189_v48 }
 0x160   : > { %v1601_v63 = vpop.permute.xlu1 %1600  ;;  %v1321_v28 = vsel %vm1225_vm4, %v1287_v50, 0.0  ;;  %v1447_v59 = vsel %vm1415_vm6, 0.0, %v1286_v51  ;;  %v1486_v4 = vpack.c.bf16 %v1384_v2, %v1384_v2  ;;  %v1191_v26 = vsel %vm1128_vm1, %v1188_v47, %v1190_v20 }
 0x161   : > { %1690 = vst.msk [vmem:[#allocation2 + $0x24] sm:$0xf] %vm1682_vm12, %v1601_v63  ;;  %v1449_v44 = vsel %vm1417_vm2, 0.0, %v1321_v28  ;;  %v1744_v63 = vpack.c.bf16 %v1447_v59, %v1447_v59  ;;  %v1487_v27 = vpack.c.bf16 %v1191_v26, %v1191_v26  ;;  %v4864_v26 = vld [vmem:[%s5269_s5] ss:$0 sm:$0xff] }
 0x162   : > { %1644 = vrot.lane.b32.xlu0 %v1551_v54, %s4023_s23  ;;  %v1746_v60 = vpack.c.bf16 %v1449_v44, %v1449_v44  ;;  %1520 = vst.msk [vmem:[#allocation2 + $0x80] sm:$0xf] %vm1489_vm3, %v1486_v4 }
 0x163   : > { %1521 = vst.msk [vmem:[#allocation2 + $0x84] sm:$0xf] %vm1489_vm3, %v1487_v27 }
 0x164   : > { %v1794_v6 = vpop.permute.xlu0 %1793  ;;  %v1802_v58 = vpop.permute.xlu2 %1801  ;;  %1642 = vrot.lane.b32.xlu2 %v1550_v35, %s4023_s23 }
 0x165   : > { %1883 = vst.msk [vmem:[#allocation2 + $0x24] sm:$0xf] %vm1875_vm5, %v1794_v6  ;;  %3566 = vmatmul.msk.bf16.gmra.mxu1 %vm2027_vm11, %v3777_v7  ;;  %v1288_v7 = vsel %vm1225_vm4, %v1285_v45, %v1287_v50  ;;  %vm2169_vm4 = vcmask 31744  }
 0x166   : > { %3651 = vmatmul.msk.bf16.gmra.mxu2 %vm2027_vm11, %v3793_v8  ;;  %1835 = vrot.lane.b32.xlu1 %v1743_v10, %s4024_s30  ;;  %v3067_v10 = vld [vmem:[%s5271_s7] sm:$0x3] }
 0x167   : > { %3736 = vmatmul.msk.bf16.gmra.mxu3 %vm2027_vm11, %v3809_v9  ;;  %v1745_v9 = vpack.c.bf16 %v1288_v7, %v1288_v7  ;;  %v3118_v12 = vsel %vm3116_vm8, %v3067_v10, 0 }
 0x168   : > { %v1603_v19 = vpop.permute.xlu1 %1602  ;;  %3127 = vmatpush.bf16.msrb.mxu0 %v3118_v12 }
 0x169   : > { %1691 = vst.msk [vmem:[#allocation2 + $0x28] sm:$0xf] %vm1682_vm12, %v1603_v19 }
 0x16a   : > { %1646 = vrot.lane.b32.xlu0 %v1552_v34, %s4023_s23 }
 0x16c   : > { %v1796_v22 = vpop.permute.xlu0 %1795  ;;  %v1804_v23 = vpop.permute.xlu2 %1803  ;;  %v3778_v38 = vld [vmem:[#allocation2 + $0x20] sm:$0xff]  ;;  %1837 = vrot.lane.b32.xlu2 %v1744_v63, %s4024_s30 }
 0x16d   : > { %1884 = vst.msk [vmem:[#allocation2 + $0x28] sm:$0xf] %vm1875_vm5, %v1796_v22  ;;  %v3794_v39 = vld [vmem:[#allocation2 + $0x20] sm:$0xff] }
 0x16e   : > { %v3810_v25 = vld [vmem:[#allocation2 + $0x20] sm:$0xff]  ;;  %1648 = vrot.lane.b32.xlu1 %v1553_v16, %s4023_s23 }
 0x170   : > { %v1798_v30 = vpop.permute.xlu1 %1797 }
 0x171   : > { %1885 = vst.msk [vmem:[#allocation2 + $0x2c] sm:$0xf] %vm1875_vm5, %v1798_v30 }
 0x172   : > { %1841 = vrot.lane.b32.xlu0 %v1746_v60, %s4024_s30 }
 0x174   : > { %v1609_v15 = vpop.permute.xlu0 %1608  ;;  %v1617_v40 = vpop.permute.xlu2 %1616  ;;  %1839 = vrot.lane.b32.xlu2 %v1745_v9, %s4024_s30 }
 0x175   : > { %1694 = vst.msk [vmem:[#allocation2 + $0x34] sm:$0xf] %vm1682_vm12, %v1609_v15  ;;  %3567 = vmatmul.msk.bf16.gmra.mxu1 %vm2027_vm11, %v3778_v38 }
 0x176   : > { %1887 = vst.msk [vmem:[#allocation2 + $0x34] sm:$0xf] %vm1875_vm5, %v1802_v58  ;;  %3652 = vmatmul.msk.bf16.gmra.mxu2 %vm2027_vm11, %v3794_v39 }
 0x177   : > { %3737 = vmatmul.msk.bf16.gmra.mxu3 %vm2027_vm11, %v3810_v25  ;;  %1698 = vst.msk [vmem:[#allocation2 + $0x44] sm:$0xf] %vm1682_vm12, %v1617_v40 }
 0x178   : > { %v1800_v46 = vpop.permute.xlu1 %1799  ;;  %v3779_v55 = vld [vmem:[#allocation2 + $0x28] sm:$0xff] }
 0x179   : > { %1886 = vst.msk [vmem:[#allocation2 + $0x30] sm:$0xf] %vm1875_vm5, %v1800_v46  ;;  %v3795_v29 = vld [vmem:[#allocation2 + $0x28] sm:$0xff] }
 0x17a   : > { %v3811_v58 = vld [vmem:[#allocation2 + $0x28] sm:$0xff] }
 0x17c   : > { %v1611_v57 = vpop.permute.xlu0 %1610  ;;  %v1619_v33 = vpop.permute.xlu2 %1618 }
 0x17d   : > { %1695 = vst.msk [vmem:[#allocation2 + $0x38] sm:$0xf] %vm1682_vm12, %v1611_v57 }
 0x17e   : > { %1888 = vst.msk [vmem:[#allocation2 + $0x38] sm:$0xf] %vm1875_vm5, %v1804_v23 }
 0x17f   : > { %1699 = vst.msk [vmem:[#allocation2 + $0x48] sm:$0xf] %vm1682_vm12, %v1619_v33 }
 0x180   : > { %v1613_v0 = vpop.permute.xlu1 %1612  ;;  %v3780_v11 = vld [vmem:[#allocation2 + $0x30] sm:$0xff] }
 0x181   : > { %1696 = vst.msk [vmem:[#allocation2 + $0x3c] sm:$0xf] %vm1682_vm12, %v1613_v0  ;;  %v3796_v18 = vld [vmem:[#allocation2 + $0x30] sm:$0xff] }
 0x182   : > { %v3812_v23 = vld [vmem:[#allocation2 + $0x30] sm:$0xff]  ;;  %v2089_v24 = vpop.f32.mrf.mxu1 }
 0x183   : > { %2170 = vst.msk [vmem:[#allocation3] sm:$0xff] %vm2169_vm4, %v2089_v24 }
 0x184   : > { %v1806_v54 = vpop.permute.xlu0 %1805  ;;  %v1814_v6 = vpop.permute.xlu2 %1813 }
 0x185   : > { %1889 = vst.msk [vmem:[#allocation2 + $0x3c] sm:$0xf] %vm1875_vm5, %v1806_v54  ;;  %3568 = vmatmul.msk.bf16.gmra.mxu1 %vm2027_vm11, %v3779_v55 }
 0x186   : > { %3653 = vmatmul.msk.bf16.gmra.mxu2 %vm2027_vm11, %v3795_v29 }
 0x187   : > { %3738 = vmatmul.msk.bf16.gmra.mxu3 %vm2027_vm11, %v3811_v58 }
 0x188   : > { %v1615_v8 = vpop.permute.xlu1 %1614 }
 0x189   : > { %1697 = vst.msk [vmem:[#allocation2 + $0x40] sm:$0xf] %vm1682_vm12, %v1615_v8 }
 0x18a   : > { %v2091_v30 = vpop.f32.mrf.mxu1  ;;  %v2462_v3 = vld [vmem:[#allocation3] sm:$0xff] }
 0x18b   : > { %2171 = vst.msk [vmem:[#allocation3 + $0x8] sm:$0xff] %vm2169_vm4, %v2091_v30 }
 0x18c   : > { %v1808_v14 = vpop.permute.xlu0 %1807  ;;  %v1816_v17 = vpop.permute.xlu2 %1815  ;;  %v3781_v32 = vld [vmem:[#allocation2 + $0x38] sm:$0xff] }
 0x18d   : > { %1890 = vst.msk [vmem:[#allocation2 + $0x40] sm:$0xf] %vm1875_vm5, %v1808_v14  ;;  %v3797_v34 = vld [vmem:[#allocation2 + $0x38] sm:$0xff] }
 0x18e   : > { %v3813_v35 = vld [vmem:[#allocation2 + $0x38] sm:$0xff] }
 0x190   : > { %v1810_v19 = vpop.permute.xlu1 %1809 }
 0x191   : > { %1891 = vst.msk [vmem:[#allocation2 + $0x44] sm:$0xf] %vm1875_vm5, %v1810_v19 }
 0x192   : > { %v2463_v60 = vld [vmem:[#allocation3 + $0x8] sm:$0xff] }
 0x194   : > { %v1621_v21 = vpop.permute.xlu0 %1620  ;;  %v1629_v22 = vpop.permute.xlu2 %1628 }
 0x195   : > { %1700 = vst.msk [vmem:[#allocation2 + $0x4c] sm:$0xf] %vm1682_vm12, %v1621_v21  ;;  %3569 = vmatmul.msk.bf16.gmra.mxu1 %vm2027_vm11, %v3780_v11 }
 0x196   : > { %1893 = vst.msk [vmem:[#allocation2 + $0x4c] sm:$0xf] %vm1875_vm5, %v1814_v6  ;;  %3654 = vmatmul.msk.bf16.gmra.mxu2 %vm2027_vm11, %v3796_v18 }
 0x197   : > { %3739 = vmatmul.msk.bf16.gmra.mxu3 %vm2027_vm11, %v3812_v23  ;;  %1704 = vst.msk [vmem:[#allocation2 + $0x5c] sm:$0xf] %vm1682_vm12, %v1629_v22 }
 0x198   : > { %v1812_v5 = vpop.permute.xlu1 %1811  ;;  %v3782_v40 = vld [vmem:[#allocation2 + $0x40] sm:$0xff] }
 0x199   : > { %1892 = vst.msk [vmem:[#allocation2 + $0x48] sm:$0xf] %vm1875_vm5, %v1812_v5  ;;  %v3798_v25 = vld [vmem:[#allocation2 + $0x40] sm:$0xff] }
 0x19a   : > { %v3814_v45 = vld [vmem:[#allocation2 + $0x40] sm:$0xff] }
 0x19c   : > { %v1623_v62 = vpop.permute.xlu0 %1622  ;;  %v1631_v31 = vpop.permute.xlu2 %1630 }
 0x19d   : > { %1701 = vst.msk [vmem:[#allocation2 + $0x50] sm:$0xf] %vm1682_vm12, %v1623_v62 }
 0x19e   : > { %1894 = vst.msk [vmem:[#allocation2 + $0x50] sm:$0xf] %vm1875_vm5, %v1816_v17 }
 0x19f   : > { %1705 = vst.msk [vmem:[#allocation2 + $0x60] sm:$0xf] %vm1682_vm12, %v1631_v31 }
 0x1a0   : > { %v1625_v61 = vpop.permute.xlu1 %1624  ;;  %v3783_v42 = vld [vmem:[#allocation2 + $0x48] sm:$0xff] }
 0x1a1   : > { %1702 = vst.msk [vmem:[#allocation2 + $0x54] sm:$0xf] %vm1682_vm12, %v1625_v61  ;;  %v3799_v51 = vld [vmem:[#allocation2 + $0x48] sm:$0xff]  ;;  %v4875_v61 = vld [vmem:[%s5270_s6] ss:$0 sm:$0xff] }
 0x1a2   : > { %v3815_v28 = vld [vmem:[#allocation2 + $0x48] sm:$0xff] }
 0x1a4   : > { %v1818_v52 = vpop.permute.xlu0 %1817  ;;  %v1826_v39 = vpop.permute.xlu2 %1825 }
 0x1a5   : > { %1895 = vst.msk [vmem:[#allocation2 + $0x54] sm:$0xf] %vm1875_vm5, %v1818_v52  ;;  %3570 = vmatmul.msk.bf16.gmra.mxu1 %vm2027_vm11, %v3781_v32 }
 0x1a6   : > { %3655 = vmatmul.msk.bf16.gmra.mxu2 %vm2027_vm11, %v3797_v34 }
 0x1a7   : > { %3740 = vmatmul.msk.bf16.gmra.mxu3 %vm2027_vm11, %v3813_v35 }
 0x1a8   : > { %v1627_v36 = vpop.permute.xlu1 %1626 }
 0x1a9   : > { %1703 = vst.msk [vmem:[#allocation2 + $0x58] sm:$0xf] %vm1682_vm12, %v1627_v36 }
 0x1ac   : > { %v1820_v15 = vpop.permute.xlu0 %1819  ;;  %v1828_v37 = vpop.permute.xlu2 %1827  ;;  %v3784_v1 = vld [vmem:[#allocation2 + $0x50] sm:$0xff] }
 0x1ad   : > { %1896 = vst.msk [vmem:[#allocation2 + $0x58] sm:$0xf] %vm1875_vm5, %v1820_v15  ;;  %v3800_v2 = vld [vmem:[#allocation2 + $0x50] sm:$0xff] }
 0x1ae   : > { %v3816_v4 = vld [vmem:[#allocation2 + $0x50] sm:$0xff] }
 0x1b0   : > { %v1822_v38 = vpop.permute.xlu1 %1821 }
 0x1b1   : > { %1897 = vst.msk [vmem:[#allocation2 + $0x5c] sm:$0xf] %vm1875_vm5, %v1822_v38 }
 0x1b4   : > { %v1633_v41 = vpop.permute.xlu0 %1632 }
 0x1b5   : > { %1706 = vst.msk [vmem:[#allocation2 + $0x64] sm:$0xf] %vm1682_vm12, %v1633_v41  ;;  %3571 = vmatmul.msk.bf16.gmra.mxu1 %vm2027_vm11, %v3782_v40 }
 0x1b6   : > { %3656 = vmatmul.msk.bf16.gmra.mxu2 %vm2027_vm11, %v3798_v25  ;;  %1899 = vst.msk [vmem:[#allocation2 + $0x64] sm:$0xf] %vm1875_vm5, %v1826_v39  ;;  %v1641_v49 = vpop.permute.xlu2 %1640 }
 0x1b7   : > { %3741 = vmatmul.msk.bf16.gmra.mxu3 %vm2027_vm11, %v3814_v45  ;;  %1710 = vst.msk [vmem:[#allocation2 + $0x74] sm:$0xf] %vm1682_vm12, %v1641_v49 }
 0x1b8   : > { %v1824_v16 = vpop.permute.xlu1 %1823  ;;  %v3785_v22 = vld [vmem:[#allocation2 + $0x58] sm:$0xff] }
 0x1b9   : > { %1898 = vst.msk [vmem:[#allocation2 + $0x60] sm:$0xf] %vm1875_vm5, %v1824_v16  ;;  %v3801_v23 = vld [vmem:[#allocation2 + $0x58] sm:$0xff] }
 0x1ba   : > { %v3817_v24 = vld [vmem:[#allocation2 + $0x58] sm:$0xff] }
 0x1bc   : > { %v1635_v46 = vpop.permute.xlu0 %1634 }
 0x1bd   : > { %1707 = vst.msk [vmem:[#allocation2 + $0x68] sm:$0xf] %vm1682_vm12, %v1635_v46 }
 0x1be   : > { %1900 = vst.msk [vmem:[#allocation2 + $0x68] sm:$0xf] %vm1875_vm5, %v1828_v37  ;;  %v1643_v56 = vpop.permute.xlu2 %1642 }
 0x1bf   : > { %1711 = vst.msk [vmem:[#allocation2 + $0x78] sm:$0xf] %vm1682_vm12, %v1643_v56 }
 0x1c0   : > { %v1637_v47 = vpop.permute.xlu1 %1636 }
 0x1c1   : > { %1708 = vst.msk [vmem:[#allocation2 + $0x6c] sm:$0xf] %vm1682_vm12, %v1637_v47 }
 0x1c2   : > { %v2094_v50 = vpop.f32.mrf.mxu1 }
 0x1c3   : > { %2172 = vst.msk [vmem:[#allocation3 + $0x10] sm:$0xff] %vm2169_vm4, %v2094_v50 }
 0x1c4   : > { %v1830_v53 = vpop.permute.xlu0 %1829 }
 0x1c5   : > { %1901 = vst.msk [vmem:[#allocation2 + $0x6c] sm:$0xf] %vm1875_vm5, %v1830_v53  ;;  %3572 = vmatmul.msk.bf16.gmra.mxu1 %vm2027_vm11, %v3783_v42 }
 0x1c6   : > { %3657 = vmatmul.msk.bf16.gmra.mxu2 %vm2027_vm11, %v3799_v51  ;;  %v1838_v12 = vpop.permute.xlu2 %1837 }
 0x1c7   : > { %3742 = vmatmul.msk.bf16.gmra.mxu3 %vm2027_vm11, %v3815_v28  ;;  %v3786_v28 = vld [vmem:[#allocation2 + $0x60] sm:$0xff] }
 0x1c8   : > { %v1639_v57 = vpop.permute.xlu1 %1638 }
 0x1c9   : > { %v2382_v13 = vpop.f32.mrf.mxu2  ;;  %1709 = vst.msk [vmem:[#allocation2 + $0x70] sm:$0xf] %vm1682_vm12, %v1639_v57  ;;  %v3818_v57 = vld [vmem:[#allocation2 + $0x60] sm:$0xff] }
 0x1ca   : > { %v2494_v33 = vadd.f32 %v2462_v3, %v2382_v13  ;;  %v2096_v48 = vpop.f32.mrf.mxu1  ;;  %v2464_v55 = vld [vmem:[#allocation3 + $0x10] sm:$0xff] }
 0x1cb   : > { %2173 = vst.msk [vmem:[#allocation3 + $0x18] sm:$0xff] %vm2169_vm4, %v2096_v48  ;;  %v3802_v3 = vld [vmem:[#allocation2 + $0x60] sm:$0xff] }
 0x1cc   : > { %2526 = vst.msk [vmem:[#allocation3] sm:$0xff] %vm2169_vm4, %v2494_v33  ;;  %v1832_v44 = vpop.permute.xlu0 %1831 }
 0x1cd   : > { %1902 = vst.msk [vmem:[#allocation2 + $0x70] sm:$0xf] %vm1875_vm5, %v1832_v44 }
 0x1ce   : > { %v1840_v25 = vpop.permute.xlu2 %1839 }
 0x1d0   : > { %v1834_v0 = vpop.permute.xlu1 %1833 }
 0x1d1   : > { %v2384_v59 = vpop.f32.mrf.mxu2  ;;  %1903 = vst.msk [vmem:[#allocation2 + $0x74] sm:$0xf] %vm1875_vm5, %v1834_v0 }
 0x1d2   : > { %v2495_v63 = vadd.f32 %v2463_v60, %v2384_v59  ;;  %v2099_v43 = vpop.f32.mrf.mxu1  ;;  %v2465_v17 = vld [vmem:[#allocation3 + $0x18] sm:$0xff] }
 0x1d3   : > { %2174 = vst.msk [vmem:[#allocation3 + $0x20] sm:$0xff] %vm2169_vm4, %v2099_v43  ;;  %v2819_v7 = vld [vmem:[#allocation3] sm:$0xff] }
 0x1d4   : > { %2527 = vst.msk [vmem:[#allocation3 + $0x8] sm:$0xff] %vm2169_vm4, %v2495_v63  ;;  %v1645_v29 = vpop.permute.xlu0 %1644 }
 0x1d5   : > { %3573 = vmatmul.msk.bf16.gmra.mxu1 %vm2027_vm11, %v3784_v1  ;;  %1712 = vst.msk [vmem:[#allocation2 + $0x7c] sm:$0xf] %vm1682_vm12, %v1645_v29 }
 0x1d6   : > { %3658 = vmatmul.msk.bf16.gmra.mxu2 %vm2027_vm11, %v3800_v2  ;;  %1905 = vst.msk [vmem:[#allocation2 + $0x7c] sm:$0xf] %vm1875_vm5, %v1838_v12 }
 0x1d7   : > { %3743 = vmatmul.msk.bf16.gmra.mxu3 %vm2027_vm11, %v3816_v4 }
 0x1d8   : > { %v1836_v10 = vpop.permute.xlu1 %1835 }
 0x1d9   : > { %v2387_v54 = vpop.f32.mrf.mxu2  ;;  %1904 = vst.msk [vmem:[#allocation2 + $0x78] sm:$0xf] %vm1875_vm5, %v1836_v10 }
 0x1da   : > { %v2496_v6 = vadd.f32 %v2464_v55, %v2387_v54  ;;  %v2739_v58 = vpop.f32.mrf.mxu3  ;;  %v2101_v9 = vpop.f32.mrf.mxu1  ;;  %v2466_v30 = vld [vmem:[#allocation3 + $0x20] sm:$0xff] }
 0x1db   : > { %v2851_v8 = vadd.f32 %v2819_v7, %v2739_v58  ;;  %2175 = vst.msk [vmem:[#allocation3 + $0x28] sm:$0xff] %vm2169_vm4, %v2101_v9  ;;  %v2820_v21 = vld [vmem:[#allocation3 + $0x8] sm:$0xff] }
 0x1dc   : > { %2528 = vst.msk [vmem:[#allocation3 + $0x10] sm:$0xff] %vm2169_vm4, %v2496_v6  ;;  %v1647_v27 = vpop.permute.xlu0 %1646 }
 0x1dd   : > { %2883 = vst.msk [vmem:[#allocation3] sm:$0xff] %vm2169_vm4, %v2851_v8 }
 0x1de   : > { %1713 = vst.msk [vmem:[#allocation2 + $0x80] sm:$0xf] %vm1682_vm12, %v1647_v27 }
 0x1df   : > { %1906 = vst.msk [vmem:[#allocation2 + $0x80] sm:$0xf] %vm1875_vm5, %v1840_v25 }
 0x1e0   : > { %v1649_v38 = vpop.permute.xlu1 %1648 }
 0x1e1   : > { %v2389_v14 = vpop.f32.mrf.mxu2  ;;  %1714 = vst.msk [vmem:[#allocation2 + $0x84] sm:$0xf] %vm1682_vm12, %v1649_v38 }
 0x1e2   : > { %v2497_v19 = vadd.f32 %v2465_v17, %v2389_v14  ;;  %v2741_v20 = vpop.f32.mrf.mxu3  ;;  %v2104_v18 = vpop.f32.mrf.mxu1  ;;  %v2467_v16 = vld [vmem:[#allocation3 + $0x28] sm:$0xff]  ;;  %v3787_v17 = vld [vmem:[#allocation2 + $0x68] sm:$0xff] }
 0x1e3   : > { %v2852_v11 = vadd.f32 %v2820_v21, %v2741_v20  ;;  %2176 = vst.msk [vmem:[#allocation3 + $0x30] sm:$0xff] %vm2169_vm4, %v2104_v18  ;;  %v2821_v34 = vld [vmem:[#allocation3 + $0x10] sm:$0xff]  ;;  %v3819_v20 = vld [vmem:[#allocation2 + $0x68] sm:$0xff] }
 0x1e4   : > { %2529 = vst.msk [vmem:[#allocation3 + $0x18] sm:$0xff] %vm2169_vm4, %v2497_v19  ;;  %v2915_v5 = vld [vmem:[#allocation3] sm:$0xff]  ;;  %v1842_v13 = vpop.permute.xlu0 %1841  ;;  %v3803_v19 = vld [vmem:[#allocation2 + $0x68] sm:$0xff] }
 0x1e5   : > { %2884 = vst.msk [vmem:[#allocation3 + $0x8] sm:$0xff] %vm2169_vm4, %v2852_v11  ;;  %3574 = vmatmul.msk.bf16.gmra.mxu1 %vm2027_vm11, %v3785_v22  ;;  %v2951_v31 = vmul.f32 %v4864_v26, %v2915_v5 }
 0x1e6   : > { %3659 = vmatmul.msk.bf16.gmra.mxu2 %vm2027_vm11, %v3801_v23  ;;  %1907 = vst.msk [vmem:[#allocation2 + $0x84] sm:$0xf] %vm1875_vm5, %v1842_v13 }
 0x1e7   : > { %3744 = vmatmul.msk.bf16.gmra.mxu3 %vm2027_vm11, %v3817_v24  ;;  %v2987_v40 = vadd.f32 %v4875_v61, %v2951_v31 }
 0x1e9   : > { %v2392_v62 = vpop.f32.mrf.mxu2  ;;  %v3019_v37 = vmax.f32 %v2987_v40, 0.0 }
 0x1ea   : > { %v2498_v52 = vadd.f32 %v2466_v30, %v2392_v62  ;;  %v2744_v32 = vpop.f32.mrf.mxu3  ;;  %v2106_v36 = vpop.f32.mrf.mxu1  ;;  %v2468_v56 = vld [vmem:[#allocation3 + $0x30] sm:$0xff] }
 0x1eb   : > { %v2853_v35 = vadd.f32 %v2821_v34, %v2744_v32  ;;  %2177 = vst.msk [vmem:[#allocation3 + $0x38] sm:$0xff] %vm2169_vm4, %v2106_v36  ;;  %v2822_v50 = vld [vmem:[#allocation3 + $0x18] sm:$0xff] }
 0x1ec   : > { %2530 = vst.msk [vmem:[#allocation3 + $0x20] sm:$0xff] %vm2169_vm4, %v2498_v52  ;;  %v2916_v15 = vld [vmem:[#allocation3 + $0x8] sm:$0xff] }
 0x1ed   : > { %2885 = vst.msk [vmem:[#allocation3 + $0x10] sm:$0xff] %vm2169_vm4, %v2853_v35  ;;  %v2952_v39 = vmul.f32 %v4864_v26, %v2916_v15 }
 0x1ef   : > { %v2988_v41 = vadd.f32 %v4875_v61, %v2952_v39 }
 0x1f1   : > { %v2394_v45 = vpop.f32.mrf.mxu2  ;;  %v3020_v46 = vmax.f32 %v2988_v41, 0.0 }
 0x1f2   : > { %v2499_v47 = vadd.f32 %v2467_v16, %v2394_v45  ;;  %v2746_v49 = vpop.f32.mrf.mxu3  ;;  %v2109_v51 = vpop.f32.mrf.mxu1  ;;  %v2469_v29 = vld [vmem:[#allocation3 + $0x38] sm:$0xff]  ;;  %v3788_v16 = vld [vmem:[#allocation2 + $0x70] sm:$0xff] }
 0x1f3   : > { %v2854_v42 = vadd.f32 %v2822_v50, %v2746_v49  ;;  %v3051_v53 = vpack.c.bf16 %v3020_v46, %v3019_v37  ;;  %2178 = vst.msk [vmem:[#allocation3 + $0x40] sm:$0xff] %vm2169_vm4, %v2109_v51  ;;  %v2823_v63 = vld [vmem:[#allocation3 + $0x20] sm:$0xff] }
 0x1f4   : > { %2531 = vst.msk [vmem:[#allocation3 + $0x28] sm:$0xff] %vm2169_vm4, %v2499_v47  ;;  %v2917_v33 = vld [vmem:[#allocation3 + $0x10] sm:$0xff]  ;;  %v3804_v37 = vld [vmem:[#allocation2 + $0x70] sm:$0xff] }
 0x1f5   : > { %2886 = vst.msk [vmem:[#allocation3 + $0x18] sm:$0xff] %vm2169_vm4, %v2854_v42  ;;  %3751 = vmatmul.msk.bf16.vlgmr.msrb.gmra.mxu0 %vm2169_vm4, %v3051_v53  ;;  %3575 = vmatmul.msk.bf16.gmra.mxu1 %vm2027_vm11, %v3786_v28  ;;  %v2953_v44 = vmul.f32 %v4864_v26, %v2917_v33  ;;  %v3820_v46 = vld [vmem:[#allocation2 + $0x70] sm:$0xff] }
 0x1f6   : > { %3660 = vmatmul.msk.bf16.gmra.mxu2 %vm2027_vm11, %v3802_v3 }
 0x1f7   : > { %3745 = vmatmul.msk.bf16.gmra.mxu3 %vm2027_vm11, %v3818_v57  ;;  %v2989_v4 = vadd.f32 %v4875_v61, %v2953_v44 }
 0x1f9   : > { %v2397_v48 = vpop.f32.mrf.mxu2  ;;  %v3021_v6 = vmax.f32 %v2989_v4, 0.0 }
 0x1fa   : > { %v2500_v59 = vadd.f32 %v2468_v56, %v2397_v48  ;;  %v2749_v60 = vpop.f32.mrf.mxu3  ;;  %v2111_v0 = vpop.f32.mrf.mxu1  ;;  %v2470_v18 = vld [vmem:[#allocation3 + $0x40] sm:$0xff] }
 0x1fb   : > { %v2855_v43 = vadd.f32 %v2823_v63, %v2749_v60  ;;  %2179 = vst.msk [vmem:[#allocation3 + $0x48] sm:$0xff] %vm2169_vm4, %v2111_v0  ;;  %v2824_v9 = vld [vmem:[#allocation3 + $0x28] sm:$0xff] }
 0x1fc   : > { %2532 = vst.msk [vmem:[#allocation3 + $0x30] sm:$0xff] %vm2169_vm4, %v2500_v59  ;;  %v2918_v1 = vld [vmem:[#allocation3 + $0x18] sm:$0xff] }
 0x1fd   : > { %2887 = vst.msk [vmem:[#allocation3 + $0x20] sm:$0xff] %vm2169_vm4, %v2855_v43  ;;  %v2954_v2 = vmul.f32 %v4864_v26, %v2918_v1 }
 0x1ff   : > { %v2990_v54 = vadd.f32 %v4875_v61, %v2954_v2 }
 0x201   : > { %v2399_v55 = vpop.f32.mrf.mxu2  ;;  %v3022_v58 = vmax.f32 %v2990_v54, 0.0 }
 0x202   : > { %v2501_v7 = vadd.f32 %v2469_v29, %v2399_v55  ;;  %v2751_v8 = vpop.f32.mrf.mxu3  ;;  %v2114_v12 = vpop.f32.mrf.mxu1  ;;  %v2471_v35 = vld [vmem:[#allocation3 + $0x48] sm:$0xff] }
 0x203   : > { %v2856_v10 = vadd.f32 %v2824_v9, %v2751_v8  ;;  %v3052_v14 = vpack.c.bf16 %v3022_v58, %v3021_v6  ;;  %2180 = vst.msk [vmem:[#allocation3 + $0x50] sm:$0xff] %vm2169_vm4, %v2114_v12  ;;  %v2825_v5 = vld [vmem:[#allocation3 + $0x30] sm:$0xff]  ;;  %v3789_v55 = vld [vmem:[#allocation2 + $0x78] sm:$0xff] }
 0x204   : > { %2533 = vst.msk [vmem:[#allocation3 + $0x38] sm:$0xff] %vm2169_vm4, %v2501_v7  ;;  %v2919_v21 = vld [vmem:[#allocation3 + $0x20] sm:$0xff]  ;;  %v3805_v29 = vld [vmem:[#allocation2 + $0x78] sm:$0xff] }
 0x205   : > { %2888 = vst.msk [vmem:[#allocation3 + $0x28] sm:$0xff] %vm2169_vm4, %v2856_v10  ;;  %3752 = vmatmul.msk.bf16.gmra.mxu0 %vm2169_vm4, %v3052_v14  ;;  %3576 = vmatmul.msk.bf16.gmra.mxu1 %vm2027_vm11, %v3787_v17  ;;  %v2955_v22 = vmul.f32 %v4864_v26, %v2919_v21  ;;  %v3821_v6 = vld [vmem:[#allocation2 + $0x78] sm:$0xff] }
 0x206   : > { %3661 = vmatmul.msk.bf16.gmra.mxu2 %vm2027_vm11, %v3803_v19 }
 0x207   : > { %3746 = vmatmul.msk.bf16.gmra.mxu3 %vm2027_vm11, %v3819_v20  ;;  %v2991_v52 = vadd.f32 %v4875_v61, %v2955_v22 }
 0x209   : > { %v2402_v11 = vpop.f32.mrf.mxu2  ;;  %v3023_v36 = vmax.f32 %v2991_v52, 0.0 }
 0x20a   : > { %v2502_v23 = vadd.f32 %v2470_v18, %v2402_v11  ;;  %v2754_v24 = vpop.f32.mrf.mxu3  ;;  %v2116_v62 = vpop.f32.mrf.mxu1  ;;  %v2472_v50 = vld [vmem:[#allocation3 + $0x50] sm:$0xff] }
 0x20b   : > { %v2857_v27 = vadd.f32 %v2825_v5, %v2754_v24  ;;  %2181 = vst.msk [vmem:[#allocation3 + $0x58] sm:$0xff] %vm2169_vm4, %v2116_v62  ;;  %v2826_v40 = vld [vmem:[#allocation3 + $0x38] sm:$0xff] }
 0x20c   : > { %2534 = vst.msk [vmem:[#allocation3 + $0x40] sm:$0xff] %vm2169_vm4, %v2502_v23  ;;  %v2920_v30 = vld [vmem:[#allocation3 + $0x28] sm:$0xff] }
 0x20d   : > { %2889 = vst.msk [vmem:[#allocation3 + $0x30] sm:$0xff] %vm2169_vm4, %v2857_v27  ;;  %v2956_v31 = vmul.f32 %v4864_v26, %v2920_v30 }
 0x20f   : > { %v2992_v32 = vadd.f32 %v4875_v61, %v2956_v31 }
 0x211   : > { %v2404_v34 = vpop.f32.mrf.mxu2  ;;  %v3024_v15 = vmax.f32 %v2992_v32, 0.0 }
 0x212   : > { %v2503_v38 = vadd.f32 %v2471_v35, %v2404_v34  ;;  %v2756_v39 = vpop.f32.mrf.mxu3  ;;  %v2119_v41 = vpop.f32.mrf.mxu1  ;;  %v2473_v59 = vld [vmem:[#allocation3 + $0x58] sm:$0xff]  ;;  %v3806_v34 = vld [vmem:[#allocation2 + $0x80] sm:$0xff] }
 0x213   : > { %v2858_v25 = vadd.f32 %v2826_v40, %v2756_v39  ;;  %v3053_v45 = vpack.c.bf16 %v3024_v15, %v3023_v36  ;;  %2182 = vst.msk [vmem:[#allocation3 + $0x60] sm:$0xff] %vm2169_vm4, %v2119_v41  ;;  %v2827_v28 = vld [vmem:[#allocation3 + $0x40] sm:$0xff]  ;;  %v3822_v35 = vld [vmem:[#allocation2 + $0x80] sm:$0xff] }
 0x214   : > { %2535 = vst.msk [vmem:[#allocation3 + $0x48] sm:$0xff] %vm2169_vm4, %v2503_v38  ;;  %v2921_v47 = vld [vmem:[#allocation3 + $0x30] sm:$0xff] }
 0x215   : > { %2890 = vst.msk [vmem:[#allocation3 + $0x38] sm:$0xff] %vm2169_vm4, %v2858_v25  ;;  %3753 = vmatmul.msk.bf16.gmra.mxu0 %vm2169_vm4, %v3053_v45  ;;  %3577 = vmatmul.msk.bf16.gmra.mxu1 %vm2027_vm11, %v3788_v16  ;;  %v2957_v42 = vmul.f32 %v4864_v26, %v2921_v47 }
 0x216   : > { %3662 = vmatmul.msk.bf16.gmra.mxu2 %vm2027_vm11, %v3804_v37 }
 0x217   : > { %3747 = vmatmul.msk.bf16.gmra.mxu3 %vm2027_vm11, %v3820_v46  ;;  %v2993_v48 = vadd.f32 %v4875_v61, %v2957_v42 }
 0x219   : > { %v2407_v49 = vpop.f32.mrf.mxu2  ;;  %v3025_v60 = vmax.f32 %v2993_v48, 0.0 }
 0x21a   : > { %v2504_v51 = vadd.f32 %v2472_v50, %v2407_v49  ;;  %v2759_v53 = vpop.f32.mrf.mxu3  ;;  %v2121_v13 = vpop.f32.mrf.mxu1  ;;  %v2474_v8 = vld [vmem:[#allocation3 + $0x60] sm:$0xff] }
 0x21b   : > { %v2859_v3 = vadd.f32 %v2827_v28, %v2759_v53  ;;  %2183 = vst.msk [vmem:[#allocation3 + $0x68] sm:$0xff] %vm2169_vm4, %v2121_v13  ;;  %v2828_v1 = vld [vmem:[#allocation3 + $0x48] sm:$0xff] }
 0x21c   : > { %2536 = vst.msk [vmem:[#allocation3 + $0x50] sm:$0xff] %vm2169_vm4, %v2504_v51  ;;  %v2922_v57 = vld [vmem:[#allocation3 + $0x38] sm:$0xff] }
 0x21d   : > { %2891 = vst.msk [vmem:[#allocation3 + $0x40] sm:$0xff] %vm2169_vm4, %v2859_v3  ;;  %v2958_v33 = vmul.f32 %v4864_v26, %v2922_v57 }
 0x21f   : > { %v2994_v56 = vadd.f32 %v4875_v61, %v2958_v33 }
 0x221   : > { %v2409_v44 = vpop.f32.mrf.mxu2  ;;  %v3026_v63 = vmax.f32 %v2994_v56, 0.0  ;;  %v3823_v56 = vld [vmem:[#allocation2 + $0x88] sm:$0xff] }
 0x222   : > { %v2505_v43 = vadd.f32 %v2473_v59, %v2409_v44  ;;  %v2761_v0 = vpop.f32.mrf.mxu3  ;;  %v2124_v4 = vpop.f32.mrf.mxu1  ;;  %v2475_v23 = vld [vmem:[#allocation3 + $0x68] sm:$0xff] }
 0x223   : > { %v2860_v2 = vadd.f32 %v2828_v1, %v2761_v0  ;;  %v3054_v54 = vpack.c.bf16 %v3026_v63, %v3025_v60  ;;  %2184 = vst.msk [vmem:[#allocation3 + $0x70] sm:$0xff] %vm2169_vm4, %v2124_v4  ;;  %v2829_v14 = vld [vmem:[#allocation3 + $0x50] sm:$0xff] }
 0x224   : > { %2537 = vst.msk [vmem:[#allocation3 + $0x58] sm:$0xff] %vm2169_vm4, %v2505_v43  ;;  %v2923_v58 = vld [vmem:[#allocation3 + $0x40] sm:$0xff] }
 0x225   : > { %2892 = vst.msk [vmem:[#allocation3 + $0x48] sm:$0xff] %vm2169_vm4, %v2860_v2  ;;  %3754 = vmatmul.msk.bf16.gmra.mxu0 %vm2169_vm4, %v3054_v54  ;;  %3578 = vmatmul.msk.bf16.gmra.mxu1 %vm2027_vm11, %v3789_v55  ;;  %v2959_v9 = vmul.f32 %v4864_v26, %v2923_v58 }
 0x226   : > { %3663 = vmatmul.msk.bf16.gmra.mxu2 %vm2027_vm11, %v3805_v29 }
 0x227   : > { %3748 = vmatmul.msk.bf16.gmra.mxu3 %vm2027_vm11, %v3821_v6  ;;  %v2995_v11 = vadd.f32 %v4875_v61, %v2959_v9 }
 0x229   : > { %v2412_v7 = vpop.f32.mrf.mxu2  ;;  %v3027_v24 = vmax.f32 %v2995_v11, 0.0 }
 0x22a   : > { %v2506_v10 = vadd.f32 %v2474_v8, %v2412_v7  ;;  %v2764_v12 = vpop.f32.mrf.mxu3  ;;  %v2126_v19 = vpop.f32.mrf.mxu1  ;;  %v2476_v38 = vld [vmem:[#allocation3 + $0x70] sm:$0xff] }
 0x22b   : > { %v2861_v17 = vadd.f32 %v2829_v14, %v2764_v12  ;;  %2185 = vst.msk [vmem:[#allocation3 + $0x78] sm:$0xff] %vm2169_vm4, %v2126_v19  ;;  %v2830_v30 = vld [vmem:[#allocation3 + $0x58] sm:$0xff] }
 0x22c   : > { %2538 = vst.msk [vmem:[#allocation3 + $0x60] sm:$0xff] %vm2169_vm4, %v2506_v10  ;;  %v2924_v20 = vld [vmem:[#allocation3 + $0x48] sm:$0xff] }
 0x22d   : > { %2893 = vst.msk [vmem:[#allocation3 + $0x50] sm:$0xff] %vm2169_vm4, %v2861_v17  ;;  %v2960_v21 = vmul.f32 %v4864_v26, %v2924_v20 }
 0x22f   : > { %v2996_v18 = vadd.f32 %v4875_v61, %v2960_v21 }
 0x231   : > { %v2414_v22 = vpop.f32.mrf.mxu2  ;;  %v3028_v5 = vmax.f32 %v2996_v18, 0.0 }
 0x232   : > { %v2507_v27 = vadd.f32 %v2475_v23, %v2414_v22  ;;  %v2766_v62 = vpop.f32.mrf.mxu3  ;;  %v2129_v52 = vpop.f32.mrf.mxu1  ;;  %v2477_v42 = vld [vmem:[#allocation3 + $0x78] sm:$0xff] }
 0x233   : > { %v2862_v31 = vadd.f32 %v2830_v30, %v2766_v62  ;;  %v3055_v32 = vpack.c.bf16 %v3028_v5, %v3027_v24  ;;  %2186 = vst.msk [vmem:[#allocation3 + $0x80] sm:$0xff] %vm2169_vm4, %v2129_v52  ;;  %v2831_v41 = vld [vmem:[#allocation3 + $0x60] sm:$0xff] }
 0x234   : > { %2539 = vst.msk [vmem:[#allocation3 + $0x68] sm:$0xff] %vm2169_vm4, %v2507_v27  ;;  %v2925_v36 = vld [vmem:[#allocation3 + $0x50] sm:$0xff] }
 0x235   : > { %2894 = vst.msk [vmem:[#allocation3 + $0x58] sm:$0xff] %vm2169_vm4, %v2862_v31  ;;  %3755 = vmatmul.msk.bf16.gmra.mxu0 %vm2169_vm4, %v3055_v32  ;;  %v2961_v39 = vmul.f32 %v4864_v26, %v2925_v36 }
 0x236   : > { %3664 = vmatmul.msk.bf16.gmra.mxu2 %vm2027_vm11, %v3806_v34 }
 0x237   : > { %3749 = vmatmul.msk.bf16.gmra.mxu3 %vm2027_vm11, %v3822_v35  ;;  %v2997_v47 = vadd.f32 %v4875_v61, %v2961_v39 }
 0x239   : > { %v2417_v15 = vpop.f32.mrf.mxu2  ;;  %v3029_v51 = vmax.f32 %v2997_v47, 0.0 }
 0x23a   : > { %v2508_v40 = vadd.f32 %v2476_v38, %v2417_v15  ;;  %v2769_v25 = vpop.f32.mrf.mxu3  ;;  %v2131_v16 = vpop.f32.mrf.mxu1  ;;  %v2478_v60 = vld [vmem:[#allocation3 + $0x80] sm:$0xff] }
 0x23b   : > { %v2863_v45 = vadd.f32 %v2831_v41, %v2769_v25  ;;  %2187 = vst.msk [vmem:[#allocation3 + $0x88] sm:$0xff] %vm2169_vm4, %v2131_v16  ;;  %v2832_v13 = vld [vmem:[#allocation3 + $0x68] sm:$0xff] }
 0x23c   : > { %2540 = vst.msk [vmem:[#allocation3 + $0x70] sm:$0xff] %vm2169_vm4, %v2508_v40  ;;  %v2926_v37 = vld [vmem:[#allocation3 + $0x58] sm:$0xff] }
 0x23d   : > { %2895 = vst.msk [vmem:[#allocation3 + $0x60] sm:$0xff] %vm2169_vm4, %v2863_v45  ;;  %v2962_v46 = vmul.f32 %v4864_v26, %v2926_v37 }
 0x23f   : > { %v2998_v49 = vadd.f32 %v4875_v61, %v2962_v46 }
 0x241   : > { %v2419_v50 = vpop.f32.mrf.mxu2  ;;  %v3030_v53 = vmax.f32 %v2998_v49, 0.0 }
 0x242   : > { %v2509_v28 = vadd.f32 %v2477_v42, %v2419_v50  ;;  %v2771_v3 = vpop.f32.mrf.mxu3  ;;  %v2134_v33 = vpop.f32.mrf.mxu1  ;;  %v2479_v7 = vld [vmem:[#allocation3 + $0x88] sm:$0xff] }
 0x243   : > { %v2864_v57 = vadd.f32 %v2832_v13, %v2771_v3  ;;  %v3056_v48 = vpack.c.bf16 %v3030_v53, %v3029_v51  ;;  %2188 = vst.msk [vmem:[#allocation3 + $0x90] sm:$0xff] %vm2169_vm4, %v2134_v33  ;;  %v2833_v1 = vld [vmem:[#allocation3 + $0x70] sm:$0xff] }
 0x244   : > { %2541 = vst.msk [vmem:[#allocation3 + $0x78] sm:$0xff] %vm2169_vm4, %v2509_v28  ;;  %v2927_v44 = vld [vmem:[#allocation3 + $0x60] sm:$0xff] }
 0x245   : > { %2896 = vst.msk [vmem:[#allocation3 + $0x68] sm:$0xff] %vm2169_vm4, %v2864_v57  ;;  %3756 = vmatmul.msk.bf16.gmra.mxu0 %vm2169_vm4, %v3056_v48  ;;  %v2963_v63 = vmul.f32 %v4864_v26, %v2927_v44  ;;  %v4991_v57 = vld [vmem:[%s5272_s8] ss:$0 sm:$0xff] }
 0x246   : > { %v4997_v44 = vld [vmem:[%s5273_s9] ss:$0 sm:$0xff] }
 0x247   : > { %3750 = vmatmul.msk.bf16.gmra.mxu3 %vm2027_vm11, %v3823_v56  ;;  %v2999_v29 = vadd.f32 %v4875_v61, %v2963_v63 }
 0x249   : > { %v2422_v59 = vpop.f32.mrf.mxu2  ;;  %v3031_v8 = vmax.f32 %v2999_v29, 0.0 }
 0x24a   : > { %v2510_v43 = vadd.f32 %v2478_v60, %v2422_v59  ;;  %v2774_v0 = vpop.f32.mrf.mxu3  ;;  %v2136_v4 = vpop.f32.mrf.mxu1  ;;  %v2480_v18 = vld [vmem:[#allocation3 + $0x90] sm:$0xff] }
 0x24b   : > { %v2865_v2 = vadd.f32 %v2833_v1, %v2774_v0  ;;  %2189 = vst.msk [vmem:[#allocation3 + $0x98] sm:$0xff] %vm2169_vm4, %v2136_v4  ;;  %v2834_v14 = vld [vmem:[#allocation3 + $0x78] sm:$0xff] }
 0x24c   : > { %2542 = vst.msk [vmem:[#allocation3 + $0x80] sm:$0xff] %vm2169_vm4, %v2510_v43  ;;  %v2928_v54 = vld [vmem:[#allocation3 + $0x68] sm:$0xff] }
 0x24d   : > { %2897 = vst.msk [vmem:[#allocation3 + $0x70] sm:$0xff] %vm2169_vm4, %v2865_v2  ;;  %v2964_v55 = vmul.f32 %v4864_v26, %v2928_v54 }
 0x24f   : > { %v3000_v6 = vadd.f32 %v4875_v61, %v2964_v55 }
 0x251   : > { %v2424_v58 = vpop.f32.mrf.mxu2  ;;  %v3032_v9 = vmax.f32 %v3000_v6, 0.0 }
 0x252   : > { %v2511_v10 = vadd.f32 %v2479_v7, %v2424_v58  ;;  %v2776_v12 = vpop.f32.mrf.mxu3  ;;  %v2139_v19 = vpop.f32.mrf.mxu1  ;;  %v2481_v35 = vld [vmem:[#allocation3 + $0x98] sm:$0xff]  ;;  %v3889_v58 = vld [vmem:[%s4174_s28] sm:$0xff] }
 0x253   : > { %v2866_v17 = vadd.f32 %v2834_v14, %v2776_v12  ;;  %v3057_v20 = vpack.c.bf16 %v3032_v9, %v3031_v8  ;;  %2190 = vst.msk [vmem:[#allocation3 + $0xa0] sm:$0xff] %vm2169_vm4, %v2139_v19  ;;  %v2835_v5 = vld [vmem:[#allocation3 + $0x80] sm:$0xff] }
 0x254   : > { %2543 = vst.msk [vmem:[#allocation3 + $0x88] sm:$0xff] %vm2169_vm4, %v2511_v10  ;;  %v2929_v21 = vld [vmem:[#allocation3 + $0x70] sm:$0xff] }
 0x255   : > { %2898 = vst.msk [vmem:[#allocation3 + $0x78] sm:$0xff] %vm2169_vm4, %v2866_v17  ;;  %3757 = vmatmul.msk.bf16.gmra.mxu0 %vm2169_vm4, %v3057_v20  ;;  %v2965_v22 = vmul.f32 %v4864_v26, %v2929_v21 }
 0x257   : > { %v3001_v52 = vadd.f32 %v4875_v61, %v2965_v22 }
 0x259   : > { %v2427_v11 = vpop.f32.mrf.mxu2  ;;  %v3033_v36 = vmax.f32 %v3001_v52, 0.0 }
 0x25a   : > { %v2512_v23 = vadd.f32 %v2480_v18, %v2427_v11  ;;  %v2779_v24 = vpop.f32.mrf.mxu3  ;;  %v2141_v62 = vpop.f32.mrf.mxu1  ;;  %v2482_v46 = vld [vmem:[#allocation3 + $0xa0] sm:$0xff] }
 0x25b   : > { %v2867_v27 = vadd.f32 %v2835_v5, %v2779_v24  ;;  %2191 = vst.msk [vmem:[#allocation3 + $0xa8] sm:$0xff] %vm2169_vm4, %v2141_v62  ;;  %v2836_v40 = vld [vmem:[#allocation3 + $0x88] sm:$0xff] }
 0x25c   : > { %2544 = vst.msk [vmem:[#allocation3 + $0x90] sm:$0xff] %vm2169_vm4, %v2512_v23  ;;  %v2930_v30 = vld [vmem:[#allocation3 + $0x78] sm:$0xff] }
 0x25d   : > { %2899 = vst.msk [vmem:[#allocation3 + $0x80] sm:$0xff] %vm2169_vm4, %v2867_v27  ;;  %v2966_v31 = vmul.f32 %v4864_v26, %v2930_v30  ;;  %v3890_v27 = vld [vmem:[%s4174_s28 + $0x8] sm:$0xff] }
 0x25f   : > { %v3002_v32 = vadd.f32 %v4875_v61, %v2966_v31 }
 0x261   : > { %v2429_v34 = vpop.f32.mrf.mxu2  ;;  %v3034_v15 = vmax.f32 %v3002_v32, 0.0 }
 0x262   : > { %v2513_v38 = vadd.f32 %v2481_v35, %v2429_v34  ;;  %v2781_v39 = vpop.f32.mrf.mxu3  ;;  %v2144_v41 = vpop.f32.mrf.mxu1  ;;  %v2483_v56 = vld [vmem:[#allocation3 + $0xa8] sm:$0xff] }
 0x263   : > { %v2868_v25 = vadd.f32 %v2836_v40, %v2781_v39  ;;  %v3058_v45 = vpack.c.bf16 %v3034_v15, %v3033_v36  ;;  %2192 = vst.msk [vmem:[#allocation3 + $0xb0] sm:$0xff] %vm2169_vm4, %v2144_v41  ;;  %v2837_v42 = vld [vmem:[#allocation3 + $0x90] sm:$0xff] }
 0x264   : > { %2545 = vst.msk [vmem:[#allocation3 + $0x98] sm:$0xff] %vm2169_vm4, %v2513_v38  ;;  %v2931_v16 = vld [vmem:[#allocation3 + $0x80] sm:$0xff] }
 0x265   : > { %2900 = vst.msk [vmem:[#allocation3 + $0x88] sm:$0xff] %vm2169_vm4, %v2868_v25  ;;  %3758 = vmatmul.msk.bf16.gmra.mxu0 %vm2169_vm4, %v3058_v45  ;;  %v2967_v47 = vmul.f32 %v4864_v26, %v2931_v16 }
 0x267   : > { %v3003_v13 = vadd.f32 %v4875_v61, %v2967_v47 }
 0x269   : > { %v2432_v37 = vpop.f32.mrf.mxu2  ;;  %v3035_v59 = vmax.f32 %v3003_v13, 0.0 }
 0x26a   : > { %v2514_v49 = vadd.f32 %v2482_v46, %v2432_v37  ;;  %v2784_v50 = vpop.f32.mrf.mxu3  ;;  %v2146_v53 = vpop.f32.mrf.mxu1  ;;  %v2484_v10 = vld [vmem:[#allocation3 + $0xb0] sm:$0xff] }
 0x26b   : > { %v2869_v51 = vadd.f32 %v2837_v42, %v2784_v50  ;;  %2193 = vst.msk [vmem:[#allocation3 + $0xb8] sm:$0xff] %vm2169_vm4, %v2146_v53  ;;  %v2838_v0 = vld [vmem:[#allocation3 + $0x98] sm:$0xff]  ;;  %v3891_v46 = vld [vmem:[%s4174_s28 + $0x10] sm:$0xff] }
 0x26c   : > { %2546 = vst.msk [vmem:[#allocation3 + $0xa0] sm:$0xff] %vm2169_vm4, %v2514_v49  ;;  %v2932_v28 = vld [vmem:[#allocation3 + $0x88] sm:$0xff] }
 0x26d   : > { %2901 = vst.msk [vmem:[#allocation3 + $0x90] sm:$0xff] %vm2169_vm4, %v2869_v51  ;;  %v2968_v3 = vmul.f32 %v4864_v26, %v2932_v28 }
 0x26f   : > { %v3004_v33 = vadd.f32 %v4875_v61, %v2968_v3 }
 0x271   : > { %v2434_v48 = vpop.f32.mrf.mxu2  ;;  %v3036_v60 = vmax.f32 %v3004_v33, 0.0 }
 0x272   : > { %v2515_v63 = vadd.f32 %v2483_v56, %v2434_v48  ;;  %v2786_v43 = vpop.f32.mrf.mxu3  ;;  %v3129_v1 = vpop.f32.mrf.mxu0  ;;  %v2485_v32 = vld [vmem:[#allocation3 + $0xb8] sm:$0xff] }
 0x273   : > { %v2870_v2 = vadd.f32 %v2838_v0, %v2786_v43  ;;  %v3213_v4 = vmul.f32 %v4991_v57, %v3129_v1  ;;  %v2149_v54 = vpop.f32.mrf.mxu1  ;;  %v3059_v55 = vpack.c.bf16 %v3036_v60, %v3035_v59  ;;  %v2839_v19 = vld [vmem:[#allocation3 + $0xa0] sm:$0xff]  ;;  %v3892_v0 = vld [vmem:[%s4174_s28 + $0x18] sm:$0xff] }
 0x274   : > { %2547 = vst.msk [vmem:[#allocation3 + $0xa8] sm:$0xff] %vm2169_vm4, %v2515_v63  ;;  %v2933_v6 = vld [vmem:[#allocation3 + $0x90] sm:$0xff] }
 0x275   : > { %2902 = vst.msk [vmem:[#allocation3 + $0x98] sm:$0xff] %vm2169_vm4, %v2870_v2  ;;  %v3249_v29 = vadd.f32 %v4997_v44, %v3213_v4  ;;  %3759 = vmatmul.msk.bf16.gmra.mxu0 %vm2169_vm4, %v3059_v55  ;;  %v2969_v12 = vmul.f32 %v4864_v26, %v2933_v6 }
 0x276   : > { %2194 = vst.msk [vmem:[#allocation3 + $0xc0] sm:$0xff] %vm2169_vm4, %v2149_v54 }
 0x277   : > { %v3281_v7 = vadd.f32 %v3889_v58, %v3249_v29  ;;  %v3005_v5 = vadd.f32 %v4875_v61, %v2969_v12 }
 0x279   : > { %v3313_v8 = vmax.f32 %v3281_v7, 0.0  ;;  %v2437_v9 = vpop.f32.mrf.mxu2  ;;  %v3037_v34 = vmax.f32 %v3005_v5, 0.0 }
 0x27a   : > { %v2516_v14 = vadd.f32 %v2484_v10, %v2437_v9  ;;  %v2789_v17 = vpop.f32.mrf.mxu3  ;;  %v3131_v20 = vpop.f32.mrf.mxu0 }
 0x27b   : > { %3345 = vst.msk [vmem:[%s5009_s22] sm:$0xff] %vm437_vm0, %v3313_v8  ;;  %v2871_v21 = vadd.f32 %v2839_v19, %v2789_v17  ;;  %v3214_v11 = vmul.f32 %v4991_v57, %v3131_v20  ;;  %v2151_v18 = vpop.f32.mrf.mxu1  ;;  %v2840_v38 = vld [vmem:[#allocation3 + $0xa8] sm:$0xff] }
 0x27c   : > { %2548 = vst.msk [vmem:[#allocation3 + $0xb0] sm:$0xff] %vm2169_vm4, %v2516_v14  ;;  %v2934_v22 = vld [vmem:[#allocation3 + $0x98] sm:$0xff] }
 0x27d   : > { %2903 = vst.msk [vmem:[#allocation3 + $0xa0] sm:$0xff] %vm2169_vm4, %v2871_v21  ;;  %v3250_v23 = vadd.f32 %v4997_v44, %v3214_v11  ;;  %v2970_v24 = vmul.f32 %v4864_v26, %v2934_v22  ;;  %v2486_v42 = vld [vmem:[#allocation3 + $0xc0] sm:$0xff] }
 0x27e   : > { %2195 = vst.msk [vmem:[#allocation3 + $0xc8] sm:$0xff] %vm2169_vm4, %v2151_v18  ;;  %v3893_v21 = vld [vmem:[%s4174_s28 + $0x20] sm:$0xff] }
 0x27f   : > { %v3282_v62 = vadd.f32 %v3890_v27, %v3250_v23  ;;  %v3006_v30 = vadd.f32 %v4875_v61, %v2970_v24 }
 0x281   : > { %v3314_v31 = vmax.f32 %v3282_v62, 0.0  ;;  %v2439_v52 = vpop.f32.mrf.mxu2  ;;  %v3038_v35 = vmax.f32 %v3006_v30, 0.0 }
 0x282   : > { %v2517_v36 = vadd.f32 %v2485_v32, %v2439_v52  ;;  %v2791_v15 = vpop.f32.mrf.mxu3  ;;  %v3134_v39 = vpop.f32.mrf.mxu0 }
 0x283   : > { %3346 = vst.msk [vmem:[%s5009_s22 + $0x8] sm:$0xff] %vm437_vm0, %v3314_v31  ;;  %v2872_v40 = vadd.f32 %v2840_v38, %v2791_v15  ;;  %v3215_v25 = vmul.f32 %v4991_v57, %v3134_v39  ;;  %v2154_v41 = vpop.f32.mrf.mxu1  ;;  %v3060_v45 = vpack.c.bf16 %v3038_v35, %v3037_v34  ;;  %v2841_v3 = vld [vmem:[#allocation3 + $0xb0] sm:$0xff]  ;;  %v3894_v38 = vld [vmem:[%s4174_s28 + $0x28] sm:$0xff] }
 0x284   : > { %2549 = vst.msk [vmem:[#allocation3 + $0xb8] sm:$0xff] %vm2169_vm4, %v2517_v36  ;;  %v2935_v37 = vld [vmem:[#allocation3 + $0xa0] sm:$0xff] }
 0x285   : > { %2904 = vst.msk [vmem:[#allocation3 + $0xa8] sm:$0xff] %vm2169_vm4, %v2872_v40  ;;  %v3251_v16 = vadd.f32 %v4997_v44, %v3215_v25  ;;  %3760 = vmatmul.msk.bf16.gmra.mxu0 %vm2169_vm4, %v3060_v45  ;;  %v2971_v51 = vmul.f32 %v4864_v26, %v2935_v37  ;;  %v2487_v55 = vld [vmem:[#allocation3 + $0xc8] sm:$0xff] }
 0x286   : > { %2196 = vst.msk [vmem:[#allocation3 + $0xd0] sm:$0xff] %vm2169_vm4, %v2154_v41 }
 0x287   : > { %v3283_v47 = vadd.f32 %v3891_v46, %v3251_v16  ;;  %v3007_v43 = vadd.f32 %v4875_v61, %v2971_v51 }
 0x289   : > { %v3315_v49 = vmax.f32 %v3283_v47, 0.0  ;;  %v2442_v50 = vpop.f32.mrf.mxu2  ;;  %v3039_v29 = vmax.f32 %v3007_v43, 0.0 }
 0x28a   : > { %v2518_v53 = vadd.f32 %v2486_v42, %v2442_v50  ;;  %v2794_v28 = vpop.f32.mrf.mxu3  ;;  %v3136_v13 = vpop.f32.mrf.mxu0 }
 0x28b   : > { %3347 = vst.msk [vmem:[%s5009_s22 + $0x10] sm:$0xff] %vm437_vm0, %v3315_v49  ;;  %v2873_v33 = vadd.f32 %v2841_v3, %v2794_v28  ;;  %v3216_v48 = vmul.f32 %v4991_v57, %v3136_v13  ;;  %v2156_v56 = vpop.f32.mrf.mxu1  ;;  %v2842_v8 = vld [vmem:[#allocation3 + $0xb8] sm:$0xff] }
 0x28c   : > { %2550 = vst.msk [vmem:[#allocation3 + $0xc0] sm:$0xff] %vm2169_vm4, %v2518_v53  ;;  %v2936_v59 = vld [vmem:[#allocation3 + $0xa8] sm:$0xff] }
 0x28d   : > { %2905 = vst.msk [vmem:[#allocation3 + $0xb0] sm:$0xff] %vm2169_vm4, %v2873_v33  ;;  %v3252_v60 = vadd.f32 %v4997_v44, %v3216_v48  ;;  %v2972_v63 = vmul.f32 %v4864_v26, %v2936_v59  ;;  %v2488_v23 = vld [vmem:[#allocation3 + $0xd0] sm:$0xff] }
 0x28e   : > { %2197 = vst.msk [vmem:[#allocation3 + $0xd8] sm:$0xff] %vm2169_vm4, %v2156_v56  ;;  %v3895_v33 = vld [vmem:[%s4174_s28 + $0x30] sm:$0xff] }
 0x28f   : > { %v3284_v1 = vadd.f32 %v3892_v0, %v3252_v60  ;;  %v3008_v2 = vadd.f32 %v4875_v61, %v2972_v63 }
 0x291   : > { %v3316_v4 = vmax.f32 %v3284_v1, 0.0  ;;  %v2444_v54 = vpop.f32.mrf.mxu2  ;;  %v3040_v6 = vmax.f32 %v3008_v2, 0.0 }
 0x292   : > { %v2519_v58 = vadd.f32 %v2487_v55, %v2444_v54  ;;  %v2796_v7 = vpop.f32.mrf.mxu3  ;;  %v3139_v9 = vpop.f32.mrf.mxu0 }
 0x293   : > { %3348 = vst.msk [vmem:[%s5009_s22 + $0x18] sm:$0xff] %vm437_vm0, %v3316_v4  ;;  %v2874_v10 = vadd.f32 %v2842_v8, %v2796_v7  ;;  %v3217_v12 = vmul.f32 %v4991_v57, %v3139_v9  ;;  %v2159_v14 = vpop.f32.mrf.mxu1  ;;  %v3061_v17 = vpack.c.bf16 %v3040_v6, %v3039_v29  ;;  %v2843_v62 = vld [vmem:[#allocation3 + $0xc0] sm:$0xff]  ;;  %v3896_v8 = vld [vmem:[%s4174_s28 + $0x38] sm:$0xff] }
 0x294   : > { %2551 = vst.msk [vmem:[#allocation3 + $0xc8] sm:$0xff] %vm2169_vm4, %v2519_v58  ;;  %v2937_v20 = vld [vmem:[#allocation3 + $0xb0] sm:$0xff] }
 0x295   : > { %2906 = vst.msk [vmem:[#allocation3 + $0xb8] sm:$0xff] %vm2169_vm4, %v2874_v10  ;;  %v3253_v19 = vadd.f32 %v4997_v44, %v3217_v12  ;;  %3761 = vmatmul.msk.bf16.gmra.mxu0 %vm2169_vm4, %v3061_v17  ;;  %v2973_v24 = vmul.f32 %v4864_v26, %v2937_v20  ;;  %v2489_v45 = vld [vmem:[#allocation3 + $0xd8] sm:$0xff] }
 0x296   : > { %2198 = vst.msk [vmem:[#allocation3 + $0xe0] sm:$0xff] %vm2169_vm4, %v2159_v14 }
 0x297   : > { %v3285_v11 = vadd.f32 %v3893_v21, %v3253_v19  ;;  %v3009_v15 = vadd.f32 %v4875_v61, %v2973_v24 }
 0x299   : > { %v3317_v18 = vmax.f32 %v3285_v11, 0.0  ;;  %v2447_v22 = vpop.f32.mrf.mxu2  ;;  %v3041_v16 = vmax.f32 %v3009_v15, 0.0 }
 0x29a   : > { %v2520_v5 = vadd.f32 %v2488_v23, %v2447_v22  ;;  %v2799_v27 = vpop.f32.mrf.mxu3  ;;  %v3141_v30 = vpop.f32.mrf.mxu0 }
 0x29b   : > { %3349 = vst.msk [vmem:[%s5009_s22 + $0x20] sm:$0xff] %vm437_vm0, %v3317_v18  ;;  %v2875_v31 = vadd.f32 %v2843_v62, %v2799_v27  ;;  %v3218_v52 = vmul.f32 %v4991_v57, %v3141_v30  ;;  %v2161_v32 = vpop.f32.mrf.mxu1  ;;  %v2844_v49 = vld [vmem:[#allocation3 + $0xc8] sm:$0xff]  ;;  %v3897_v30 = vld [vmem:[%s4174_s28 + $0x40] sm:$0xff] }
 0x29c   : > { %2552 = vst.msk [vmem:[#allocation3 + $0xd0] sm:$0xff] %vm2169_vm4, %v2520_v5  ;;  %v2938_v34 = vld [vmem:[#allocation3 + $0xb8] sm:$0xff] }
 0x29d   : > { %2907 = vst.msk [vmem:[#allocation3 + $0xc0] sm:$0xff] %vm2169_vm4, %v2875_v31  ;;  %v3254_v35 = vadd.f32 %v4997_v44, %v3218_v52  ;;  %v2974_v36 = vmul.f32 %v4864_v26, %v2938_v34  ;;  %v2490_v60 = vld [vmem:[#allocation3 + $0xe0] sm:$0xff] }
 0x29e   : > { %2199 = vst.msk [vmem:[#allocation3 + $0xe8] sm:$0xff] %vm2169_vm4, %v2161_v32 }
 0x29f   : > { %v3286_v39 = vadd.f32 %v3894_v38, %v3254_v35  ;;  %v3010_v40 = vadd.f32 %v4875_v61, %v2974_v36 }
 0x2a1   : > { %v3318_v25 = vmax.f32 %v3286_v39, 0.0  ;;  %v2449_v41 = vpop.f32.mrf.mxu2  ;;  %v3042_v37 = vmax.f32 %v3010_v40, 0.0 }
 0x2a2   : > { %v2521_v46 = vadd.f32 %v2489_v45, %v2449_v41  ;;  %v2801_v47 = vpop.f32.mrf.mxu3  ;;  %v3144_v50 = vpop.f32.mrf.mxu0 }
 0x2a3   : > { %3350 = vst.msk [vmem:[%s5009_s22 + $0x28] sm:$0xff] %vm437_vm0, %v3318_v25  ;;  %v2876_v42 = vadd.f32 %v2844_v49, %v2801_v47  ;;  %v3219_v51 = vmul.f32 %v4991_v57, %v3144_v50  ;;  %v2164_v53 = vpop.f32.mrf.mxu1  ;;  %v3062_v28 = vpack.c.bf16 %v3042_v37, %v3041_v16  ;;  %v2845_v1 = vld [vmem:[#allocation3 + $0xd0] sm:$0xff] }
 0x2a4   : > { %2553 = vst.msk [vmem:[#allocation3 + $0xd8] sm:$0xff] %vm2169_vm4, %v2521_v46  ;;  %v2939_v13 = vld [vmem:[#allocation3 + $0xc0] sm:$0xff]  ;;  %v3898_v46 = vld [vmem:[%s4174_s28 + $0x48] sm:$0xff] }
 0x2a5   : > { %2908 = vst.msk [vmem:[#allocation3 + $0xc8] sm:$0xff] %vm2169_vm4, %v2876_v42  ;;  %v3255_v3 = vadd.f32 %v4997_v44, %v3219_v51  ;;  %3762 = vmatmul.msk.bf16.gmra.mxu0 %vm2169_vm4, %v3062_v28  ;;  %v2975_v63 = vmul.f32 %v4864_v26, %v2939_v13  ;;  %v2491_v17 = vld [vmem:[#allocation3 + $0xe8] sm:$0xff] }
 0x2a6   : > { %2200 = vst.msk [vmem:[#allocation3 + $0xf0] sm:$0xff] %vm2169_vm4, %v2164_v53 }
 0x2a7   : > { %v3287_v48 = vadd.f32 %v3895_v33, %v3255_v3  ;;  %v3011_v7 = vadd.f32 %v4875_v61, %v2975_v63  ;;  %v3899_v63 = vld [vmem:[%s4174_s28 + $0x50] sm:$0xff] }
 0x2a9   : > { %v3319_v56 = vmax.f32 %v3287_v48, 0.0  ;;  %v2452_v59 = vpop.f32.mrf.mxu2  ;;  %v3043_v19 = vmax.f32 %v3011_v7, 0.0 }
 0x2aa   : > { %v2522_v43 = vadd.f32 %v2490_v60, %v2452_v59  ;;  %v2804_v0 = vpop.f32.mrf.mxu3  ;;  %v3146_v2 = vpop.f32.mrf.mxu0 }
 0x2ab   : > { %3351 = vst.msk [vmem:[%s5009_s22 + $0x30] sm:$0xff] %vm437_vm0, %v3319_v56  ;;  %v2877_v4 = vadd.f32 %v2845_v1, %v2804_v0  ;;  %v3220_v54 = vmul.f32 %v4991_v57, %v3146_v2  ;;  %v2166_v55 = vpop.f32.mrf.mxu1  ;;  %v2846_v18 = vld [vmem:[#allocation3 + $0xd8] sm:$0xff]  ;;  %v3900_v1 = vld [vmem:[%s5269_s5] ss:$0 sm:$0xff] }
 0x2ac   : > { %2554 = vst.msk [vmem:[#allocation3 + $0xe0] sm:$0xff] %vm2169_vm4, %v2522_v43  ;;  %v2940_v29 = vld [vmem:[#allocation3 + $0xc8] sm:$0xff] }
 0x2ad   : > { %2909 = vst.msk [vmem:[#allocation3 + $0xd0] sm:$0xff] %vm2169_vm4, %v2877_v4  ;;  %v3256_v6 = vadd.f32 %v4997_v44, %v3220_v54  ;;  %v2976_v58 = vmul.f32 %v4864_v26, %v2940_v29  ;;  %v2492_v34 = vld [vmem:[#allocation3 + $0xf0] sm:$0xff] }
 0x2ae   : > { %2201 = vst.msk [vmem:[#allocation3 + $0xf8] sm:$0xff] %vm2169_vm4, %v2166_v55 }
 0x2af   : > { %v3288_v9 = vadd.f32 %v3896_v8, %v3256_v6  ;;  %v3012_v10 = vadd.f32 %v4875_v61, %v2976_v58 }
 0x2b1   : > { %v3320_v12 = vmax.f32 %v3288_v9, 0.0  ;;  %v2454_v14 = vpop.f32.mrf.mxu2  ;;  %v3044_v20 = vmax.f32 %v3012_v10, 0.0  ;;  %v3901_v9 = vld [vmem:[%s5270_s6] ss:$0 sm:$0xff] }
 0x2b2   : > { %v2523_v21 = vadd.f32 %v2491_v17, %v2454_v14  ;;  %v2806_v11 = vpop.f32.mrf.mxu3  ;;  %v3149_v22 = vpop.f32.mrf.mxu0 }
 0x2b3   : > { %3352 = vst.msk [vmem:[%s5009_s22 + $0x38] sm:$0xff] %vm437_vm0, %v3320_v12  ;;  %v2878_v23 = vadd.f32 %v2846_v18, %v2806_v11  ;;  %v3221_v24 = vmul.f32 %v4991_v57, %v3149_v22  ;;  %v3063_v5 = vpack.c.bf16 %v3044_v20, %v3043_v19  ;;  %v2847_v38 = vld [vmem:[#allocation3 + $0xe0] sm:$0xff]  ;;  %v3902_v12 = vld [vmem:[%s4174_s28 + $0x58] sm:$0xff] }
 0x2b4   : > { %2555 = vst.msk [vmem:[#allocation3 + $0xe8] sm:$0xff] %vm2169_vm4, %v2523_v21  ;;  %v2941_v62 = vld [vmem:[#allocation3 + $0xd0] sm:$0xff] }
 0x2b5   : > { %2910 = vst.msk [vmem:[#allocation3 + $0xd8] sm:$0xff] %vm2169_vm4, %v2878_v23  ;;  %v3257_v27 = vadd.f32 %v4997_v44, %v3221_v24  ;;  %3763 = vmatmul.msk.bf16.gmra.mxu0 %vm2169_vm4, %v3063_v5  ;;  %v2977_v35 = vmul.f32 %v4864_v26, %v2941_v62  ;;  %v2493_v51 = vld [vmem:[#allocation3 + $0xf8] sm:$0xff] }
 0x2b7   : > { %v3289_v31 = vadd.f32 %v3897_v30, %v3257_v27  ;;  %v3013_v37 = vadd.f32 %v4875_v61, %v2977_v35  ;;  %v3903_v30 = vld [vmem:[%s4174_s28 + $0x60] sm:$0xff] }
 0x2b9   : > { %v3321_v52 = vmax.f32 %v3289_v31, 0.0  ;;  %v2457_v32 = vpop.f32.mrf.mxu2  ;;  %v3045_v53 = vmax.f32 %v3013_v37, 0.0 }
 0x2ba   : > { %v2524_v36 = vadd.f32 %v2492_v34, %v2457_v32  ;;  %v2809_v15 = vpop.f32.mrf.mxu3  ;;  %v3151_v39 = vpop.f32.mrf.mxu0 }
 0x2bb   : > { %3353 = vst.msk [vmem:[%s5009_s22 + $0x40] sm:$0xff] %vm437_vm0, %v3321_v52  ;;  %v2879_v40 = vadd.f32 %v2847_v38, %v2809_v15  ;;  %v3222_v25 = vmul.f32 %v4991_v57, %v3151_v39  ;;  %v2848_v33 = vld [vmem:[#allocation3 + $0xe8] sm:$0xff] }
 0x2bc   : > { %2556 = vst.msk [vmem:[#allocation3 + $0xf0] sm:$0xff] %vm2169_vm4, %v2524_v36  ;;  %v2942_v41 = vld [vmem:[#allocation3 + $0xd8] sm:$0xff] }
 0x2bd   : > { %2911 = vst.msk [vmem:[#allocation3 + $0xe0] sm:$0xff] %vm2169_vm4, %v2879_v40  ;;  %v3258_v45 = vadd.f32 %v4997_v44, %v3222_v25  ;;  %v2978_v16 = vmul.f32 %v4864_v26, %v2942_v41  ;;  %v3904_v40 = vld [vmem:[%s4174_s28 + $0x68] sm:$0xff] }
 0x2bf   : > { %v3290_v47 = vadd.f32 %v3898_v46, %v3258_v45  ;;  %v3014_v49 = vadd.f32 %v4875_v61, %v2978_v16 }
 0x2c1   : > { %v3322_v50 = vmax.f32 %v3290_v47, 0.0  ;;  %v2459_v42 = vpop.f32.mrf.mxu2  ;;  %v3046_v28 = vmax.f32 %v3014_v49, 0.0 }
 0x2c2   : > { %v2525_v3 = vadd.f32 %v2493_v51, %v2459_v42  ;;  %v2811_v13 = vpop.f32.mrf.mxu3  ;;  %v3154_v48 = vpop.f32.mrf.mxu0  ;;  %v3905_v42 = vld [vmem:[%s4174_s28 + $0x70] sm:$0xff] }
 0x2c3   : > { %3354 = vst.msk [vmem:[%s5009_s22 + $0x48] sm:$0xff] %vm437_vm0, %v3322_v50  ;;  %v2880_v56 = vadd.f32 %v2848_v33, %v2811_v13  ;;  %v3223_v26 = vmul.f32 %v4991_v57, %v3154_v48  ;;  %v3064_v59 = vpack.c.bf16 %v3046_v28, %v3045_v53  ;;  %v2849_v54 = vld [vmem:[#allocation3 + $0xf0] sm:$0xff]  ;;  %v3906_v33 = vld [vmem:[%s4174_s28 + $0x78] sm:$0xff] }
 0x2c4   : > { %2557 = vst.msk [vmem:[#allocation3 + $0xf8] sm:$0xff] %vm2169_vm4, %v2525_v3  ;;  %v2943_v60 = vld [vmem:[#allocation3 + $0xe0] sm:$0xff] }
 0x2c5   : > { %2912 = vst.msk [vmem:[#allocation3 + $0xe8] sm:$0xff] %vm2169_vm4, %v2880_v56  ;;  %v3259_v61 = vadd.f32 %v4997_v44, %v3223_v26  ;;  %3764 = vmatmul.msk.bf16.gmra.mxu0 %vm2169_vm4, %v3064_v59  ;;  %v2979_v2 = vmul.f32 %v3900_v1, %v2943_v60  ;;  %v3907_v60 = vld [vmem:[%s4174_s28 + $0x80] sm:$0xff] }
 0x2c7   : > { %v3291_v43 = vadd.f32 %v3899_v63, %v3259_v61  ;;  %v3015_v10 = vadd.f32 %v3901_v9, %v2979_v2 }
 0x2c9   : > { %v3323_v0 = vmax.f32 %v3291_v43, 0.0  ;;  %v3047_v20 = vmax.f32 %v3015_v10, 0.0 }
 0x2ca   : > { %v2814_v4 = vpop.f32.mrf.mxu3  ;;  %v3156_v55 = vpop.f32.mrf.mxu0 }
 0x2cb   : > { %3355 = vst.msk [vmem:[%s5009_s22 + $0x50] sm:$0xff] %vm437_vm0, %v3323_v0  ;;  %v2881_v29 = vadd.f32 %v2849_v54, %v2814_v4  ;;  %v3224_v6 = vmul.f32 %v4991_v57, %v3156_v55  ;;  %v2850_v18 = vld [vmem:[#allocation3 + $0xf8] sm:$0xff]  ;;  %v3908_v4 = vld [vmem:[%s4174_s28 + $0x88] sm:$0xff] }
 0x2cc   : > { %v2944_v58 = vld [vmem:[#allocation3 + $0xe8] sm:$0xff] }
 0x2cd   : > { %2913 = vst.msk [vmem:[#allocation3 + $0xf0] sm:$0xff] %vm2169_vm4, %v2881_v29  ;;  %v3260_v7 = vadd.f32 %v4997_v44, %v3224_v6  ;;  %v2980_v8 = vmul.f32 %v3900_v1, %v2944_v58 }
 0x2cf   : > { %v3292_v14 = vadd.f32 %v3902_v12, %v3260_v7  ;;  %v3016_v17 = vadd.f32 %v3901_v9, %v2980_v8  ;;  %v3909_v7 = vld [vmem:[%s4174_s28 + $0x90] sm:$0xff] }
 0x2d1   : > { %v3324_v19 = vmax.f32 %v3292_v14, 0.0  ;;  %v3048_v21 = vmax.f32 %v3016_v17, 0.0  ;;  %v3910_v17 = vld [vmem:[%s4174_s28 + $0x98] sm:$0xff] }
 0x2d2   : > { %v2816_v11 = vpop.f32.mrf.mxu3  ;;  %v3159_v22 = vpop.f32.mrf.mxu0 }
 0x2d3   : > { %3356 = vst.msk [vmem:[%s5009_s22 + $0x58] sm:$0xff] %vm437_vm0, %v3324_v19  ;;  %v2882_v23 = vadd.f32 %v2850_v18, %v2816_v11  ;;  %v3225_v24 = vmul.f32 %v4991_v57, %v3159_v22  ;;  %v3065_v5 = vpack.c.bf16 %v3048_v21, %v3047_v20  ;;  %v3911_v22 = vld [vmem:[%s4174_s28 + $0xa0] sm:$0xff] }
 0x2d4   : > { %v2945_v62 = vld [vmem:[#allocation3 + $0xf0] sm:$0xff] }
 0x2d5   : > { %2914 = vst.msk [vmem:[#allocation3 + $0xf8] sm:$0xff] %vm2169_vm4, %v2882_v23  ;;  %v3261_v27 = vadd.f32 %v4997_v44, %v3225_v24  ;;  %3765 = vmatmul.msk.bf16.gmra.mxu0 %vm2169_vm4, %v3065_v5  ;;  %v2981_v32 = vmul.f32 %v3900_v1, %v2945_v62 }
 0x2d7   : > { %v3293_v31 = vadd.f32 %v3903_v30, %v3261_v27  ;;  %v3017_v39 = vadd.f32 %v3901_v9, %v2981_v32  ;;  %v3912_v30 = vld [vmem:[%s4174_s28 + $0xa8] sm:$0xff] }
 0x2d9   : > { %v3325_v52 = vmax.f32 %v3293_v31, 0.0  ;;  %v3049_v16 = vmax.f32 %v3017_v39, 0.0 }
 0x2da   : > { %v3161_v34 = vpop.f32.mrf.mxu0 }
 0x2db   : > { %3357 = vst.msk [vmem:[%s5009_s22 + $0x60] sm:$0xff] %vm437_vm0, %v3325_v52  ;;  %v3226_v35 = vmul.f32 %v4991_v57, %v3161_v34 }
 0x2dc   : > { %v2946_v36 = vld [vmem:[#allocation3 + $0xf8] sm:$0xff] }
 0x2dd   : > { %v3262_v15 = vadd.f32 %v4997_v44, %v3226_v35  ;;  %v2982_v38 = vmul.f32 %v3900_v1, %v2946_v36  ;;  %v3913_v36 = vld [vmem:[%s4174_s28 + $0xb0] sm:$0xff] }
 0x2df   : > { %v3294_v25 = vadd.f32 %v3904_v40, %v3262_v15  ;;  %v3018_v41 = vadd.f32 %v3901_v9, %v2982_v38 }
 0x2e1   : > { %v3326_v45 = vmax.f32 %v3294_v25, 0.0  ;;  %v3050_v37 = vmax.f32 %v3018_v41, 0.0  ;;  %v3914_v41 = vld [vmem:[%s4174_s28 + $0xb8] sm:$0xff] }
 0x2e2   : > { %v3164_v46 = vpop.f32.mrf.mxu0 }
 0x2e3   : > { %3358 = vst.msk [vmem:[%s5009_s22 + $0x68] sm:$0xff] %vm437_vm0, %v3326_v45  ;;  %v3227_v47 = vmul.f32 %v4991_v57, %v3164_v46  ;;  %v3066_v49 = vpack.c.bf16 %v3050_v37, %v3049_v16 }
 0x2e5   : > { %v3263_v50 = vadd.f32 %v4997_v44, %v3227_v47  ;;  %3766 = vmatmul.msk.bf16.gmra.mxu0 %vm2169_vm4, %v3066_v49  ;;  %v3915_v49 = vld [vmem:[%s4174_s28 + $0xc0] sm:$0xff] }
 0x2e7   : > { %v3295_v51 = vadd.f32 %v3905_v42, %v3263_v50 }
 0x2e9   : > { %v3327_v53 = vmax.f32 %v3295_v51, 0.0 }
 0x2ea   : > { %v3166_v28 = vpop.f32.mrf.mxu0 }
 0x2eb   : > { %3359 = vst.msk [vmem:[%s5009_s22 + $0x70] sm:$0xff] %vm437_vm0, %v3327_v53  ;;  %v3228_v3 = vmul.f32 %v4991_v57, %v3166_v28 }
 0x2ed   : > { %v3264_v13 = vadd.f32 %v4997_v44, %v3228_v3  ;;  %v3916_v3 = vld [vmem:[%s4174_s28 + $0xc8] sm:$0xff] }
 0x2ef   : > { %v3296_v48 = vadd.f32 %v3906_v33, %v3264_v13 }
 0x2f1   : > { %v3328_v56 = vmax.f32 %v3296_v48, 0.0 }
 0x2f2   : > { %v3169_v26 = vpop.f32.mrf.mxu0 }
 0x2f3   : > { %3360 = vst.msk [vmem:[%s5009_s22 + $0x78] sm:$0xff] %vm437_vm0, %v3328_v56  ;;  %v3229_v59 = vmul.f32 %v4991_v57, %v3169_v26 }
 0x2f5   : > { %v3265_v61 = vadd.f32 %v4997_v44, %v3229_v59  ;;  %v3917_v59 = vld [vmem:[%s4174_s28 + $0xd0] sm:$0xff] }
 0x2f7   : > { %v3297_v63 = vadd.f32 %v3907_v60, %v3265_v61 }
 0x2f9   : > { %v3329_v43 = vmax.f32 %v3297_v63, 0.0 }
 0x2fa   : > { %v3171_v0 = vpop.f32.mrf.mxu0 }
 0x2fb   : > { %3361 = vst.msk [vmem:[%s5009_s22 + $0x80] sm:$0xff] %vm437_vm0, %v3329_v43  ;;  %v3230_v1 = vmul.f32 %v4991_v57, %v3171_v0 }
 0x2fd   : > { %v3266_v2 = vadd.f32 %v4997_v44, %v3230_v1  ;;  %v3918_v1 = vld [vmem:[%s4174_s28 + $0xd8] sm:$0xff] }
 0x2ff   : > { %v3298_v54 = vadd.f32 %v3908_v4, %v3266_v2 }
 0x301   : > { %v3330_v55 = vmax.f32 %v3298_v54, 0.0 }
 0x302   : > { %v3174_v29 = vpop.f32.mrf.mxu0 }
 0x303   : > { %3362 = vst.msk [vmem:[%s5009_s22 + $0x88] sm:$0xff] %vm437_vm0, %v3330_v55  ;;  %v3231_v6 = vmul.f32 %v4991_v57, %v3174_v29 }
 0x305   : > { %v3267_v58 = vadd.f32 %v4997_v44, %v3231_v6  ;;  %v3919_v6 = vld [vmem:[%s4174_s28 + $0xe0] sm:$0xff] }
 0x307   : > { %v3299_v8 = vadd.f32 %v3909_v7, %v3267_v58 }
 0x309   : > { %v3331_v9 = vmax.f32 %v3299_v8, 0.0 }
 0x30a   : > { %v3176_v10 = vpop.f32.mrf.mxu0 }
 0x30b   : > { %3363 = vst.msk [vmem:[%s5009_s22 + $0x90] sm:$0xff] %vm437_vm0, %v3331_v9  ;;  %v3232_v12 = vmul.f32 %v4991_v57, %v3176_v10 }
 0x30d   : > { %v3268_v14 = vadd.f32 %v4997_v44, %v3232_v12  ;;  %v3920_v12 = vld [vmem:[%s4174_s28 + $0xe8] sm:$0xff] }
 0x30f   : > { %v3300_v19 = vadd.f32 %v3910_v17, %v3268_v14 }
 0x311   : > { %v3332_v20 = vmax.f32 %v3300_v19, 0.0 }
 0x312   : > { %v3179_v21 = vpop.f32.mrf.mxu0 }
 0x313   : > { %3364 = vst.msk [vmem:[%s5009_s22 + $0x98] sm:$0xff] %vm437_vm0, %v3332_v20  ;;  %v3233_v11 = vmul.f32 %v4991_v57, %v3179_v21 }
 0x315   : > { %v3269_v18 = vadd.f32 %v4997_v44, %v3233_v11  ;;  %v3921_v11 = vld [vmem:[%s4174_s28 + $0xf0] sm:$0xff] }
 0x317   : > { %v3301_v23 = vadd.f32 %v3911_v22, %v3269_v18 }
 0x319   : > { %v3333_v24 = vmax.f32 %v3301_v23, 0.0 }
 0x31a   : > { %v3181_v5 = vpop.f32.mrf.mxu0 }
 0x31b   : > { %3365 = vst.msk [vmem:[%s5009_s22 + $0xa0] sm:$0xff] %vm437_vm0, %v3333_v24  ;;  %v3234_v27 = vmul.f32 %v4991_v57, %v3181_v5 }
 0x31d   : > { %v3270_v62 = vadd.f32 %v4997_v44, %v3234_v27  ;;  %v3922_v27 = vld [vmem:[%s4174_s28 + $0xf8] sm:$0xff] }
 0x31f   : > { %v3302_v31 = vadd.f32 %v3912_v30, %v3270_v62 }
 0x321   : > { %v3334_v52 = vmax.f32 %v3302_v31, 0.0 }
 0x322   : > { %v3184_v32 = vpop.f32.mrf.mxu0 }
 0x323   : > { %3366 = vst.msk [vmem:[%s5009_s22 + $0xa8] sm:$0xff] %vm437_vm0, %v3334_v52  ;;  %v3235_v34 = vmul.f32 %v4991_v57, %v3184_v32 }
 0x325   : > { %v3271_v35 = vadd.f32 %v4997_v44, %v3235_v34 }
 0x327   : > { %v3303_v15 = vadd.f32 %v3913_v36, %v3271_v35 }
 0x329   : > { %v3335_v38 = vmax.f32 %v3303_v15, 0.0 }
 0x32a   : > { %v3186_v39 = vpop.f32.mrf.mxu0 }
 0x32b   : > { %3367 = vst.msk [vmem:[%s5009_s22 + $0xb0] sm:$0xff] %vm437_vm0, %v3335_v38  ;;  %v3236_v40 = vmul.f32 %v4991_v57, %v3186_v39 }
 0x32d   : > { %v3272_v25 = vadd.f32 %v4997_v44, %v3236_v40 }
 0x32f   : > { %v3304_v45 = vadd.f32 %v3914_v41, %v3272_v25 }
 0x331   : > { %v3336_v16 = vmax.f32 %v3304_v45, 0.0 }
 0x332   : > { %v3189_v37 = vpop.f32.mrf.mxu0 }
 0x333   : > { %3368 = vst.msk [vmem:[%s5009_s22 + $0xb8] sm:$0xff] %vm437_vm0, %v3336_v16  ;;  %v3237_v46 = vmul.f32 %v4991_v57, %v3189_v37 }
 0x335   : > { %v3273_v47 = vadd.f32 %v4997_v44, %v3237_v46 }
 0x337   : > { %v3305_v50 = vadd.f32 %v3915_v49, %v3273_v47 }
 0x339   : > { %v3337_v42 = vmax.f32 %v3305_v50, 0.0 }
 0x33a   : > { %v3191_v51 = vpop.f32.mrf.mxu0 }
 0x33b   : > { %3369 = vst.msk [vmem:[%s5009_s22 + $0xc0] sm:$0xff] %vm437_vm0, %v3337_v42  ;;  %v3238_v53 = vmul.f32 %v4991_v57, %v3191_v51 }
 0x33d   : > { %v3274_v28 = vadd.f32 %v4997_v44, %v3238_v53 }
 0x33f   : > { %v3306_v13 = vadd.f32 %v3916_v3, %v3274_v28 }
 0x341   : > { %v3338_v33 = vmax.f32 %v3306_v13, 0.0 }
 0x342   : > { %v3194_v48 = vpop.f32.mrf.mxu0 }
 0x343   : > { %3370 = vst.msk [vmem:[%s5009_s22 + $0xc8] sm:$0xff] %vm437_vm0, %v3338_v33  ;;  %v3239_v56 = vmul.f32 %v4991_v57, %v3194_v48 }
 0x345   : > { %v3275_v26 = vadd.f32 %v4997_v44, %v3239_v56 }
 0x347   : > { %v3307_v61 = vadd.f32 %v3917_v59, %v3275_v26 }
 0x349   : > { %v3339_v60 = vmax.f32 %v3307_v61, 0.0 }
 0x34a   : > { %v3196_v63 = vpop.f32.mrf.mxu0 }
 0x34b   : > { %3371 = vst.msk [vmem:[%s5009_s22 + $0xd0] sm:$0xff] %vm437_vm0, %v3339_v60  ;;  %v3240_v43 = vmul.f32 %v4991_v57, %v3196_v63 }
 0x34d   : > { %v3276_v0 = vadd.f32 %v4997_v44, %v3240_v43 }
 0x34f   : > { %v3308_v2 = vadd.f32 %v3918_v1, %v3276_v0 }
 0x351   : > { %v3340_v4 = vmax.f32 %v3308_v2, 0.0 }
 0x352   : > { %v3199_v54 = vpop.f32.mrf.mxu0 }
 0x353   : > { %3372 = vst.msk [vmem:[%s5009_s22 + $0xd8] sm:$0xff] %vm437_vm0, %v3340_v4  ;;  %v3241_v55 = vmul.f32 %v4991_v57, %v3199_v54 }
 0x355   : > { %v3277_v29 = vadd.f32 %v4997_v44, %v3241_v55 }
 0x357   : > { %v3309_v58 = vadd.f32 %v3919_v6, %v3277_v29 }
 0x359   : > { %v3341_v7 = vmax.f32 %v3309_v58, 0.0 }
 0x35a   : > { %v3201_v8 = vpop.f32.mrf.mxu0 }
 0x35b   : > { %3373 = vst.msk [vmem:[%s5009_s22 + $0xe0] sm:$0xff] %vm437_vm0, %v3341_v7  ;;  %v3242_v9 = vmul.f32 %v4991_v57, %v3201_v8 }
 0x35d   : > { %v3278_v10 = vadd.f32 %v4997_v44, %v3242_v9 }
 0x35f   : > { %v3310_v14 = vadd.f32 %v3920_v12, %v3278_v10 }
 0x361   : > { %v3342_v17 = vmax.f32 %v3310_v14, 0.0 }
 0x362   : > { %v3204_v19 = vpop.f32.mrf.mxu0 }
 0x363   : > { %3374 = vst.msk [vmem:[%s5009_s22 + $0xe8] sm:$0xff] %vm437_vm0, %v3342_v17  ;;  %v3243_v20 = vmul.f32 %v4991_v57, %v3204_v19 }
 0x365   : > { %v3279_v21 = vadd.f32 %v4997_v44, %v3243_v20 }
 0x367   : > { %v3311_v18 = vadd.f32 %v3921_v11, %v3279_v21 }
 0x369   : > { %v3343_v22 = vmax.f32 %v3311_v18, 0.0 }
 0x36a   : > { %v3206_v23 = vpop.f32.mrf.mxu0 }
 0x36b   : > { %3375 = vst.msk [vmem:[%s5009_s22 + $0xf0] sm:$0xff] %vm437_vm0, %v3343_v22  ;;  %v3244_v24 = vmul.f32 %v4991_v57, %v3206_v23 }
 0x36d   : > { %v3280_v5 = vadd.f32 %v4997_v44, %v3244_v24 }
 0x36f   : > { %v3312_v62 = vadd.f32 %v3922_v27, %v3280_v5 }
 0x371   : > { %v3344_v30 = vmax.f32 %v3312_v62, 0.0 }
 0x373   : > { %3376 = vst.msk [vmem:[%s5009_s22 + $0xf8] sm:$0xff] %vm437_vm0, %v3344_v30 }
 0x374   : > { %3980 = shalt.err (!%p3977_p4)
}
 0x375   : > { %s4026_s18 = smov 128  }
 0x376   : > { %3831 = dma.vmem_to_hbm [thread:$0]  (%p4132_p11), %s3391_s12, 4096, %s3393_s26, %s3378_s17, %s4026_s18, %s4026_s18, %s4024_s30  }
 0x377 PF: > { %s3407_s29 = sand.u32 1, %s4007_s13   ;;  %p5293_p7 = scmp.ge.s32.totalorder %s4019_s16, 2 }
 0x378   : > { %s3408_s11 = scalar_lea.sflag [#allocation6], %s3407_s29 }
 0x379   : > { %p3838_p5 = pnand %p5293_p7, %p4136_p12 }
 0x37b   : > { %p3839_p8 = pneg %p3838_p5 }
 0x37d   : > { %4002 = dma.done.wait (%p3839_p8), %s3408_s11, 4096  }
 0x37e   : > { %4004 = vsyncadd (%p3839_p8), %s3408_s11, 4294963200  ;;  %s5294_s16 = sld [smem:[#allocation11_spill]]  ;;  %s5297_s13 = smov %s4011_s14 }
 0x37f   : > { %s5295_s27 = sld [smem:[#allocation10_spill]] }
 0x380   : > { %s5296_s15 = sld [smem:[#allocation12_spill]] }
 0x384   : > { %p23_p10 = scmp.ge.s32.totalorder %s5294_s16, 4  }
 0x385   : > { %s5298_s14 = smov %s5295_s27 }
 0x386   :  { %25 = sbr.rel (!%p23_p10) target bundleno = 5 (0x5), region = 110 }
 0x38b   :  { %3414 = vsyncpa [#allocation5], 1 }
 0x38c   :  { %3416 = vsyncpa [#allocation5 + $0x1], 1 }
 0x38d   :  { %3417 = vsyncpa [#allocation6], 1 }
 0x38e   :  { %3419 = vsyncpa [#allocation6 + $0x1], 1 }

</bundles_post_ra>
